<compile_context>
chip_gen: v7x
topology: tpu7x:2x2x1
jax: 0.10.0
libtpu: 0.0.40
codegen_flags: <defaults>
</compile_context>

<pallas_src>
import math

import jax
import jax.numpy as jnp
from jax.experimental import pallas as pl
from jax.experimental.pallas import tpu as pltpu

# ---- small synthetic config standing in for trocr-small-handwritten decoder ----
VOCAB = 512          # real: ~64044 (pad to a multiple of LM_TILE_N for the real size)
D_MODEL = 128        # real: 256
N_HEADS = 4          # real: 8
HEAD_DIM = D_MODEL // N_HEADS
FFN_DIM = 256        # real: 1024
N_LAYERS = 2         # real: 6
MAX_LEN = 16         # real: 32
ENC_LEN = 24         # real: 197
ENC_PAD = 128        # keys padded to a lane-dense multiple of 128 (real: 197 -> 256)
POS_OFFSET = 2       # TrOCRLearnedPositionalEmbedding offset
EMBED_SCALE = math.sqrt(D_MODEL)   # scale_embedding=True
LN_EPS = 1e-5

# lm_head vocab tile: whole vocab in one step for the synthetic size; 4096
# (256-multiple, ~1 MB bf16 weight tile) for a real ~64k vocab.
LM_TILE_N = VOCAB if VOCAB <= 4096 else 4096
assert VOCAB % LM_TILE_N == 0
assert FFN_DIM % 128 == 0 and FFN_DIM <= 3 * D_MODEL

# ---- packed per-layer parameter layout ----
# wpack columns (bf16, rows = D_MODEL):
C_QKV = 0                       # width 3*D  : fused Q/K/V projection
C_CQ = 3 * D_MODEL              # width   D  : cross-attn Q projection
C_CKV = 4 * D_MODEL             # width 2*D  : fused cross-attn K/V projection
C_FC1 = 6 * D_MODEL             # width FFN  : FFN first matmul
WPACK_COLS = 6 * D_MODEL + FFN_DIM
# wrows rows (bf16, cols = D_MODEL):
RW_OUT = 0                      # D rows     : self-attn output projection
RW_COUT = D_MODEL               # D rows     : cross-attn output projection
RW_FC2 = 2 * D_MODEL            # FFN rows   : FFN second matmul
WROWS_ROWS = 2 * D_MODEL + FFN_DIM
# smallpack rows (f32, cols = 3*D): biases + LN params (+ embed-LN in layer 0)
R_BQKV, R_BOUT, R_BCQ, R_BCKV, R_BCOUT, R_BFC1, R_BFC2 = 0, 1, 2, 3, 4, 5, 6
R_LN1G, R_LN1B, R_LN2G, R_LN2B, R_LN3G, R_LN3B = 7, 8, 9, 10, 11, 12
R_EMBG, R_EMBB = 13, 14
SP_ROWS = 16
SP_COLS = 3 * D_MODEL


# ----------------------------- in-kernel helpers -----------------------------

def _mm(x_f32, w_bf16):
    """bf16 MXU matmul with f32 accumulation."""
    return jnp.dot(x_f32.astype(jnp.bfloat16), w_bf16,
                   preferred_element_type=jnp.float32)


def _ln(x, g, b):
    """LayerNorm in f32; g, b are (1, D)."""
    mu = jnp.mean(x, axis=-1, keepdims=True)
    var = jnp.mean(jnp.square(x - mu), axis=-1, keepdims=True)
    return (x - mu) * jax.lax.rsqrt(var + LN_EPS) * g + b


def _attention(q, k, v, wrows_ref, wo_row, *, causal, kv_len):
    """Multi-head attention + output projection, entirely in VMEM.

    q: (Tq, D) f32, k/v: (Tk, D) f32.  Each head's PV result is immediately
    folded through its (Dh, D) row-block of the output projection weight
    (wrows_ref[0, wo_row + h*Dh : ..., :]) and accumulated into a lane-dense
    (Tq, D) f32 output -- no per-head concatenate, no held-live head outputs.
    Returns the projected context (output-projection bias NOT included).
    """
    tq, tk = q.shape[0], k.shape[0]
    scale = 1.0 / math.sqrt(HEAD_DIM)

    keep = None
    if causal:
        row = jax.lax.broadcasted_iota(jnp.int32, (tq, tk), 0)
        col = jax.lax.broadcasted_iota(jnp.int32, (tq, tk), 1)
        keep = row >= col
    elif kv_len is not None and kv_len < tk:
        col = jax.lax.broadcasted_iota(jnp.int32, (tq, tk), 1)
        keep = col < kv_len                      # mask padded encoder keys

    out = jnp.zeros((tq, D_MODEL), jnp.float32)
    for h in range(N_HEADS):                     # static unroll; H is small
        sl = slice(h * HEAD_DIM, (h + 1) * HEAD_DIM)
        qh = (q[:, sl] * scale).astype(jnp.bfloat16)
        kh = k[:, sl].astype(jnp.bfloat16)
        vh = v[:, sl].astype(jnp.bfloat16)
        s = jax.lax.dot_general(qh, kh, (((1,), (1,)), ((), ())),
                                preferred_element_type=jnp.float32)
        if keep is not None:
            s = jnp.where(keep, s, -1e30)
        m = jnp.max(s, axis=-1, keepdims=True)
        p = jnp.exp(s - m)
        # approx reciprocal runs on the EUP slot; not bit-identical to a divide.
        p = p * pl.reciprocal(jnp.sum(p, axis=-1, keepdims=True), approx=True)
        pv = jnp.dot(p.astype(jnp.bfloat16), vh,
                     preferred_element_type=jnp.float32)         # (Tq, Dh)
        wo_h = wrows_ref[0, wo_row + h * HEAD_DIM:wo_row + (h + 1) * HEAD_DIM, :]
        out = out + jnp.dot(pv.astype(jnp.bfloat16), wo_h,
                            preferred_element_type=jnp.float32)   # (Tq, D)
    return out


# ----------------------------- fused decoder-stack kernel -----------------------------

def _decoder_stack_kernel(h0_ref, enc_ref, wpack_ref, wrows_ref, sp_ref, h_ref):
    """grid=(N_LAYERS,).  h_ref is the resident (T, D) activation (same block
    index every step), so the hidden state never leaves VMEM between layers."""
    layer = pl.program_id(0)

    @pl.when(layer == 0)
    def _():
        # embedding LayerNorm, once; params ride in layer 0's smallpack
        h_ref[...] = _ln(h0_ref[...],
                         sp_ref[0, R_EMBG:R_EMBG + 1, 0:D_MODEL],
                         sp_ref[0, R_EMBB:R_EMBB + 1, 0:D_MODEL])

    h = h_ref[...]                                        # (T, D) f32

    # --- causal self-attention (fused QKV proj) + residual + post-LN ---
    qkv = (_mm(h, wpack_ref[0, :, C_QKV:C_QKV + 3 * D_MODEL])
           + sp_ref[0, R_BQKV:R_BQKV + 1, 0:3 * D_MODEL])          # (T, 3D)
    q = qkv[:, :D_MODEL]
    k = qkv[:, D_MODEL:2 * D_MODEL]
    v = qkv[:, 2 * D_MODEL:]
    ctx = _attention(q, k, v, wrows_ref, RW_OUT, causal=True, kv_len=None)
    h = _ln(h + ctx + sp_ref[0, R_BOUT:R_BOUT + 1, 0:D_MODEL],
            sp_ref[0, R_LN1G:R_LN1G + 1, 0:D_MODEL],
            sp_ref[0, R_LN1B:R_LN1B + 1, 0:D_MODEL])

    # --- cross-attention over (padded) encoder states (fused KV proj) ---
    q = (_mm(h, wpack_ref[0, :, C_CQ:C_CQ + D_MODEL])
         + sp_ref[0, R_BCQ:R_BCQ + 1, 0:D_MODEL])
    kv = (jnp.dot(enc_ref[...], wpack_ref[0, :, C_CKV:C_CKV + 2 * D_MODEL],
                  preferred_element_type=jnp.float32)
          + sp_ref[0, R_BCKV:R_BCKV + 1, 0:2 * D_MODEL])            # (ENC_PAD, 2D)
    k = kv[:, :D_MODEL]
    v = kv[:, D_MODEL:]
    ctx = _attention(q, k, v, wrows_ref, RW_COUT, causal=False, kv_len=ENC_LEN)
    h = _ln(h + ctx + sp_ref[0, R_BCOUT:R_BCOUT + 1, 0:D_MODEL],
            sp_ref[0, R_LN2G:R_LN2G + 1, 0:D_MODEL],
            sp_ref[0, R_LN2B:R_LN2B + 1, 0:D_MODEL])

    # --- FFN (fc1 -> relu -> fc2) + residual + post-LN ---
    ff = jnp.maximum(_mm(h, wpack_ref[0, :, C_FC1:C_FC1 + FFN_DIM])
                     + sp_ref[0, R_BFC1:R_BFC1 + 1, 0:FFN_DIM], 0.0)
    h = _ln(h + _mm(ff, wrows_ref[0, RW_FC2:RW_FC2 + FFN_DIM, :])
            + sp_ref[0, R_BFC2:R_BFC2 + 1, 0:D_MODEL],
            sp_ref[0, R_LN3G:R_LN3G + 1, 0:D_MODEL],
            sp_ref[0, R_LN3B:R_LN3B + 1, 0:D_MODEL])

    h_ref[...] = h


def _stack_cost_estimate():
    T, D, F, E = MAX_LEN, D_MODEL, FFN_DIM, ENC_PAD
    per_layer = (2 * T * D * 3 * D            # qkv proj
                 + 2 * T * T * D * 2          # self scores + pv (summed over heads)
                 + 2 * T * D * D              # self out proj
                 + 2 * T * D * D              # cross q proj
                 + 2 * E * D * 2 * D          # cross kv proj
                 + 2 * T * E * D * 2          # cross scores + pv
                 + 2 * T * D * D              # cross out proj
                 + 2 * T * D * F + 2 * T * F * D)   # ffn
    trans = N_LAYERS * (T * T * N_HEADS + T * E * N_HEADS)   # softmax exps
    params_bytes = N_LAYERS * (D * WPACK_COLS * 2 + WROWS_ROWS * D * 2
                               + SP_ROWS * SP_COLS * 4)
    act_bytes = 2 * T * D * 4 + E * D * 2
    return pl.CostEstimate(flops=N_LAYERS * per_layer, transcendentals=trans,
                           bytes_accessed=params_bytes + act_bytes)


def decoder_stack(h0, enc_pad_bf16, params):
    T, D = h0.shape
    return pl.pallas_call(
        _decoder_stack_kernel,
        out_shape=jax.ShapeDtypeStruct((T, D), jnp.float32),
        grid=(N_LAYERS,),
        in_specs=[
            pl.BlockSpec((T, D), lambda l: (0, 0)),                  # h0 (pre-LN emb)
            pl.BlockSpec((ENC_PAD, D), lambda l: (0, 0)),            # padded encoder (bf16)
            pl.BlockSpec((1, D, WPACK_COLS), lambda l: (l, 0, 0)),   # packed col-weights
            pl.BlockSpec((1, WROWS_ROWS, D), lambda l: (l, 0, 0)),   # packed row-weights
            pl.BlockSpec((1, SP_ROWS, SP_COLS), lambda l: (l, 0, 0)),  # biases + LN params
        ],
        out_specs=pl.BlockSpec((T, D), lambda l: (0, 0)),
        compiler_params=pltpu.CompilerParams(
            dimension_semantics=("arbitrary",)),
        cost_estimate=_stack_cost_estimate(),
    )(h0, enc_pad_bf16, params["wpack"], params["wrows"], params["smallpack"])


# ----------------------------- lm_head kernel (vocab-tiled) -----------------------------

def _lm_head_kernel(h_ref, w_ref, o_ref):
    # h already bf16 (cast once in the wrapper, not per vocab tile)
    o_ref[...] = jnp.dot(h_ref[...], w_ref[...],
                         preferred_element_type=jnp.float32)


def lm_head(h_bf16, w_bf16):
    """h: (T, D) bf16; w: (D, VOCAB) bf16 -> (T, VOCAB) f32. No bias."""
    T, D = h_bf16.shape
    V = w_bf16.shape[1]
    cost = pl.CostEstimate(flops=2 * T * D * V, transcendentals=0,
                           bytes_accessed=T * D * 2 + D * V * 2 + T * V * 4)
    return pl.pallas_call(
        _lm_head_kernel,
        out_shape=jax.ShapeDtypeStruct((T, V), jnp.float32),
        grid=(V // LM_TILE_N,),
        in_specs=[
            pl.BlockSpec((T, D), lambda j: (0, 0)),
            # For the real ~64k vocab the grid has many steps; the "parallel"
            # axis shards them across v7x's two TensorCores.  Weight tile at
            # LM_TILE_N=4096 is 2 MB bf16 (x2 double-buffered), well inside the
            # scoped-VMEM default on all generations.
            pl.BlockSpec((D, LM_TILE_N), lambda j: (0, j)),
        ],
        out_specs=pl.BlockSpec((T, LM_TILE_N), lambda j: (0, j)),
        compiler_params=pltpu.CompilerParams(
            dimension_semantics=("parallel",)),
        cost_estimate=cost,
    )(h_bf16, w_bf16)


# ----------------------------- parameters -----------------------------

def init_params(key):
    ks = jax.random.split(key, 4)

    def nrm(k, shape):
        return jax.random.normal(k, shape, jnp.float32) * 0.02

    embed_tokens = nrm(ks[0], (VOCAB, D_MODEL))
    embed_positions = nrm(ks[1], (MAX_LEN + POS_OFFSET, D_MODEL))
    lm_head_w = nrm(ks[2], (D_MODEL, VOCAB)).astype(jnp.bfloat16)

    layer_keys = jax.random.split(ks[3], N_LAYERS)
    wpacks, wrows_list, sps = [], [], []
    ones_d = jnp.ones((D_MODEL,), jnp.float32)
    for li in range(N_LAYERS):
        lk = jax.random.split(layer_keys[li], 14)
        wqkv = nrm(lk[0], (D_MODEL, 3 * D_MODEL)); bqkv = nrm(lk[1], (3 * D_MODEL,))
        wout = nrm(lk[2], (D_MODEL, D_MODEL));     bout = nrm(lk[3], (D_MODEL,))
        wcq = nrm(lk[4], (D_MODEL, D_MODEL));      bcq = nrm(lk[5], (D_MODEL,))
        wckv = nrm(lk[6], (D_MODEL, 2 * D_MODEL)); bckv = nrm(lk[7], (2 * D_MODEL,))
        wcout = nrm(lk[8], (D_MODEL, D_MODEL));    bcout = nrm(lk[9], (D_MODEL,))
        wfc1 = nrm(lk[10], (D_MODEL, FFN_DIM));    bfc1 = nrm(lk[11], (FFN_DIM,))
        wfc2 = nrm(lk[12], (FFN_DIM, D_MODEL));    bfc2 = nrm(lk[13], (D_MODEL,))

        # column-packed weights (contraction dim = D rows)
        wpack = jnp.concatenate([wqkv, wcq, wckv, wfc1], axis=1)      # (D, 6D+FFN)
        # row-packed weights (output projections head-sliceable by rows + fc2)
        wrows = jnp.concatenate([wout, wcout, wfc2], axis=0)          # (2D+FFN, D)

        sp = jnp.zeros((SP_ROWS, SP_COLS), jnp.float32)

        def put(a, row, vec):
            return a.at[row, :vec.shape[0]].set(vec)

        sp = put(sp, R_BQKV, bqkv); sp = put(sp, R_BOUT, bout)
        sp = put(sp, R_BCQ, bcq);   sp = put(sp, R_BCKV, bckv)
        sp = put(sp, R_BCOUT, bcout)
        sp = put(sp, R_BFC1, bfc1); sp = put(sp, R_BFC2, bfc2)
        sp = put(sp, R_LN1G, ones_d)   # gammas = 1, betas stay 0
        sp = put(sp, R_LN2G, ones_d)
        sp = put(sp, R_LN3G, ones_d)
        if li == 0:
            sp = put(sp, R_EMBG, ones_d)   # embedding LN (beta stays 0)

        wpacks.append(wpack.astype(jnp.bfloat16))
        wrows_list.append(wrows.astype(jnp.bfloat16))
        sps.append(sp)

    return {
        "embed_tokens": embed_tokens,
        "embed_positions": embed_positions,
        "lm_head": lm_head_w,
        "wpack": jnp.stack(wpacks),        # (L, D, 6D+FFN)     bf16
        "wrows": jnp.stack(wrows_list),    # (L, 2D+FFN, D)     bf16
        "smallpack": jnp.stack(sps),       # (L, 16, 3D)        f32
    }


# ----------------------------- forward pass -----------------------------

def decoder_forward(params, decoder_input_ids, encoder_hidden_states):
    """decoder_input_ids: (1, MAX_LEN) int32;
    encoder_hidden_states: (1, ENC_LEN, D_MODEL) f32 -> logits (1, MAX_LEN, VOCAB)."""
    ids = decoder_input_ids[0]
    enc = encoder_hidden_states[0]
    # lane-dense cross-attention keys: pad to ENC_PAD and mask inside the kernel
    enc_pad = jnp.pad(enc, ((0, ENC_PAD - ENC_LEN), (0, 0))).astype(jnp.bfloat16)

    # embedding gathers stay in plain JAX glue
    tok = jnp.take(params["embed_tokens"], ids, axis=0) * EMBED_SCALE
    positions = jnp.arange(MAX_LEN, dtype=jnp.int32) + POS_OFFSET
    pos = jnp.take(params["embed_positions"], positions, axis=0)
    h0 = tok + pos                                   # LN happens inside the kernel

    h = decoder_stack(h0, enc_pad, params)           # one fused pallas_call
    logits = lm_head(h.astype(jnp.bfloat16), params["lm_head"])
    return logits[None]                              # add back batch dim

    # TODO(synk): incremental decoding with an aliased KV cache
    # (input_output_aliases) and folding real batch into the row dim of h
    # (M -> 128-256) are the serving-path follow-ups; this implements the
    # batch-1 full-sequence forward matching the PyTorch DecoderWrapper spec.


if __name__ == "__main__":
    key = jax.random.PRNGKey(0)
    params = init_params(key)

    # mirrors the PyTorch script: ids of ones, encoder_hidden_states of ones
    decoder_input_ids = jnp.ones((1, MAX_LEN), dtype=jnp.int32)
    encoder_hidden_states = jnp.ones((1, ENC_LEN, D_MODEL), dtype=jnp.float32)

    logits = jax.jit(decoder_forward)(params, decoder_input_ids, encoder_hidden_states)
    logits = jax.block_until_ready(logits)
    assert logits.shape == (1, MAX_LEN, VOCAB)
    assert bool(jnp.all(jnp.isfinite(logits)))
    print("KERNEL_OK")
</pallas_src>

<mosaic_0001>
module attributes {stable_mosaic.version = 11 : i64} {
  func.func @_lm_head_kernel(%arg0: i32, %arg1: memref<16x128xbf16, #tpu.memory_space<vmem>>, %arg2: memref<128x512xbf16, #tpu.memory_space<vmem>>, %arg3: memref<16x512xf32, #tpu.memory_space<vmem>>) attributes {dimension_semantics = [#tpu.dimension_semantics<parallel>], iteration_bounds = array<i64: 1>, scalar_prefetch = 0 : i64, scratch_operands = 0 : i64, tpu.core_type = #tpu.core_type<tc>, window_params = [{pipeline_mode = #tpu.pipeline_mode<synchronous>, transform_indices = @transform_0, window_bounds = array<i64: 16, 128>}, {transform_indices = @transform_1, window_bounds = array<i64: 128, 512>}, {transform_indices = @transform_2, window_bounds = array<i64: 16, 512>}]} {
    %c0 = arith.constant 0 : index
    %c0_0 = arith.constant 0 : index
    %0 = vector.load %arg1[%c0, %c0_0] : memref<16x128xbf16, #tpu.memory_space<vmem>>, vector<16x128xbf16>
    %c0_1 = arith.constant 0 : index
    %c0_2 = arith.constant 0 : index
    %1 = vector.load %arg2[%c0_1, %c0_2] : memref<128x512xbf16, #tpu.memory_space<vmem>>, vector<128x512xbf16>
    %cst = arith.constant dense<0.000000e+00> : vector<16x512xf32>
    %2 = tpu.matmul %0, %1, %cst {dimension_numbers = #tpu.dot_dimension_numbers<[1], [0], [0], [1], [0, 0, 1, 1], [], []>} : vector<16x128xbf16>, vector<128x512xbf16>, vector<16x512xf32> -> vector<16x512xf32>
    %c0_3 = arith.constant 0 : index
    %c0_4 = arith.constant 0 : index
    %3 = vector.load %arg3[%c0_3, %c0_4] : memref<16x512xf32, #tpu.memory_space<vmem>>, vector<16x512xf32>
    tpu.vector_store %arg3[%c0_3, %c0_4], %2 {strides = array<i32>} : memref<16x512xf32, #tpu.memory_space<vmem>>, vector<16x512xf32>,
    return
  }
  func.func @transform_0(%arg0: i32) -> (i32, i32) {
    %c0_i32 = arith.constant 0 : i32
    %c0_i32_0 = arith.constant 0 : i32
    %c0_i32_1 = arith.constant 0 : i32
    return %c0_i32, %c0_i32_0 : i32, i32
  }
  func.func @transform_1(%arg0: i32) -> (i32, i32) {
    %c0_i32 = arith.constant 0 : i32
    %c0_i32_0 = arith.constant 0 : i32
    return %c0_i32, %arg0 : i32, i32
  }
  func.func @transform_2(%arg0: i32) -> (i32, i32) {
    %c0_i32 = arith.constant 0 : i32
    %c0_i32_0 = arith.constant 0 : i32
    return %c0_i32, %arg0 : i32, i32
  }
}

module attributes {stable_mosaic.version = 11 : i64} {
  func.func @_decoder_stack_kernel(%arg0: i32, %arg1: memref<16x128xf32, #tpu.memory_space<vmem>>, %arg2: memref<128x128xbf16, #tpu.memory_space<vmem>>, %arg3: memref<1x128x1024xbf16, #tpu.memory_space<vmem>>, %arg4: memref<1x512x128xbf16, #tpu.memory_space<vmem>>, %arg5: memref<1x16x384xf32, #tpu.memory_space<vmem>>, %arg6: memref<16x128xf32, #tpu.memory_space<vmem>>) attributes {dimension_semantics = [#tpu.dimension_semantics<arbitrary>], iteration_bounds = array<i64: 2>, scalar_prefetch = 0 : i64, scratch_operands = 0 : i64, tpu.core_type = #tpu.core_type<tc>, window_params = [{pipeline_mode = #tpu.pipeline_mode<synchronous>, transform_indices = @transform_0, window_bounds = array<i64: 16, 128>}, {pipeline_mode = #tpu.pipeline_mode<synchronous>, transform_indices = @transform_1, window_bounds = array<i64: 128, 128>}, {transform_indices = @transform_2, window_bounds = array<i64: 1, 128, 1024>}, {transform_indices = @transform_3, window_bounds = array<i64: 1, 512, 128>}, {transform_indices = @transform_4, window_bounds = array<i64: 1, 16, 384>}, {pipeline_mode = #tpu.pipeline_mode<synchronous>, transform_indices = @transform_5, window_bounds = array<i64: 16, 128>}]} {
    %c0_i32 = arith.constant 0 : i32
    %0 = arith.cmpi eq, %arg0, %c0_i32 : i32
    %1 = arith.extui %0 : i1 to i32
    %c0_i32_0 = arith.constant 0 : i32
    %2 = arith.cmpi ne, %1, %c0_i32_0 : i32
    scf.if %2 {
      %c0_139 = arith.constant 0 : index
      %c0_140 = arith.constant 0 : index
      %373 = vector.load %arg1[%c0_139, %c0_140] : memref<16x128xf32, #tpu.memory_space<vmem>>, vector<16x128xf32>
      %c0_141 = arith.constant 0 : index
      %c13 = arith.constant 13 : index
      %c0_142 = arith.constant 0 : index
      %374 = vector.load %arg5[%c0_141, %c13, %c0_142] : memref<1x16x384xf32, #tpu.memory_space<vmem>>, vector<1x1x128xf32>
      %375 = vector.shape_cast %374 : vector<1x1x128xf32> to vector<1x128xf32>
      %c0_143 = arith.constant 0 : index
      %c14 = arith.constant 14 : index
      %c0_144 = arith.constant 0 : index
      %376 = vector.load %arg5[%c0_143, %c14, %c0_144] : memref<1x16x384xf32, #tpu.memory_space<vmem>>, vector<1x1x128xf32>
      %377 = vector.shape_cast %376 : vector<1x1x128xf32> to vector<1x128xf32>
      %cst_145 = arith.constant dense<0.000000e+00> : vector<16xf32>
      %378 = vector.multi_reduction <add>, %373, %cst_145 [1] : vector<16x128xf32> to vector<16xf32>
      %379 = vector.shape_cast %378 : vector<16xf32> to vector<16x1xf32>
      %cst_146 = arith.constant 1.280000e+02 : f32
      %380 = vector.broadcast %cst_146 : f32 to vector<16x1xf32>
      %381 = arith.divf %379, %380 : vector<16x1xf32>
      %382 = vector.broadcast %381 : vector<16x1xf32> to vector<16x128xf32>
      %383 = arith.subf %373, %382 : vector<16x128xf32>
      %384 = arith.mulf %383, %383 : vector<16x128xf32>
      %cst_147 = arith.constant dense<0.000000e+00> : vector<16xf32>
      %385 = vector.multi_reduction <add>, %384, %cst_147 [1] : vector<16x128xf32> to vector<16xf32>
      %386 = vector.shape_cast %385 : vector<16xf32> to vector<16x1xf32>
      %cst_148 = arith.constant 1.280000e+02 : f32
      %387 = vector.broadcast %cst_148 : f32 to vector<16x1xf32>
      %388 = arith.divf %386, %387 : vector<16x1xf32>
      %389 = vector.broadcast %381 : vector<16x1xf32> to vector<16x128xf32>
      %390 = arith.subf %373, %389 : vector<16x128xf32>
      %cst_149 = arith.constant 9.99999974E-6 : f32
      %391 = vector.broadcast %cst_149 : f32 to vector<16x1xf32>
      %392 = arith.addf %388, %391 : vector<16x1xf32>
      %393 = math.rsqrt %392 : vector<16x1xf32>
      %394 = vector.broadcast %393 : vector<16x1xf32> to vector<16x128xf32>
      %395 = arith.mulf %390, %394 : vector<16x128xf32>
      %396 = vector.broadcast %375 : vector<1x128xf32> to vector<16x128xf32>
      %397 = arith.mulf %395, %396 : vector<16x128xf32>
      %398 = vector.broadcast %377 : vector<1x128xf32> to vector<16x128xf32>
      %399 = arith.addf %397, %398 : vector<16x128xf32>
      %c0_150 = arith.constant 0 : index
      %c0_151 = arith.constant 0 : index
      %400 = vector.load %arg6[%c0_150, %c0_151] : memref<16x128xf32, #tpu.memory_space<vmem>>, vector<16x128xf32>
      tpu.vector_store %arg6[%c0_150, %c0_151], %399 {strides = array<i32>} : memref<16x128xf32, #tpu.memory_space<vmem>>, vector<16x128xf32>,
    } else {
    }
    %c0 = arith.constant 0 : index
    %c0_1 = arith.constant 0 : index
    %3 = vector.load %arg6[%c0, %c0_1] : memref<16x128xf32, #tpu.memory_space<vmem>>, vector<16x128xf32>
    %c0_2 = arith.constant 0 : index
    %c0_3 = arith.constant 0 : index
    %c0_4 = arith.constant 0 : index
    %4 = vector.load %arg3[%c0_2, %c0_3, %c0_4] : memref<1x128x1024xbf16, #tpu.memory_space<vmem>>, vector<1x128x384xbf16>
    %5 = vector.shape_cast %4 : vector<1x128x384xbf16> to vector<128x384xbf16>
    %6 = arith.truncf %3 : vector<16x128xf32> to vector<16x128xbf16>
    %cst = arith.constant dense<0.000000e+00> : vector<16x384xf32>
    %7 = tpu.matmul %6, %5, %cst {dimension_numbers = #tpu.dot_dimension_numbers<[1], [0], [0], [1], [0, 0, 1, 1], [], []>} : vector<16x128xbf16>, vector<128x384xbf16>, vector<16x384xf32> -> vector<16x384xf32>
    %c0_5 = arith.constant 0 : index
    %c0_6 = arith.constant 0 : index
    %c0_7 = arith.constant 0 : index
    %8 = vector.load %arg5[%c0_5, %c0_6, %c0_7] : memref<1x16x384xf32, #tpu.memory_space<vmem>>, vector<1x1x384xf32>
    %9 = vector.shape_cast %8 : vector<1x1x384xf32> to vector<1x384xf32>
    %10 = vector.broadcast %9 : vector<1x384xf32> to vector<16x384xf32>
    %11 = arith.addf %7, %10 : vector<16x384xf32>
    %12 = vector.extract_strided_slice %11 {offsets = [0, 0], sizes = [16, 128], strides = [1, 1]} : vector<16x384xf32> to vector<16x128xf32>
    %13 = vector.extract_strided_slice %11 {offsets = [0, 128], sizes = [16, 128], strides = [1, 1]} : vector<16x384xf32> to vector<16x128xf32>
    %14 = vector.extract_strided_slice %11 {offsets = [0, 256], sizes = [16, 128], strides = [1, 1]} : vector<16x384xf32> to vector<16x128xf32>
    %15 = tpu.iota {dimensions = array<i32: 0>} : vector<16x16xi32>
    %16 = tpu.iota {dimensions = array<i32: 1>} : vector<16x16xi32>
    %17 = arith.cmpi sge, %15, %16 : vector<16x16xi32>
    %cst_8 = arith.constant 0.000000e+00 : f32
    %18 = vector.broadcast %cst_8 : f32 to vector<16x128xf32>
    %19 = vector.extract_strided_slice %12 {offsets = [0, 0], sizes = [16, 32], strides = [1, 1]} : vector<16x128xf32> to vector<16x32xf32>
    %cst_9 = arith.constant 0.176776692 : f32
    %20 = vector.broadcast %cst_9 : f32 to vector<16x32xf32>
    %21 = arith.mulf %19, %20 : vector<16x32xf32>
    %22 = arith.truncf %21 : vector<16x32xf32> to vector<16x32xbf16>
    %23 = vector.extract_strided_slice %13 {offsets = [0, 0], sizes = [16, 32], strides = [1, 1]} : vector<16x128xf32> to vector<16x32xf32>
    %24 = arith.truncf %23 : vector<16x32xf32> to vector<16x32xbf16>
    %25 = vector.extract_strided_slice %14 {offsets = [0, 0], sizes = [16, 32], strides = [1, 1]} : vector<16x128xf32> to vector<16x32xf32>
    %26 = arith.truncf %25 : vector<16x32xf32> to vector<16x32xbf16>
    %cst_10 = arith.constant dense<0.000000e+00> : vector<16x16xf32>
    %27 = tpu.matmul %22, %24, %cst_10 {dimension_numbers = #tpu.dot_dimension_numbers<[1], [1], [0], [0], [0, 0, 1, 0], [], []>} : vector<16x32xbf16>, vector<16x32xbf16>, vector<16x16xf32> -> vector<16x16xf32>
    %cst_11 = arith.constant -1.000000e+30 : f32
    %28 = vector.broadcast %cst_11 : f32 to vector<16x16xf32>
    %29 = arith.select %17, %27, %28 : vector<16x16xi1>, vector<16x16xf32>
    %cst_12 = arith.constant dense<0xFF800000> : vector<16xf32>
    %30 = vector.multi_reduction <maximumf>, %29, %cst_12 [1] : vector<16x16xf32> to vector<16xf32>
    %31 = vector.shape_cast %30 : vector<16xf32> to vector<16x1xf32>
    %32 = vector.broadcast %31 : vector<16x1xf32> to vector<16x16xf32>
    %33 = arith.subf %29, %32 : vector<16x16xf32>
    %34 = math.exp %33 : vector<16x16xf32>
    %cst_13 = arith.constant dense<0.000000e+00> : vector<16xf32>
    %35 = vector.multi_reduction <add>, %34, %cst_13 [1] : vector<16x16xf32> to vector<16xf32>
    %36 = vector.shape_cast %35 : vector<16xf32> to vector<16x1xf32>
    %37 = tpu.reciprocal %36 {approx = true} : vector<16x1xf32> -> vector<16x1xf32>
    %38 = vector.broadcast %37 : vector<16x1xf32> to vector<16x16xf32>
    %39 = arith.mulf %34, %38 : vector<16x16xf32>
    %40 = arith.truncf %39 : vector<16x16xf32> to vector<16x16xbf16>
    %cst_14 = arith.constant dense<0.000000e+00> : vector<16x32xf32>
    %41 = tpu.matmul %40, %26, %cst_14 {dimension_numbers = #tpu.dot_dimension_numbers<[1], [0], [0], [1], [0, 0, 1, 1], [], []>} : vector<16x16xbf16>, vector<16x32xbf16>, vector<16x32xf32> -> vector<16x32xf32>
    %c0_15 = arith.constant 0 : index
    %c0_16 = arith.constant 0 : index
    %c0_17 = arith.constant 0 : index
    %42 = vector.load %arg4[%c0_15, %c0_16, %c0_17] : memref<1x512x128xbf16, #tpu.memory_space<vmem>>, vector<1x32x128xbf16>
    %43 = vector.shape_cast %42 : vector<1x32x128xbf16> to vector<32x128xbf16>
    %44 = arith.truncf %41 : vector<16x32xf32> to vector<16x32xbf16>
    %cst_18 = arith.constant dense<0.000000e+00> : vector<16x128xf32>
    %45 = tpu.matmul %44, %43, %cst_18 {dimension_numbers = #tpu.dot_dimension_numbers<[1], [0], [0], [1], [0, 0, 1, 1], [], []>} : vector<16x32xbf16>, vector<32x128xbf16>, vector<16x128xf32> -> vector<16x128xf32>
    %46 = arith.addf %18, %45 : vector<16x128xf32>
    %47 = vector.extract_strided_slice %12 {offsets = [0, 32], sizes = [16, 32], strides = [1, 1]} : vector<16x128xf32> to vector<16x32xf32>
    %cst_19 = arith.constant 0.176776692 : f32
    %48 = vector.broadcast %cst_19 : f32 to vector<16x32xf32>
    %49 = arith.mulf %47, %48 : vector<16x32xf32>
    %50 = arith.truncf %49 : vector<16x32xf32> to vector<16x32xbf16>
    %51 = vector.extract_strided_slice %13 {offsets = [0, 32], sizes = [16, 32], strides = [1, 1]} : vector<16x128xf32> to vector<16x32xf32>
    %52 = arith.truncf %51 : vector<16x32xf32> to vector<16x32xbf16>
    %53 = vector.extract_strided_slice %14 {offsets = [0, 32], sizes = [16, 32], strides = [1, 1]} : vector<16x128xf32> to vector<16x32xf32>
    %54 = arith.truncf %53 : vector<16x32xf32> to vector<16x32xbf16>
    %cst_20 = arith.constant dense<0.000000e+00> : vector<16x16xf32>
    %55 = tpu.matmul %50, %52, %cst_20 {dimension_numbers = #tpu.dot_dimension_numbers<[1], [1], [0], [0], [0, 0, 1, 0], [], []>} : vector<16x32xbf16>, vector<16x32xbf16>, vector<16x16xf32> -> vector<16x16xf32>
    %cst_21 = arith.constant -1.000000e+30 : f32
    %56 = vector.broadcast %cst_21 : f32 to vector<16x16xf32>
    %57 = arith.select %17, %55, %56 : vector<16x16xi1>, vector<16x16xf32>
    %cst_22 = arith.constant dense<0xFF800000> : vector<16xf32>
    %58 = vector.multi_reduction <maximumf>, %57, %cst_22 [1] : vector<16x16xf32> to vector<16xf32>
    %59 = vector.shape_cast %58 : vector<16xf32> to vector<16x1xf32>
    %60 = vector.broadcast %59 : vector<16x1xf32> to vector<16x16xf32>
    %61 = arith.subf %57, %60 : vector<16x16xf32>
    %62 = math.exp %61 : vector<16x16xf32>
    %cst_23 = arith.constant dense<0.000000e+00> : vector<16xf32>
    %63 = vector.multi_reduction <add>, %62, %cst_23 [1] : vector<16x16xf32> to vector<16xf32>
    %64 = vector.shape_cast %63 : vector<16xf32> to vector<16x1xf32>
    %65 = tpu.reciprocal %64 {approx = true} : vector<16x1xf32> -> vector<16x1xf32>
    %66 = vector.broadcast %65 : vector<16x1xf32> to vector<16x16xf32>
    %67 = arith.mulf %62, %66 : vector<16x16xf32>
    %68 = arith.truncf %67 : vector<16x16xf32> to vector<16x16xbf16>
    %cst_24 = arith.constant dense<0.000000e+00> : vector<16x32xf32>
    %69 = tpu.matmul %68, %54, %cst_24 {dimension_numbers = #tpu.dot_dimension_numbers<[1], [0], [0], [1], [0, 0, 1, 1], [], []>} : vector<16x16xbf16>, vector<16x32xbf16>, vector<16x32xf32> -> vector<16x32xf32>
    %c0_25 = arith.constant 0 : index
    %c32 = arith.constant 32 : index
    %c0_26 = arith.constant 0 : index
    %70 = vector.load %arg4[%c0_25, %c32, %c0_26] : memref<1x512x128xbf16, #tpu.memory_space<vmem>>, vector<1x32x128xbf16>
    %71 = vector.shape_cast %70 : vector<1x32x128xbf16> to vector<32x128xbf16>
    %72 = arith.truncf %69 : vector<16x32xf32> to vector<16x32xbf16>
    %cst_27 = arith.constant dense<0.000000e+00> : vector<16x128xf32>
    %73 = tpu.matmul %72, %71, %cst_27 {dimension_numbers = #tpu.dot_dimension_numbers<[1], [0], [0], [1], [0, 0, 1, 1], [], []>} : vector<16x32xbf16>, vector<32x128xbf16>, vector<16x128xf32> -> vector<16x128xf32>
    %74 = arith.addf %46, %73 : vector<16x128xf32>
    %75 = vector.extract_strided_slice %12 {offsets = [0, 64], sizes = [16, 32], strides = [1, 1]} : vector<16x128xf32> to vector<16x32xf32>
    %cst_28 = arith.constant 0.176776692 : f32
    %76 = vector.broadcast %cst_28 : f32 to vector<16x32xf32>
    %77 = arith.mulf %75, %76 : vector<16x32xf32>
    %78 = arith.truncf %77 : vector<16x32xf32> to vector<16x32xbf16>
    %79 = vector.extract_strided_slice %13 {offsets = [0, 64], sizes = [16, 32], strides = [1, 1]} : vector<16x128xf32> to vector<16x32xf32>
    %80 = arith.truncf %79 : vector<16x32xf32> to vector<16x32xbf16>
    %81 = vector.extract_strided_slice %14 {offsets = [0, 64], sizes = [16, 32], strides = [1, 1]} : vector<16x128xf32> to vector<16x32xf32>
    %82 = arith.truncf %81 : vector<16x32xf32> to vector<16x32xbf16>
    %cst_29 = arith.constant dense<0.000000e+00> : vector<16x16xf32>
    %83 = tpu.matmul %78, %80, %cst_29 {dimension_numbers = #tpu.dot_dimension_numbers<[1], [1], [0], [0], [0, 0, 1, 0], [], []>} : vector<16x32xbf16>, vector<16x32xbf16>, vector<16x16xf32> -> vector<16x16xf32>
    %cst_30 = arith.constant -1.000000e+30 : f32
    %84 = vector.broadcast %cst_30 : f32 to vector<16x16xf32>
    %85 = arith.select %17, %83, %84 : vector<16x16xi1>, vector<16x16xf32>
    %cst_31 = arith.constant dense<0xFF800000> : vector<16xf32>
    %86 = vector.multi_reduction <maximumf>, %85, %cst_31 [1] : vector<16x16xf32> to vector<16xf32>
    %87 = vector.shape_cast %86 : vector<16xf32> to vector<16x1xf32>
    %88 = vector.broadcast %87 : vector<16x1xf32> to vector<16x16xf32>
    %89 = arith.subf %85, %88 : vector<16x16xf32>
    %90 = math.exp %89 : vector<16x16xf32>
    %cst_32 = arith.constant dense<0.000000e+00> : vector<16xf32>
    %91 = vector.multi_reduction <add>, %90, %cst_32 [1] : vector<16x16xf32> to vector<16xf32>
    %92 = vector.shape_cast %91 : vector<16xf32> to vector<16x1xf32>
    %93 = tpu.reciprocal %92 {approx = true} : vector<16x1xf32> -> vector<16x1xf32>
    %94 = vector.broadcast %93 : vector<16x1xf32> to vector<16x16xf32>
    %95 = arith.mulf %90, %94 : vector<16x16xf32>
    %96 = arith.truncf %95 : vector<16x16xf32> to vector<16x16xbf16>
    %cst_33 = arith.constant dense<0.000000e+00> : vector<16x32xf32>
    %97 = tpu.matmul %96, %82, %cst_33 {dimension_numbers = #tpu.dot_dimension_numbers<[1], [0], [0], [1], [0, 0, 1, 1], [], []>} : vector<16x16xbf16>, vector<16x32xbf16>, vector<16x32xf32> -> vector<16x32xf32>
    %c0_34 = arith.constant 0 : index
    %c64 = arith.constant 64 : index
    %c0_35 = arith.constant 0 : index
    %98 = vector.load %arg4[%c0_34, %c64, %c0_35] : memref<1x512x128xbf16, #tpu.memory_space<vmem>>, vector<1x32x128xbf16>
    %99 = vector.shape_cast %98 : vector<1x32x128xbf16> to vector<32x128xbf16>
    %100 = arith.truncf %97 : vector<16x32xf32> to vector<16x32xbf16>
    %cst_36 = arith.constant dense<0.000000e+00> : vector<16x128xf32>
    %101 = tpu.matmul %100, %99, %cst_36 {dimension_numbers = #tpu.dot_dimension_numbers<[1], [0], [0], [1], [0, 0, 1, 1], [], []>} : vector<16x32xbf16>, vector<32x128xbf16>, vector<16x128xf32> -> vector<16x128xf32>
    %102 = arith.addf %74, %101 : vector<16x128xf32>
    %103 = vector.extract_strided_slice %12 {offsets = [0, 96], sizes = [16, 32], strides = [1, 1]} : vector<16x128xf32> to vector<16x32xf32>
    %cst_37 = arith.constant 0.176776692 : f32
    %104 = vector.broadcast %cst_37 : f32 to vector<16x32xf32>
    %105 = arith.mulf %103, %104 : vector<16x32xf32>
    %106 = arith.truncf %105 : vector<16x32xf32> to vector<16x32xbf16>
    %107 = vector.extract_strided_slice %13 {offsets = [0, 96], sizes = [16, 32], strides = [1, 1]} : vector<16x128xf32> to vector<16x32xf32>
    %108 = arith.truncf %107 : vector<16x32xf32> to vector<16x32xbf16>
    %109 = vector.extract_strided_slice %14 {offsets = [0, 96], sizes = [16, 32], strides = [1, 1]} : vector<16x128xf32> to vector<16x32xf32>
    %110 = arith.truncf %109 : vector<16x32xf32> to vector<16x32xbf16>
    %cst_38 = arith.constant dense<0.000000e+00> : vector<16x16xf32>
    %111 = tpu.matmul %106, %108, %cst_38 {dimension_numbers = #tpu.dot_dimension_numbers<[1], [1], [0], [0], [0, 0, 1, 0], [], []>} : vector<16x32xbf16>, vector<16x32xbf16>, vector<16x16xf32> -> vector<16x16xf32>
    %cst_39 = arith.constant -1.000000e+30 : f32
    %112 = vector.broadcast %cst_39 : f32 to vector<16x16xf32>
    %113 = arith.select %17, %111, %112 : vector<16x16xi1>, vector<16x16xf32>
    %cst_40 = arith.constant dense<0xFF800000> : vector<16xf32>
    %114 = vector.multi_reduction <maximumf>, %113, %cst_40 [1] : vector<16x16xf32> to vector<16xf32>
    %115 = vector.shape_cast %114 : vector<16xf32> to vector<16x1xf32>
    %116 = vector.broadcast %115 : vector<16x1xf32> to vector<16x16xf32>
    %117 = arith.subf %113, %116 : vector<16x16xf32>
    %118 = math.exp %117 : vector<16x16xf32>
    %cst_41 = arith.constant dense<0.000000e+00> : vector<16xf32>
    %119 = vector.multi_reduction <add>, %118, %cst_41 [1] : vector<16x16xf32> to vector<16xf32>
    %120 = vector.shape_cast %119 : vector<16xf32> to vector<16x1xf32>
    %121 = tpu.reciprocal %120 {approx = true} : vector<16x1xf32> -> vector<16x1xf32>
    %122 = vector.broadcast %121 : vector<16x1xf32> to vector<16x16xf32>
    %123 = arith.mulf %118, %122 : vector<16x16xf32>
    %124 = arith.truncf %123 : vector<16x16xf32> to vector<16x16xbf16>
    %cst_42 = arith.constant dense<0.000000e+00> : vector<16x32xf32>
    %125 = tpu.matmul %124, %110, %cst_42 {dimension_numbers = #tpu.dot_dimension_numbers<[1], [0], [0], [1], [0, 0, 1, 1], [], []>} : vector<16x16xbf16>, vector<16x32xbf16>, vector<16x32xf32> -> vector<16x32xf32>
    %c0_43 = arith.constant 0 : index
    %c96 = arith.constant 96 : index
    %c0_44 = arith.constant 0 : index
    %126 = vector.load %arg4[%c0_43, %c96, %c0_44] : memref<1x512x128xbf16, #tpu.memory_space<vmem>>, vector<1x32x128xbf16>
    %127 = vector.shape_cast %126 : vector<1x32x128xbf16> to vector<32x128xbf16>
    %128 = arith.truncf %125 : vector<16x32xf32> to vector<16x32xbf16>
    %cst_45 = arith.constant dense<0.000000e+00> : vector<16x128xf32>
    %129 = tpu.matmul %128, %127, %cst_45 {dimension_numbers = #tpu.dot_dimension_numbers<[1], [0], [0], [1], [0, 0, 1, 1], [], []>} : vector<16x32xbf16>, vector<32x128xbf16>, vector<16x128xf32> -> vector<16x128xf32>
    %130 = arith.addf %102, %129 : vector<16x128xf32>
    %131 = arith.addf %3, %130 : vector<16x128xf32>
    %c0_46 = arith.constant 0 : index
    %c1 = arith.constant 1 : index
    %c0_47 = arith.constant 0 : index
    %132 = vector.load %arg5[%c0_46, %c1, %c0_47] : memref<1x16x384xf32, #tpu.memory_space<vmem>>, vector<1x1x128xf32>
    %133 = vector.shape_cast %132 : vector<1x1x128xf32> to vector<1x128xf32>
    %134 = vector.broadcast %133 : vector<1x128xf32> to vector<16x128xf32>
    %135 = arith.addf %131, %134 : vector<16x128xf32>
    %c0_48 = arith.constant 0 : index
    %c7 = arith.constant 7 : index
    %c0_49 = arith.constant 0 : index
    %136 = vector.load %arg5[%c0_48, %c7, %c0_49] : memref<1x16x384xf32, #tpu.memory_space<vmem>>, vector<1x1x128xf32>
    %137 = vector.shape_cast %136 : vector<1x1x128xf32> to vector<1x128xf32>
    %c0_50 = arith.constant 0 : index
    %c8 = arith.constant 8 : index
    %c0_51 = arith.constant 0 : index
    %138 = vector.load %arg5[%c0_50, %c8, %c0_51] : memref<1x16x384xf32, #tpu.memory_space<vmem>>, vector<1x1x128xf32>
    %139 = vector.shape_cast %138 : vector<1x1x128xf32> to vector<1x128xf32>
    %cst_52 = arith.constant dense<0.000000e+00> : vector<16xf32>
    %140 = vector.multi_reduction <add>, %135, %cst_52 [1] : vector<16x128xf32> to vector<16xf32>
    %141 = vector.shape_cast %140 : vector<16xf32> to vector<16x1xf32>
    %cst_53 = arith.constant 1.280000e+02 : f32
    %142 = vector.broadcast %cst_53 : f32 to vector<16x1xf32>
    %143 = arith.divf %141, %142 : vector<16x1xf32>
    %144 = vector.broadcast %143 : vector<16x1xf32> to vector<16x128xf32>
    %145 = arith.subf %135, %144 : vector<16x128xf32>
    %146 = arith.mulf %145, %145 : vector<16x128xf32>
    %cst_54 = arith.constant dense<0.000000e+00> : vector<16xf32>
    %147 = vector.multi_reduction <add>, %146, %cst_54 [1] : vector<16x128xf32> to vector<16xf32>
    %148 = vector.shape_cast %147 : vector<16xf32> to vector<16x1xf32>
    %cst_55 = arith.constant 1.280000e+02 : f32
    %149 = vector.broadcast %cst_55 : f32 to vector<16x1xf32>
    %150 = arith.divf %148, %149 : vector<16x1xf32>
    %151 = vector.broadcast %143 : vector<16x1xf32> to vector<16x128xf32>
    %152 = arith.subf %135, %151 : vector<16x128xf32>
    %cst_56 = arith.constant 9.99999974E-6 : f32
    %153 = vector.broadcast %cst_56 : f32 to vector<16x1xf32>
    %154 = arith.addf %150, %153 : vector<16x1xf32>
    %155 = math.rsqrt %154 : vector<16x1xf32>
    %156 = vector.broadcast %155 : vector<16x1xf32> to vector<16x128xf32>
    %157 = arith.mulf %152, %156 : vector<16x128xf32>
    %158 = vector.broadcast %137 : vector<1x128xf32> to vector<16x128xf32>
    %159 = arith.mulf %157, %158 : vector<16x128xf32>
    %160 = vector.broadcast %139 : vector<1x128xf32> to vector<16x128xf32>
    %161 = arith.addf %159, %160 : vector<16x128xf32>
    %c0_57 = arith.constant 0 : index
    %c0_58 = arith.constant 0 : index
    %c384 = arith.constant 384 : index
    %162 = vector.load %arg3[%c0_57, %c0_58, %c384] : memref<1x128x1024xbf16, #tpu.memory_space<vmem>>, vector<1x128x128xbf16>
    %163 = vector.shape_cast %162 : vector<1x128x128xbf16> to vector<128x128xbf16>
    %164 = arith.truncf %161 : vector<16x128xf32> to vector<16x128xbf16>
    %cst_59 = arith.constant dense<0.000000e+00> : vector<16x128xf32>
    %165 = tpu.matmul %164, %163, %cst_59 {dimension_numbers = #tpu.dot_dimension_numbers<[1], [0], [0], [1], [0, 0, 1, 1], [], []>} : vector<16x128xbf16>, vector<128x128xbf16>, vector<16x128xf32> -> vector<16x128xf32>
    %c0_60 = arith.constant 0 : index
    %c2 = arith.constant 2 : index
    %c0_61 = arith.constant 0 : index
    %166 = vector.load %arg5[%c0_60, %c2, %c0_61] : memref<1x16x384xf32, #tpu.memory_space<vmem>>, vector<1x1x128xf32>
    %167 = vector.shape_cast %166 : vector<1x1x128xf32> to vector<1x128xf32>
    %168 = vector.broadcast %167 : vector<1x128xf32> to vector<16x128xf32>
    %169 = arith.addf %165, %168 : vector<16x128xf32>
    %c0_62 = arith.constant 0 : index
    %c0_63 = arith.constant 0 : index
    %170 = vector.load %arg2[%c0_62, %c0_63] : memref<128x128xbf16, #tpu.memory_space<vmem>>, vector<128x128xbf16>
    %c0_64 = arith.constant 0 : index
    %c0_65 = arith.constant 0 : index
    %c512 = arith.constant 512 : index
    %171 = vector.load %arg3[%c0_64, %c0_65, %c512] : memref<1x128x1024xbf16, #tpu.memory_space<vmem>>, vector<1x128x256xbf16>
    %172 = vector.shape_cast %171 : vector<1x128x256xbf16> to vector<128x256xbf16>
    %cst_66 = arith.constant dense<0.000000e+00> : vector<128x256xf32>
    %173 = tpu.matmul %170, %172, %cst_66 {dimension_numbers = #tpu.dot_dimension_numbers<[1], [0], [0], [1], [0, 0, 1, 1], [], []>} : vector<128x128xbf16>, vector<128x256xbf16>, vector<128x256xf32> -> vector<128x256xf32>
    %c0_67 = arith.constant 0 : index
    %c3 = arith.constant 3 : index
    %c0_68 = arith.constant 0 : index
    %174 = vector.load %arg5[%c0_67, %c3, %c0_68] : memref<1x16x384xf32, #tpu.memory_space<vmem>>, vector<1x1x256xf32>
    %175 = vector.shape_cast %174 : vector<1x1x256xf32> to vector<1x256xf32>
    %176 = vector.broadcast %175 : vector<1x256xf32> to vector<128x256xf32>
    %177 = arith.addf %173, %176 : vector<128x256xf32>
    %178 = vector.extract_strided_slice %177 {offsets = [0, 0], sizes = [128, 128], strides = [1, 1]} : vector<128x256xf32> to vector<128x128xf32>
    %179 = vector.extract_strided_slice %177 {offsets = [0, 128], sizes = [128, 128], strides = [1, 1]} : vector<128x256xf32> to vector<128x128xf32>
    %180 = tpu.iota {dimensions = array<i32: 1>} : vector<16x128xi32>
    %c24_i32 = arith.constant 24 : i32
    %181 = vector.broadcast %c24_i32 : i32 to vector<16x128xi32>
    %182 = arith.cmpi slt, %180, %181 : vector<16x128xi32>
    %cst_69 = arith.constant 0.000000e+00 : f32
    %183 = vector.broadcast %cst_69 : f32 to vector<16x128xf32>
    %184 = vector.extract_strided_slice %169 {offsets = [0, 0], sizes = [16, 32], strides = [1, 1]} : vector<16x128xf32> to vector<16x32xf32>
    %cst_70 = arith.constant 0.176776692 : f32
    %185 = vector.broadcast %cst_70 : f32 to vector<16x32xf32>
    %186 = arith.mulf %184, %185 : vector<16x32xf32>
    %187 = arith.truncf %186 : vector<16x32xf32> to vector<16x32xbf16>
    %188 = vector.extract_strided_slice %178 {offsets = [0, 0], sizes = [128, 32], strides = [1, 1]} : vector<128x128xf32> to vector<128x32xf32>
    %189 = arith.truncf %188 : vector<128x32xf32> to vector<128x32xbf16>
    %190 = vector.extract_strided_slice %179 {offsets = [0, 0], sizes = [128, 32], strides = [1, 1]} : vector<128x128xf32> to vector<128x32xf32>
    %191 = arith.truncf %190 : vector<128x32xf32> to vector<128x32xbf16>
    %cst_71 = arith.constant dense<0.000000e+00> : vector<16x128xf32>
    %192 = tpu.matmul %187, %189, %cst_71 {dimension_numbers = #tpu.dot_dimension_numbers<[1], [1], [0], [0], [0, 0, 1, 0], [], []>} : vector<16x32xbf16>, vector<128x32xbf16>, vector<16x128xf32> -> vector<16x128xf32>
    %cst_72 = arith.constant -1.000000e+30 : f32
    %193 = vector.broadcast %cst_72 : f32 to vector<16x128xf32>
    %194 = arith.select %182, %192, %193 : vector<16x128xi1>, vector<16x128xf32>
    %cst_73 = arith.constant dense<0xFF800000> : vector<16xf32>
    %195 = vector.multi_reduction <maximumf>, %194, %cst_73 [1] : vector<16x128xf32> to vector<16xf32>
    %196 = vector.shape_cast %195 : vector<16xf32> to vector<16x1xf32>
    %197 = vector.broadcast %196 : vector<16x1xf32> to vector<16x128xf32>
    %198 = arith.subf %194, %197 : vector<16x128xf32>
    %199 = math.exp %198 : vector<16x128xf32>
    %cst_74 = arith.constant dense<0.000000e+00> : vector<16xf32>
    %200 = vector.multi_reduction <add>, %199, %cst_74 [1] : vector<16x128xf32> to vector<16xf32>
    %201 = vector.shape_cast %200 : vector<16xf32> to vector<16x1xf32>
    %202 = tpu.reciprocal %201 {approx = true} : vector<16x1xf32> -> vector<16x1xf32>
    %203 = vector.broadcast %202 : vector<16x1xf32> to vector<16x128xf32>
    %204 = arith.mulf %199, %203 : vector<16x128xf32>
    %205 = arith.truncf %204 : vector<16x128xf32> to vector<16x128xbf16>
    %cst_75 = arith.constant dense<0.000000e+00> : vector<16x32xf32>
    %206 = tpu.matmul %205, %191, %cst_75 {dimension_numbers = #tpu.dot_dimension_numbers<[1], [0], [0], [1], [0, 0, 1, 1], [], []>} : vector<16x128xbf16>, vector<128x32xbf16>, vector<16x32xf32> -> vector<16x32xf32>
    %c0_76 = arith.constant 0 : index
    %c128 = arith.constant 128 : index
    %c0_77 = arith.constant 0 : index
    %207 = vector.load %arg4[%c0_76, %c128, %c0_77] : memref<1x512x128xbf16, #tpu.memory_space<vmem>>, vector<1x32x128xbf16>
    %208 = vector.shape_cast %207 : vector<1x32x128xbf16> to vector<32x128xbf16>
    %209 = arith.truncf %206 : vector<16x32xf32> to vector<16x32xbf16>
    %cst_78 = arith.constant dense<0.000000e+00> : vector<16x128xf32>
    %210 = tpu.matmul %209, %208, %cst_78 {dimension_numbers = #tpu.dot_dimension_numbers<[1], [0], [0], [1], [0, 0, 1, 1], [], []>} : vector<16x32xbf16>, vector<32x128xbf16>, vector<16x128xf32> -> vector<16x128xf32>
    %211 = arith.addf %183, %210 : vector<16x128xf32>
    %212 = vector.extract_strided_slice %169 {offsets = [0, 32], sizes = [16, 32], strides = [1, 1]} : vector<16x128xf32> to vector<16x32xf32>
    %cst_79 = arith.constant 0.176776692 : f32
    %213 = vector.broadcast %cst_79 : f32 to vector<16x32xf32>
    %214 = arith.mulf %212, %213 : vector<16x32xf32>
    %215 = arith.truncf %214 : vector<16x32xf32> to vector<16x32xbf16>
    %216 = vector.extract_strided_slice %178 {offsets = [0, 32], sizes = [128, 32], strides = [1, 1]} : vector<128x128xf32> to vector<128x32xf32>
    %217 = arith.truncf %216 : vector<128x32xf32> to vector<128x32xbf16>
    %218 = vector.extract_strided_slice %179 {offsets = [0, 32], sizes = [128, 32], strides = [1, 1]} : vector<128x128xf32> to vector<128x32xf32>
    %219 = arith.truncf %218 : vector<128x32xf32> to vector<128x32xbf16>
    %cst_80 = arith.constant dense<0.000000e+00> : vector<16x128xf32>
    %220 = tpu.matmul %215, %217, %cst_80 {dimension_numbers = #tpu.dot_dimension_numbers<[1], [1], [0], [0], [0, 0, 1, 0], [], []>} : vector<16x32xbf16>, vector<128x32xbf16>, vector<16x128xf32> -> vector<16x128xf32>
    %cst_81 = arith.constant -1.000000e+30 : f32
    %221 = vector.broadcast %cst_81 : f32 to vector<16x128xf32>
    %222 = arith.select %182, %220, %221 : vector<16x128xi1>, vector<16x128xf32>
    %cst_82 = arith.constant dense<0xFF800000> : vector<16xf32>
    %223 = vector.multi_reduction <maximumf>, %222, %cst_82 [1] : vector<16x128xf32> to vector<16xf32>
    %224 = vector.shape_cast %223 : vector<16xf32> to vector<16x1xf32>
    %225 = vector.broadcast %224 : vector<16x1xf32> to vector<16x128xf32>
    %226 = arith.subf %222, %225 : vector<16x128xf32>
    %227 = math.exp %226 : vector<16x128xf32>
    %cst_83 = arith.constant dense<0.000000e+00> : vector<16xf32>
    %228 = vector.multi_reduction <add>, %227, %cst_83 [1] : vector<16x128xf32> to vector<16xf32>
    %229 = vector.shape_cast %228 : vector<16xf32> to vector<16x1xf32>
    %230 = tpu.reciprocal %229 {approx = true} : vector<16x1xf32> -> vector<16x1xf32>
    %231 = vector.broadcast %230 : vector<16x1xf32> to vector<16x128xf32>
    %232 = arith.mulf %227, %231 : vector<16x128xf32>
    %233 = arith.truncf %232 : vector<16x128xf32> to vector<16x128xbf16>
    %cst_84 = arith.constant dense<0.000000e+00> : vector<16x32xf32>
    %234 = tpu.matmul %233, %219, %cst_84 {dimension_numbers = #tpu.dot_dimension_numbers<[1], [0], [0], [1], [0, 0, 1, 1], [], []>} : vector<16x128xbf16>, vector<128x32xbf16>, vector<16x32xf32> -> vector<16x32xf32>
    %c0_85 = arith.constant 0 : index
    %c160 = arith.constant 160 : index
    %c0_86 = arith.constant 0 : index
    %235 = vector.load %arg4[%c0_85, %c160, %c0_86] : memref<1x512x128xbf16, #tpu.memory_space<vmem>>, vector<1x32x128xbf16>
    %236 = vector.shape_cast %235 : vector<1x32x128xbf16> to vector<32x128xbf16>
    %237 = arith.truncf %234 : vector<16x32xf32> to vector<16x32xbf16>
    %cst_87 = arith.constant dense<0.000000e+00> : vector<16x128xf32>
    %238 = tpu.matmul %237, %236, %cst_87 {dimension_numbers = #tpu.dot_dimension_numbers<[1], [0], [0], [1], [0, 0, 1, 1], [], []>} : vector<16x32xbf16>, vector<32x128xbf16>, vector<16x128xf32> -> vector<16x128xf32>
    %239 = arith.addf %211, %238 : vector<16x128xf32>
    %240 = vector.extract_strided_slice %169 {offsets = [0, 64], sizes = [16, 32], strides = [1, 1]} : vector<16x128xf32> to vector<16x32xf32>
    %cst_88 = arith.constant 0.176776692 : f32
    %241 = vector.broadcast %cst_88 : f32 to vector<16x32xf32>
    %242 = arith.mulf %240, %241 : vector<16x32xf32>
    %243 = arith.truncf %242 : vector<16x32xf32> to vector<16x32xbf16>
    %244 = vector.extract_strided_slice %178 {offsets = [0, 64], sizes = [128, 32], strides = [1, 1]} : vector<128x128xf32> to vector<128x32xf32>
    %245 = arith.truncf %244 : vector<128x32xf32> to vector<128x32xbf16>
    %246 = vector.extract_strided_slice %179 {offsets = [0, 64], sizes = [128, 32], strides = [1, 1]} : vector<128x128xf32> to vector<128x32xf32>
    %247 = arith.truncf %246 : vector<128x32xf32> to vector<128x32xbf16>
    %cst_89 = arith.constant dense<0.000000e+00> : vector<16x128xf32>
    %248 = tpu.matmul %243, %245, %cst_89 {dimension_numbers = #tpu.dot_dimension_numbers<[1], [1], [0], [0], [0, 0, 1, 0], [], []>} : vector<16x32xbf16>, vector<128x32xbf16>, vector<16x128xf32> -> vector<16x128xf32>
    %cst_90 = arith.constant -1.000000e+30 : f32
    %249 = vector.broadcast %cst_90 : f32 to vector<16x128xf32>
    %250 = arith.select %182, %248, %249 : vector<16x128xi1>, vector<16x128xf32>
    %cst_91 = arith.constant dense<0xFF800000> : vector<16xf32>
    %251 = vector.multi_reduction <maximumf>, %250, %cst_91 [1] : vector<16x128xf32> to vector<16xf32>
    %252 = vector.shape_cast %251 : vector<16xf32> to vector<16x1xf32>
    %253 = vector.broadcast %252 : vector<16x1xf32> to vector<16x128xf32>
    %254 = arith.subf %250, %253 : vector<16x128xf32>
    %255 = math.exp %254 : vector<16x128xf32>
    %cst_92 = arith.constant dense<0.000000e+00> : vector<16xf32>
    %256 = vector.multi_reduction <add>, %255, %cst_92 [1] : vector<16x128xf32> to vector<16xf32>
    %257 = vector.shape_cast %256 : vector<16xf32> to vector<16x1xf32>
    %258 = tpu.reciprocal %257 {approx = true} : vector<16x1xf32> -> vector<16x1xf32>
    %259 = vector.broadcast %258 : vector<16x1xf32> to vector<16x128xf32>
    %260 = arith.mulf %255, %259 : vector<16x128xf32>
    %261 = arith.truncf %260 : vector<16x128xf32> to vector<16x128xbf16>
    %cst_93 = arith.constant dense<0.000000e+00> : vector<16x32xf32>
    %262 = tpu.matmul %261, %247, %cst_93 {dimension_numbers = #tpu.dot_dimension_numbers<[1], [0], [0], [1], [0, 0, 1, 1], [], []>} : vector<16x128xbf16>, vector<128x32xbf16>, vector<16x32xf32> -> vector<16x32xf32>
    %c0_94 = arith.constant 0 : index
    %c192 = arith.constant 192 : index
    %c0_95 = arith.constant 0 : index
    %263 = vector.load %arg4[%c0_94, %c192, %c0_95] : memref<1x512x128xbf16, #tpu.memory_space<vmem>>, vector<1x32x128xbf16>
    %264 = vector.shape_cast %263 : vector<1x32x128xbf16> to vector<32x128xbf16>
    %265 = arith.truncf %262 : vector<16x32xf32> to vector<16x32xbf16>
    %cst_96 = arith.constant dense<0.000000e+00> : vector<16x128xf32>
    %266 = tpu.matmul %265, %264, %cst_96 {dimension_numbers = #tpu.dot_dimension_numbers<[1], [0], [0], [1], [0, 0, 1, 1], [], []>} : vector<16x32xbf16>, vector<32x128xbf16>, vector<16x128xf32> -> vector<16x128xf32>
    %267 = arith.addf %239, %266 : vector<16x128xf32>
    %268 = vector.extract_strided_slice %169 {offsets = [0, 96], sizes = [16, 32], strides = [1, 1]} : vector<16x128xf32> to vector<16x32xf32>
    %cst_97 = arith.constant 0.176776692 : f32
    %269 = vector.broadcast %cst_97 : f32 to vector<16x32xf32>
    %270 = arith.mulf %268, %269 : vector<16x32xf32>
    %271 = arith.truncf %270 : vector<16x32xf32> to vector<16x32xbf16>
    %272 = vector.extract_strided_slice %178 {offsets = [0, 96], sizes = [128, 32], strides = [1, 1]} : vector<128x128xf32> to vector<128x32xf32>
    %273 = arith.truncf %272 : vector<128x32xf32> to vector<128x32xbf16>
    %274 = vector.extract_strided_slice %179 {offsets = [0, 96], sizes = [128, 32], strides = [1, 1]} : vector<128x128xf32> to vector<128x32xf32>
    %275 = arith.truncf %274 : vector<128x32xf32> to vector<128x32xbf16>
    %cst_98 = arith.constant dense<0.000000e+00> : vector<16x128xf32>
    %276 = tpu.matmul %271, %273, %cst_98 {dimension_numbers = #tpu.dot_dimension_numbers<[1], [1], [0], [0], [0, 0, 1, 0], [], []>} : vector<16x32xbf16>, vector<128x32xbf16>, vector<16x128xf32> -> vector<16x128xf32>
    %cst_99 = arith.constant -1.000000e+30 : f32
    %277 = vector.broadcast %cst_99 : f32 to vector<16x128xf32>
    %278 = arith.select %182, %276, %277 : vector<16x128xi1>, vector<16x128xf32>
    %cst_100 = arith.constant dense<0xFF800000> : vector<16xf32>
    %279 = vector.multi_reduction <maximumf>, %278, %cst_100 [1] : vector<16x128xf32> to vector<16xf32>
    %280 = vector.shape_cast %279 : vector<16xf32> to vector<16x1xf32>
    %281 = vector.broadcast %280 : vector<16x1xf32> to vector<16x128xf32>
    %282 = arith.subf %278, %281 : vector<16x128xf32>
    %283 = math.exp %282 : vector<16x128xf32>
    %cst_101 = arith.constant dense<0.000000e+00> : vector<16xf32>
    %284 = vector.multi_reduction <add>, %283, %cst_101 [1] : vector<16x128xf32> to vector<16xf32>
    %285 = vector.shape_cast %284 : vector<16xf32> to vector<16x1xf32>
    %286 = tpu.reciprocal %285 {approx = true} : vector<16x1xf32> -> vector<16x1xf32>
    %287 = vector.broadcast %286 : vector<16x1xf32> to vector<16x128xf32>
    %288 = arith.mulf %283, %287 : vector<16x128xf32>
    %289 = arith.truncf %288 : vector<16x128xf32> to vector<16x128xbf16>
    %cst_102 = arith.constant dense<0.000000e+00> : vector<16x32xf32>
    %290 = tpu.matmul %289, %275, %cst_102 {dimension_numbers = #tpu.dot_dimension_numbers<[1], [0], [0], [1], [0, 0, 1, 1], [], []>} : vector<16x128xbf16>, vector<128x32xbf16>, vector<16x32xf32> -> vector<16x32xf32>
    %c0_103 = arith.constant 0 : index
    %c224 = arith.constant 224 : index
    %c0_104 = arith.constant 0 : index
    %291 = vector.load %arg4[%c0_103, %c224, %c0_104] : memref<1x512x128xbf16, #tpu.memory_space<vmem>>, vector<1x32x128xbf16>
    %292 = vector.shape_cast %291 : vector<1x32x128xbf16> to vector<32x128xbf16>
    %293 = arith.truncf %290 : vector<16x32xf32> to vector<16x32xbf16>
    %cst_105 = arith.constant dense<0.000000e+00> : vector<16x128xf32>
    %294 = tpu.matmul %293, %292, %cst_105 {dimension_numbers = #tpu.dot_dimension_numbers<[1], [0], [0], [1], [0, 0, 1, 1], [], []>} : vector<16x32xbf16>, vector<32x128xbf16>, vector<16x128xf32> -> vector<16x128xf32>
    %295 = arith.addf %267, %294 : vector<16x128xf32>
    %296 = arith.addf %161, %295 : vector<16x128xf32>
    %c0_106 = arith.constant 0 : index
    %c4 = arith.constant 4 : index
    %c0_107 = arith.constant 0 : index
    %297 = vector.load %arg5[%c0_106, %c4, %c0_107] : memref<1x16x384xf32, #tpu.memory_space<vmem>>, vector<1x1x128xf32>
    %298 = vector.shape_cast %297 : vector<1x1x128xf32> to vector<1x128xf32>
    %299 = vector.broadcast %298 : vector<1x128xf32> to vector<16x128xf32>
    %300 = arith.addf %296, %299 : vector<16x128xf32>
    %c0_108 = arith.constant 0 : index
    %c9 = arith.constant 9 : index
    %c0_109 = arith.constant 0 : index
    %301 = vector.load %arg5[%c0_108, %c9, %c0_109] : memref<1x16x384xf32, #tpu.memory_space<vmem>>, vector<1x1x128xf32>
    %302 = vector.shape_cast %301 : vector<1x1x128xf32> to vector<1x128xf32>
    %c0_110 = arith.constant 0 : index
    %c10 = arith.constant 10 : index
    %c0_111 = arith.constant 0 : index
    %303 = vector.load %arg5[%c0_110, %c10, %c0_111] : memref<1x16x384xf32, #tpu.memory_space<vmem>>, vector<1x1x128xf32>
    %304 = vector.shape_cast %303 : vector<1x1x128xf32> to vector<1x128xf32>
    %cst_112 = arith.constant dense<0.000000e+00> : vector<16xf32>
    %305 = vector.multi_reduction <add>, %300, %cst_112 [1] : vector<16x128xf32> to vector<16xf32>
    %306 = vector.shape_cast %305 : vector<16xf32> to vector<16x1xf32>
    %cst_113 = arith.constant 1.280000e+02 : f32
    %307 = vector.broadcast %cst_113 : f32 to vector<16x1xf32>
    %308 = arith.divf %306, %307 : vector<16x1xf32>
    %309 = vector.broadcast %308 : vector<16x1xf32> to vector<16x128xf32>
    %310 = arith.subf %300, %309 : vector<16x128xf32>
    %311 = arith.mulf %310, %310 : vector<16x128xf32>
    %cst_114 = arith.constant dense<0.000000e+00> : vector<16xf32>
    %312 = vector.multi_reduction <add>, %311, %cst_114 [1] : vector<16x128xf32> to vector<16xf32>
    %313 = vector.shape_cast %312 : vector<16xf32> to vector<16x1xf32>
    %cst_115 = arith.constant 1.280000e+02 : f32
    %314 = vector.broadcast %cst_115 : f32 to vector<16x1xf32>
    %315 = arith.divf %313, %314 : vector<16x1xf32>
    %316 = vector.broadcast %308 : vector<16x1xf32> to vector<16x128xf32>
    %317 = arith.subf %300, %316 : vector<16x128xf32>
    %cst_116 = arith.constant 9.99999974E-6 : f32
    %318 = vector.broadcast %cst_116 : f32 to vector<16x1xf32>
    %319 = arith.addf %315, %318 : vector<16x1xf32>
    %320 = math.rsqrt %319 : vector<16x1xf32>
    %321 = vector.broadcast %320 : vector<16x1xf32> to vector<16x128xf32>
    %322 = arith.mulf %317, %321 : vector<16x128xf32>
    %323 = vector.broadcast %302 : vector<1x128xf32> to vector<16x128xf32>
    %324 = arith.mulf %322, %323 : vector<16x128xf32>
    %325 = vector.broadcast %304 : vector<1x128xf32> to vector<16x128xf32>
    %326 = arith.addf %324, %325 : vector<16x128xf32>
    %c0_117 = arith.constant 0 : index
    %c0_118 = arith.constant 0 : index
    %c768 = arith.constant 768 : index
    %327 = vector.load %arg3[%c0_117, %c0_118, %c768] : memref<1x128x1024xbf16, #tpu.memory_space<vmem>>, vector<1x128x256xbf16>
    %328 = vector.shape_cast %327 : vector<1x128x256xbf16> to vector<128x256xbf16>
    %329 = arith.truncf %326 : vector<16x128xf32> to vector<16x128xbf16>
    %cst_119 = arith.constant dense<0.000000e+00> : vector<16x256xf32>
    %330 = tpu.matmul %329, %328, %cst_119 {dimension_numbers = #tpu.dot_dimension_numbers<[1], [0], [0], [1], [0, 0, 1, 1], [], []>} : vector<16x128xbf16>, vector<128x256xbf16>, vector<16x256xf32> -> vector<16x256xf32>
    %c0_120 = arith.constant 0 : index
    %c5 = arith.constant 5 : index
    %c0_121 = arith.constant 0 : index
    %331 = vector.load %arg5[%c0_120, %c5, %c0_121] : memref<1x16x384xf32, #tpu.memory_space<vmem>>, vector<1x1x256xf32>
    %332 = vector.shape_cast %331 : vector<1x1x256xf32> to vector<1x256xf32>
    %333 = vector.broadcast %332 : vector<1x256xf32> to vector<16x256xf32>
    %334 = arith.addf %330, %333 : vector<16x256xf32>
    %cst_122 = arith.constant 0.000000e+00 : f32
    %335 = vector.broadcast %cst_122 : f32 to vector<16x256xf32>
    %336 = arith.maximumf %334, %335 : vector<16x256xf32>
    %c0_123 = arith.constant 0 : index
    %c256 = arith.constant 256 : index
    %c0_124 = arith.constant 0 : index
    %337 = vector.load %arg4[%c0_123, %c256, %c0_124] : memref<1x512x128xbf16, #tpu.memory_space<vmem>>, vector<1x256x128xbf16>
    %338 = vector.shape_cast %337 : vector<1x256x128xbf16> to vector<256x128xbf16>
    %339 = arith.truncf %336 : vector<16x256xf32> to vector<16x256xbf16>
    %cst_125 = arith.constant dense<0.000000e+00> : vector<16x128xf32>
    %340 = tpu.matmul %339, %338, %cst_125 {dimension_numbers = #tpu.dot_dimension_numbers<[1], [0], [0], [1], [0, 0, 1, 1], [], []>} : vector<16x256xbf16>, vector<256x128xbf16>, vector<16x128xf32> -> vector<16x128xf32>
    %341 = arith.addf %326, %340 : vector<16x128xf32>
    %c0_126 = arith.constant 0 : index
    %c6 = arith.constant 6 : index
    %c0_127 = arith.constant 0 : index
    %342 = vector.load %arg5[%c0_126, %c6, %c0_127] : memref<1x16x384xf32, #tpu.memory_space<vmem>>, vector<1x1x128xf32>
    %343 = vector.shape_cast %342 : vector<1x1x128xf32> to vector<1x128xf32>
    %344 = vector.broadcast %343 : vector<1x128xf32> to vector<16x128xf32>
    %345 = arith.addf %341, %344 : vector<16x128xf32>
    %c0_128 = arith.constant 0 : index
    %c11 = arith.constant 11 : index
    %c0_129 = arith.constant 0 : index
    %346 = vector.load %arg5[%c0_128, %c11, %c0_129] : memref<1x16x384xf32, #tpu.memory_space<vmem>>, vector<1x1x128xf32>
    %347 = vector.shape_cast %346 : vector<1x1x128xf32> to vector<1x128xf32>
    %c0_130 = arith.constant 0 : index
    %c12 = arith.constant 12 : index
    %c0_131 = arith.constant 0 : index
    %348 = vector.load %arg5[%c0_130, %c12, %c0_131] : memref<1x16x384xf32, #tpu.memory_space<vmem>>, vector<1x1x128xf32>
    %349 = vector.shape_cast %348 : vector<1x1x128xf32> to vector<1x128xf32>
    %cst_132 = arith.constant dense<0.000000e+00> : vector<16xf32>
    %350 = vector.multi_reduction <add>, %345, %cst_132 [1] : vector<16x128xf32> to vector<16xf32>
    %351 = vector.shape_cast %350 : vector<16xf32> to vector<16x1xf32>
    %cst_133 = arith.constant 1.280000e+02 : f32
    %352 = vector.broadcast %cst_133 : f32 to vector<16x1xf32>
    %353 = arith.divf %351, %352 : vector<16x1xf32>
    %354 = vector.broadcast %353 : vector<16x1xf32> to vector<16x128xf32>
    %355 = arith.subf %345, %354 : vector<16x128xf32>
    %356 = arith.mulf %355, %355 : vector<16x128xf32>
    %cst_134 = arith.constant dense<0.000000e+00> : vector<16xf32>
    %357 = vector.multi_reduction <add>, %356, %cst_134 [1] : vector<16x128xf32> to vector<16xf32>
    %358 = vector.shape_cast %357 : vector<16xf32> to vector<16x1xf32>
    %cst_135 = arith.constant 1.280000e+02 : f32
    %359 = vector.broadcast %cst_135 : f32 to vector<16x1xf32>
    %360 = arith.divf %358, %359 : vector<16x1xf32>
    %361 = vector.broadcast %353 : vector<16x1xf32> to vector<16x128xf32>
    %362 = arith.subf %345, %361 : vector<16x128xf32>
    %cst_136 = arith.constant 9.99999974E-6 : f32
    %363 = vector.broadcast %cst_136 : f32 to vector<16x1xf32>
    %364 = arith.addf %360, %363 : vector<16x1xf32>
    %365 = math.rsqrt %364 : vector<16x1xf32>
    %366 = vector.broadcast %365 : vector<16x1xf32> to vector<16x128xf32>
    %367 = arith.mulf %362, %366 : vector<16x128xf32>
    %368 = vector.broadcast %347 : vector<1x128xf32> to vector<16x128xf32>
    %369 = arith.mulf %367, %368 : vector<16x128xf32>
    %370 = vector.broadcast %349 : vector<1x128xf32> to vector<16x128xf32>
    %371 = arith.addf %369, %370 : vector<16x128xf32>
    %c0_137 = arith.constant 0 : index
    %c0_138 = arith.constant 0 : index
    %372 = vector.load %arg6[%c0_137, %c0_138] : memref<16x128xf32, #tpu.memory_space<vmem>>, vector<16x128xf32>
    tpu.vector_store %arg6[%c0_137, %c0_138], %371 {strides = array<i32>} : memref<16x128xf32, #tpu.memory_space<vmem>>, vector<16x128xf32>,
    return
  }
  func.func @transform_0(%arg0: i32) -> (i32, i32) {
    %c0_i32 = arith.constant 0 : i32
    %c0_i32_0 = arith.constant 0 : i32
    %c0_i32_1 = arith.constant 0 : i32
    return %c0_i32, %c0_i32_0 : i32, i32
  }
  func.func @transform_1(%arg0: i32) -> (i32, i32) {
    %c0_i32 = arith.constant 0 : i32
    %c0_i32_0 = arith.constant 0 : i32
    %c0_i32_1 = arith.constant 0 : i32
    return %c0_i32, %c0_i32_0 : i32, i32
  }
  func.func @transform_2(%arg0: i32) -> (i32, i32, i32) {
    %c0_i32 = arith.constant 0 : i32
    %c0_i32_0 = arith.constant 0 : i32
    %c0_i32_1 = arith.constant 0 : i32
    return %arg0, %c0_i32, %c0_i32_0 : i32, i32, i32
  }
  func.func @transform_3(%arg0: i32) -> (i32, i32, i32) {
    %c0_i32 = arith.constant 0 : i32
    %c0_i32_0 = arith.constant 0 : i32
    %c0_i32_1 = arith.constant 0 : i32
    return %arg0, %c0_i32, %c0_i32_0 : i32, i32, i32
  }
  func.func @transform_4(%arg0: i32) -> (i32, i32, i32) {
    %c0_i32 = arith.constant 0 : i32
    %c0_i32_0 = arith.constant 0 : i32
    %c0_i32_1 = arith.constant 0 : i32
    return %arg0, %c0_i32, %c0_i32_0 : i32, i32, i32
  }
  func.func @transform_5(%arg0: i32) -> (i32, i32) {
    %c0_i32 = arith.constant 0 : i32
    %c0_i32_0 = arith.constant 0 : i32
    %c0_i32_1 = arith.constant 0 : i32
    return %c0_i32, %c0_i32_0 : i32, i32
  }
}

</mosaic_0001>

<bundles_post_ra>
// kernel: decoder_forward.3
= control target key start
LH: loop header
LB: loop body
LE: loop exit
PB: predicated region body
PF: predicated region fallthrough
CT: control target
= control target key end

     0   :  { %v433_v2 = vmov 0   ;;  %s563_s0 = inlined_call_operand.vmem [shape: bf16[16,128], index: 0, kind: input, shape index: {}]   ;;  %s564_s1 = inlined_call_operand.vmem [shape: bf16[128,512], index: 1, kind: input, shape index: {}]   ;;  %s565_s2 = inlined_call_operand.hbm [shape: f32[16,512], index: 2, kind: output, shape index: {}]  }
   0x1   :  { %v360_v0 = vld [vmem:[%s564_s1 + $0x4] ss:$16 sps:$4 sm:$0xff]   ;;  %v362_v1 = vld [vmem:[%s564_s1 + $0xc] ss:$16 sps:$4 sm:$0xff]   ;;  %245 = vmatprep.mubr.bf16.mxu0 %v433_v2  ;;  %288 = vmatprep.mubr.bf16.mxu1 %v433_v2  ;;  %v364_v3 = vld [vmem:[%s564_s1] ss:$16 sps:$4 sm:$0xff]  }
   0x2   :  { %213 = vmatprep.subr.bf16.mxu0 %v360_v0  ;;  %v365_v4 = vld [vmem:[%s564_s1 + $0x8] ss:$16 sps:$4 sm:$0xff]   ;;  %256 = vmatprep.subr.bf16.mxu1 %v362_v1  ;;  %v366_v5 = vld [vmem:[%s564_s1 + $0x24] ss:$16 sps:$4 sm:$0xff]   ;;  %v368_v6 = vld [vmem:[%s564_s1 + $0x2c] ss:$16 sps:$4 sm:$0xff]  }
   0x3   :  { %214 = vmatpush1.bf16.msra.mxu0 %v364_v3  ;;  %257 = vmatpush1.bf16.msra.mxu1 %v365_v4  ;;  %v370_v7 = vld [vmem:[%s564_s1 + $0x20] ss:$16 sps:$4 sm:$0xff]   ;;  %v371_v8 = vld [vmem:[%s564_s1 + $0x28] ss:$16 sps:$4 sm:$0xff]   ;;  %v372_v9 = vld [vmem:[%s564_s1 + $0x44] ss:$16 sps:$4 sm:$0xff]  }
   0x4   :  { %215 = vmatprep.subr.bf16.mxu0 %v366_v5  ;;  %258 = vmatprep.subr.bf16.mxu1 %v368_v6  ;;  %v374_v10 = vld [vmem:[%s564_s1 + $0x4c] ss:$16 sps:$4 sm:$0xff]   ;;  %v376_v11 = vld [vmem:[%s564_s1 + $0x40] ss:$16 sps:$4 sm:$0xff]   ;;  %v377_v12 = vld [vmem:[%s564_s1 + $0x48] ss:$16 sps:$4 sm:$0xff]  }
   0x5   :  { %v378_v13 = vld [vmem:[%s564_s1 + $0x64] ss:$16 sps:$4 sm:$0xff]   ;;  %v380_v14 = vld [vmem:[%s564_s1 + $0x6c] ss:$16 sps:$4 sm:$0xff]   ;;  %v382_v15 = vld [vmem:[%s564_s1 + $0x60] ss:$16 sps:$4 sm:$0xff]  }
   0x6   :  { %v383_v16 = vld [vmem:[%s564_s1 + $0x68] ss:$16 sps:$4 sm:$0xff]   ;;  %v384_v17 = vld [vmem:[%s564_s1 + $0x84] ss:$16 sps:$4 sm:$0xff]   ;;  %v386_v18 = vld [vmem:[%s564_s1 + $0x8c] ss:$16 sps:$4 sm:$0xff]  }
   0x7   :  { %216 = vmatpush1.bf16.msra.mxu0 %v370_v7  ;;  %259 = vmatpush1.bf16.msra.mxu1 %v371_v8  ;;  %v388_v19 = vld [vmem:[%s564_s1 + $0x80] ss:$16 sps:$4 sm:$0xff]   ;;  %v389_v20 = vld [vmem:[%s564_s1 + $0x88] ss:$16 sps:$4 sm:$0xff]   ;;  %v390_v21 = vld [vmem:[%s564_s1 + $0xa4] ss:$16 sps:$4 sm:$0xff]  }
   0x8   :  { %217 = vmatprep.subr.bf16.mxu0 %v372_v9  ;;  %260 = vmatprep.subr.bf16.mxu1 %v374_v10  ;;  %v392_v22 = vld [vmem:[%s564_s1 + $0xac] ss:$16 sps:$4 sm:$0xff]   ;;  %v394_v23 = vld [vmem:[%s564_s1 + $0xa0] ss:$16 sps:$4 sm:$0xff]   ;;  %v395_v24 = vld [vmem:[%s564_s1 + $0xa8] ss:$16 sps:$4 sm:$0xff]  }
   0x9   :  { %v396_v25 = vld [vmem:[%s564_s1 + $0xc4] ss:$16 sps:$4 sm:$0xff]   ;;  %v398_v26 = vld [vmem:[%s564_s1 + $0xcc] ss:$16 sps:$4 sm:$0xff]  }
   0xb   :  { %218 = vmatpush1.bf16.msra.mxu0 %v376_v11  ;;  %261 = vmatpush1.bf16.msra.mxu1 %v377_v12 }
   0xc   :  { %219 = vmatprep.subr.bf16.mxu0 %v378_v13  ;;  %262 = vmatprep.subr.bf16.mxu1 %v380_v14 }
   0xf   :  { %220 = vmatpush1.bf16.msra.mxu0 %v382_v15  ;;  %263 = vmatpush1.bf16.msra.mxu1 %v383_v16 }
  0x10   :  { %221 = vmatprep.subr.bf16.mxu0 %v384_v17  ;;  %264 = vmatprep.subr.bf16.mxu1 %v386_v18 }
  0x13   :  { %222 = vmatpush1.bf16.msra.mxu0 %v388_v19  ;;  %265 = vmatpush1.bf16.msra.mxu1 %v389_v20 }
  0x14   :  { %223 = vmatprep.subr.bf16.mxu0 %v390_v21  ;;  %266 = vmatprep.subr.bf16.mxu1 %v392_v22 }
  0x15   :  { %7 = vsyncpa [#allocation3], 0  ;;  %v400_v27 = vld [vmem:[%s564_s1 + $0xc0] ss:$16 sps:$4 sm:$0xff]   ;;  %v401_v28 = vld [vmem:[%s564_s1 + $0xc8] ss:$16 sps:$4 sm:$0xff]  }
  0x16   :  { %v402_v29 = vld [vmem:[%s564_s1 + $0xe4] ss:$16 sps:$4 sm:$0xff]   ;;  %v404_v30 = vld [vmem:[%s564_s1 + $0xec] ss:$16 sps:$4 sm:$0xff]   ;;  %v406_v31 = vld [vmem:[%s564_s1 + $0xe0] ss:$16 sps:$4 sm:$0xff]  }
  0x17   :  { %224 = vmatpush1.bf16.msra.mxu0 %v394_v23  ;;  %267 = vmatpush1.bf16.msra.mxu1 %v395_v24  ;;  %v407_v32 = vld [vmem:[%s564_s1 + $0xe8] ss:$16 sps:$4 sm:$0xff]   ;;  %v408_v33 = vld [vmem:[%s563_s0] sm:$0xff]   ;;  %s434_s19 = smov [#allocation2]  }
  0x18   :  { %225 = vmatprep.subr.bf16.mxu0 %v396_v25  ;;  %268 = vmatprep.subr.bf16.mxu1 %v398_v26  ;;  %s312_s20 = sshll.u32 %s434_s19, 4  ;;  %s313_s20 = int_to_ptr.vmem [resolvable:$true] %s312_s20 }
  0x19   :  { %s409_s0 = scalar_lea.vmem %s313_s20, 1024  ;;  %p414_p1 = scmp.lt.s32.totalorder %s313_s20, %s313_s20 }
  0x1a   :  { %p410_p0 = scmp.ne.s32.totalorder %s313_s20, %s409_s0  ;;  %p415_p2 = scmp.lt.s32.totalorder %s409_s0, %s409_s0 }
  0x1b   :  { %226 = vmatpush1.bf16.msra.mxu0 %v400_v27  ;;  %269 = vmatpush1.bf16.msra.mxu1 %v401_v28 }
  0x1c   :  { %227 = vmatprep.subr.bf16.mxu0 %v402_v29  ;;  %270 = vmatprep.subr.bf16.mxu1 %v404_v30  ;;  %p416_p3 = por %p415_p2, %p414_p1 }
  0x1e   :  { %p417_p4 = pnand %p416_p3, %p410_p0 }
  0x1f   :  { %228 = vmatpush1.bf16.msra.mxu0 %v406_v31  ;;  %271 = vmatpush1.bf16.msra.mxu1 %v407_v32 }
  0x22   :  { %246 = vmatmul.mubr.bf16.vlgmr.msra.gmra.mrb[0].mxu0 %v408_v33  ;;  %289 = vmatmul.mubr.bf16.vlgmr.msra.gmra.mrb[0].mxu1 %v408_v33 }
  0xf5   :  { %v247_v34 = vpop.f32.mrb[0].mxu0  ;;  %v290_v35 = vpop.f32.mrb[0].mxu1 }
  0xf6   :  { %299 = vst [vmem:[#allocation2] sm:$0xff] %v247_v34  ;;  %301 = vst [vmem:[#allocation2 + $0x10] sm:$0xff] %v290_v35  ;;  %v249_v36 = vpop.f32.mrb[1].mxu0  ;;  %v292_v37 = vpop.f32.mrb[1].mxu1 }
  0xf7   :  { %300 = vst [vmem:[#allocation2 + $0x8] sm:$0xff] %v249_v36  ;;  %302 = vst [vmem:[#allocation2 + $0x18] sm:$0xff] %v292_v37  ;;  %v251_v38 = vpop.f32.mrb[2].mxu0  ;;  %v294_v39 = vpop.f32.mrb[2].mxu1 }
  0xf8   :  { %303 = vst [vmem:[#allocation2 + $0x20] sm:$0xff] %v251_v38  ;;  %305 = vst [vmem:[#allocation2 + $0x30] sm:$0xff] %v294_v39  ;;  %v253_v40 = vpop.f32.mrb[3].mxu0  ;;  %v296_v41 = vpop.f32.mrb[3].mxu1 }
  0xf9   :  { %304 = vst [vmem:[#allocation2 + $0x28] sm:$0xff] %v253_v40  ;;  %306 = vst [vmem:[#allocation2 + $0x38] sm:$0xff] %v296_v41 }
  0xfa   :  { %420 = shalt.err (!%p417_p4)
}
  0xfb   :  { %s421_s22 = scalar_lea.hbm %s565_s2, 1024 }
  0xfc   :  { %p422_p5 = scmp.ne.s32.totalorder %s565_s2, %s421_s22  ;;  %p425_p6 = scmp.lt.u32.totalorder %s421_s22, %s565_s2 }
  0xfe   :  { %p427_p7 = pnand %p425_p6, %p422_p5 }
 0x100   :  { %430 = shalt.err (!%p427_p7)
}
 0x101   :  { %s435_s27 = smov 512   ;;  %s436_s28 = smov 32  }
 0x102   :  { %318 = dma.vmem_to_hbm [thread:$0]  %s313_s20, 1024, %s565_s2, [#allocation3], %s435_s27, %s435_s27, %s436_s28  }
 0x103   :  { %431 = dma.done.wait [#allocation3], 1024  }
 0x104   :  { %432 = vsyncadd [#allocation3], 4294966272 }
 0x105   :  { %322 = vsyncpa [#allocation3], 1 }

// kernel: decoder_forward.2
= control target key start
LH: loop header
LB: loop body
LE: loop exit
PB: predicated region body
PF: predicated region fallthrough
CT: control target
= control target key end

     0   :  { %10 = vsyncpa [#allocation3], 0  ;;  %s5014_s0 = inlined_call_operand.vmem [shape: f32[16,128], index: 0, kind: input, shape index: {}]   ;;  %s5015_s1 = inlined_call_operand.vmem [shape: bf16[128,128], index: 1, kind: input, shape index: {}]   ;;  %s5016_s2 = inlined_call_operand.hbm [shape: bf16[2,128,1024], index: 2, kind: input, shape index: {}]   ;;  %s5017_s3 = inlined_call_operand.hbm [shape: bf16[2,512,128], index: 3, kind: input, shape index: {}]   ;;  %s5018_s4 = inlined_call_operand.vmem [shape: f32[2,16,384], index: 4, kind: input, shape index: {}]   ;;  %s5019_s5 = inlined_call_operand.vmem [shape: f32[16,128], index: 5, kind: output, shape index: {}]  }
   0x1   :  { %12 = vsyncpa [#allocation3 + $0x1], 0 }
   0x2   :  { %13 = vsyncpa [#allocation5], 0 }
   0x3   :  { %15 = vsyncpa [#allocation5 + $0x1], 0  ;;  %s4095_s18 = smov 0   ;;  %s4097_s19 = smov 0  }
   0x4   :  { %s4099_s20 = smov 0   ;;  %s4101_s21 = smov 0  }
   0x5 LB: > { %s4114_s22 = sadd.s32 4294967295, %s4051_s21   ;;  %s4117_s23 = sadd.s32 1, %s4051_s21   ;;  %s4051_s21 = sphi %s4101_s21, %s5029_s21   ;;  %s4047_s20 = sphi %s4099_s20, %s5028_s20   ;;  %s4043_s19 = sphi %s4097_s19, %s5027_s19   ;;  %s4039_s18 = sphi %s4095_s18, %s5026_s18  }
   0x6   : > { %s67_s24 = ssub.s32 %s4051_s21, %s4117_s23  ;;  %s70_s25 = sadd.s32 1, %s4047_s20 }
   0x7   : > { %p68_p0 = scmp.eq.s32.totalorder %s67_s24, 0  ;;  %p77_p1 = scmp.ne.s32.totalorder %s4047_s20, %s4043_s19 }
   0x8   : > { %p78_p2 = scmp.eq.s32.totalorder %s4051_s21, 0  ;;  %p83_p3 = scmp.ne.s32.totalorder %s4043_s19, %s4039_s18 }
   0x9   : > { %s4127_s26 = scalar_select %p68_p0, %s4047_s20, %s70_s25  }
   0xa   : > { %p79_p4 = por %p78_p2, %p77_p1  ;;  %p84_p5 = scmp.eq.s32.totalorder %s4114_s22, 0 }
   0xb   : > { %p3790_p6 = scmp.lt.s32.totalorder %s4051_s21, 2  ;;  %s4136_s28 = sand.u32 1, %s4047_s20  }
   0xc   : > { %p4131_p7 = por %p84_p5, %p83_p3  ;;  %s3173_s29 = sshll.u32 %s4136_s28, 9 }
   0xd   : > { %s3312_s30 = sshll.u32 %s4051_s21, 13  ;;  %s190_s9 = scalar_lea.vmem [#allocation2], %s3173_s29 }
   0xe   : > { %s5021_s27 = scalar_select %p4131_p7, 1, 0 }
   0xf   : > { %s4143_s8 = scalar_lea.hbm %s5016_s2, %s3312_s30  ;;  %s197_s10 = sshll.u32 %s190_s9, 4  ;;  %s4145_s10 = int_to_ptr.vmem [resolvable:$true] %s197_s10 }
  0x10   : > { %p4147_p8 = pnand %p3790_p6, %p79_p4  ;;  %s187_s12 = scalar_lea.sflag [#allocation3], %s4136_s28 }
  0x11   : > { %s3953_s13 = scalar_lea.hbm %s4143_s8, 8192  ;;  %s3958_s16 = scalar_lea.hbm %s5016_s2, 16384 }
  0x12   : > { %p3954_p10 = scmp.ne.s32.totalorder %s4143_s8, %s3953_s13  ;;  %p3955_p11 = pneg %p4147_p8 }
  0x13   : > { %p3959_p0 = scmp.lt.u32.totalorder %s4143_s8, %s5016_s2  ;;  %p3960_p1 = scmp.lt.u32.totalorder %s3958_s16, %s3953_s13 }
  0x14   : > { %p3956_p12 = pnand %p3955_p11, %p3954_p10  ;;  %p3962_p3 = scmp.lt.u32.totalorder %s3953_s13, %s4143_s8 }
  0x15   : > { %p3961_p2 = por %p3960_p1, %p3959_p0 }
  0x16   : > { %p3957_p13 = pneg %p3956_p12 }
  0x17   : > { %p3963_p4 = por %p3962_p3, %p3961_p2 }
  0x19   : > { %p3964_p5 = pnand %p3963_p4, %p3957_p13 }
  0x1b   : > { %3967 = shalt.err (!%p3964_p5)
}
  0x1c   : > { %s3968_s24 = scalar_lea.vmem %s4145_s10, 8192  ;;  %s4053_s25 = smov [#allocation2]  }
  0x1d   : > { %p3969_p6 = scmp.ne.s32.totalorder %s4145_s10, %s3968_s24  ;;  %s3973_s29 = sshll.u32 %s4053_s25, 4  ;;  %s3974_s29 = int_to_ptr.vmem [resolvable:$false] %s3973_s29 }
  0x1e   : > { %s3975_s30 = scalar_lea.vmem %s3974_s29, 16384  ;;  %p3976_p9 = scmp.lt.s32.totalorder %s4145_s10, %s3974_s29 }
  0x1f   : > { %p3971_p10 = pnand %p3969_p6, %p3955_p11  ;;  %p3977_p0 = scmp.lt.s32.totalorder %s3975_s30, %s3968_s24 }
  0x21   : > { %p3972_p12 = pneg %p3971_p10  ;;  %p3978_p1 = por %p3977_p0, %p3976_p9 }
  0x23   : > { %p3979_p2 = pnand %p3978_p1, %p3972_p12 }
  0x25   : > { %3982 = shalt.err (!%p3979_p2)
}
  0x26   : > { %s4054_s6 = smov 512   ;;  %s4055_s7 = smov 32  }
  0x27   : > { %3786 = dma.hbm_to_vmem [thread:$0]  (!%p4147_p8), %s4143_s8, 8192, %s4145_s10, %s187_s12, %s4054_s6, %s4054_s6, %s4055_s7  }
  0x28   : > { %p234_p13 = scmp.lt.s32.totalorder %s4051_s21, 3  ;;  %s3176_s9 = sshll.u32 %s4136_s28, 8 }
  0x29   : > { %s3313_s13 = sshll.u32 %s4051_s21, 12  ;;  %p5023_p9 = scmp.ge.s32.totalorder %s4051_s21, 1 }
  0x2a   : > { %s4192_s17 = scalar_lea.hbm %s5017_s3, %s3313_s13  ;;  %s211_s18 = scalar_lea.vmem [#allocation4], %s3176_s9 }
  0x2b   : > { %p4185_p3 = pnand %p5023_p9, %p234_p13  ;;  %s218_s24 = sshll.u32 %s211_s18, 4  ;;  %s4194_s24 = int_to_ptr.vmem [resolvable:$true] %s218_s24 }
  0x2c   : > { %s208_s8 = scalar_lea.sflag [#allocation5], %s4136_s28  ;;  %s3983_s10 = scalar_lea.hbm %s4192_s17, 4096 }
  0x2d   : > { %p3984_p4 = scmp.ne.s32.totalorder %s4192_s17, %s3983_s10  ;;  %s3988_s25 = scalar_lea.hbm %s5017_s3, 8192 }
  0x2e   : > { %p3989_p10 = scmp.lt.u32.totalorder %s4192_s17, %s5017_s3  ;;  %p3990_p12 = scmp.lt.u32.totalorder %s3988_s25, %s3983_s10 }
  0x2f   : > { %p3986_p5 = pnand %p3984_p4, %p3955_p11  ;;  %p3992_p1 = scmp.lt.u32.totalorder %s3983_s10, %s4192_s17 }
  0x30   : > { %p3991_p0 = por %p3990_p12, %p3989_p10 }
  0x31   : > { %p3987_p6 = pneg %p3986_p5 }
  0x32   : > { %p3993_p2 = por %p3992_p1, %p3991_p0 }
  0x34   : > { %p3994_p13 = pnand %p3993_p2, %p3987_p6 }
  0x36   : > { %3997 = shalt.err (!%p3994_p13)
}
  0x37   : > { %s3998_s6 = scalar_lea.vmem %s4194_s24, 4096  ;;  %s4056_s7 = smov [#allocation4]  }
  0x38   : > { %p3999_p9 = scmp.ne.s32.totalorder %s4194_s24, %s3998_s6  ;;  %s4003_s9 = sshll.u32 %s4056_s7, 4  ;;  %s4004_s9 = int_to_ptr.vmem [resolvable:$false] %s4003_s9 }
  0x39   : > { %s4005_s13 = scalar_lea.vmem %s4004_s9, 8192  ;;  %p4006_p7 = scmp.lt.s32.totalorder %s4194_s24, %s4004_s9 }
  0x3a   : > { %p4001_p4 = pnand %p3999_p9, %p3955_p11  ;;  %p4007_p10 = scmp.lt.s32.totalorder %s4005_s13, %s3998_s6 }
  0x3c   : > { %p4002_p5 = pneg %p4001_p4  ;;  %p4008_p12 = por %p4007_p10, %p4006_p7 }
  0x3e   : > { %p4009_p0 = pnand %p4008_p12, %p4002_p5 }
  0x40   : > { %4012 = shalt.err (!%p4009_p0)
}
  0x41   : > { %s4057_s15 = smov 64   ;;  %s4058_s16 = smov 4  }
  0x42   : > { %3789 = dma.hbm_to_vmem [thread:$0]  (!%p4147_p8), %s4192_s17, 4096, %s4194_s24, %s208_s8, %s4057_s15, %s4057_s15, %s4058_s16  }
  0x43   : > { %238 = sbr.rel (%p4185_p3) target bundleno = 7364 (0x1cc4), region = 40  ;;  %s240_s18 = sand.u32 (!%p4185_p3), 1, %s4043_s19  }
  0x44   : > { %s3180_s10 = sshll.u32 (!%p4185_p3), %s240_s18, 9  ;;  %s241_s21 = scalar_lea.sflag (!%p4185_p3), [#allocation3], %s240_s18 }
  0x45   : > { %s4225_s12 = scalar_lea.vmem (!%p4185_p3), [#allocation2], %s3180_s10  ;;  %p5025_p7 = scmp.ne.s32.totalorder (!%p4185_p3), %s5021_s27, 0 }
  0x4a   : > { %4030 = dma.done.wait (%p5025_p7), %s241_s21, 8192  }
  0x4b   : > { %4032 = vsyncadd (%p5025_p7), %s241_s21, 4294959104  ;;  %s3181_s25 = sshll.u32 %s240_s18, 8  ;;  %s250_s11 = scalar_lea.sflag [#allocation5], %s240_s18 }
  0x4c   : > { %s4231_s28 = scalar_lea.vmem [#allocation4], %s3181_s25 }
  0x4d   : > { %4034 = dma.done.wait (%p5025_p7), %s250_s11, 4096  }
  0x4e   : > { %4036 = vsyncadd (%p5025_p7), %s250_s11, 4294963200  ;;  %p285_p8 = scmp.lt.s32.totalorder %s4114_s22, 1  ;;  %p3183_p11 = scmp.ne.s32.totalorder %s4114_s22, 0 }
  0x4f   : > { %v295_v0 = vld [vmem:[%s5014_s0] sm:$0xff] (!%p3183_p11)  ;;  %v296_v1 = vld [vmem:[%s5014_s0 + $0x8] sm:$0xff] (!%p3183_p11) }
  0x50   : > { %s286_s14 = scalar_select %p285_p8, %s4114_s22, 1 }
  0x51   : > { %294 = sbr.rel (%p3183_p11) target bundleno = 397 (0x18d), region = 52  ;;  %299 = vadd.xlane.f32.xlu0 (!%p3183_p11), %v295_v0 }
  0x52   : > { %s3778_s17 = smul.u32 48, %s286_s14 }
  0x54   : > { %s4242_s29 = scalar_lea.vmem %s5018_s4, %s3778_s17 }
  0x55   : > { %301 = vadd.xlane.f32.xlu0 (!%p3183_p11), %v296_v1  ;;  %v297_v17 = vld [vmem:[%s4242_s29 + $0x1d] ss:$0 sm:$0xff] (!%p3183_p11)  ;;  %v298_v19 = vld [vmem:[%s4242_s29 + $0x1e] ss:$0 sm:$0xff] (!%p3183_p11) }
  0xde   : > { %v300_v2 = vpop.xlane.xlu0 %299 }
  0xdf   : > { %v304_v3 = vmul.f32 0.0078125, %v300_v2 }
  0xe1   : > { %v306_v4 = vsub.f32 %v295_v0, %v304_v3 }
  0xe2   : > { %v302_v5 = vpop.xlane.xlu0 %301 }
  0xe3   : > { %v305_v6 = vmul.f32 0.0078125, %v302_v5  ;;  %v308_v7 = vmul.f32 %v306_v4, %v306_v4 }
  0xe5   : > { %v307_v8 = vsub.f32 %v296_v1, %v305_v6  ;;  %310 = vadd.xlane.f32.xlu1 %v308_v7 }
  0xe7   : > { %v309_v9 = vmul.f32 %v307_v8, %v307_v8 }
  0xe9   : > { %312 = vadd.xlane.f32.xlu1 %v309_v9 }
 0x172   : > { %v311_v10 = vpop.xlane.xlu1 %310 }
 0x173   : > { %v314_v11 = vmul.f32 0.0078125, %v311_v10 }
 0x175   : > { %v316_v12 = vadd.f32 1e-05, %v314_v11 }
 0x176   : > { %v313_v13 = vpop.xlane.xlu1 %312 }
 0x177   : > { %3833 = vrsqrt.f32 %v316_v12  ;;  %v315_v14 = vmul.f32 0.0078125, %v313_v13 }
 0x179   : > { %v317_v15 = vadd.f32 1e-05, %v315_v14 }
 0x17b   : > { %3835 = vrsqrt.f32 %v317_v15 }
 0x181   : > { %v3834_v16 = vpop.eup %3833 }
 0x182   : > { %v320_v18 = vmul.f32 %v3834_v16, %v306_v4 }
 0x184   : > { %v322_v20 = vmul.f32 %v320_v18, %v297_v17 }
 0x185   : > { %v3836_v21 = vpop.eup %3835 }
 0x186   : > { %v324_v22 = vadd.f32 %v322_v20, %v298_v19  ;;  %v321_v23 = vmul.f32 %v3836_v21, %v307_v8 }
 0x188   : > { %326 = vst [vmem:[%s5019_s5] sm:$0xff] %v324_v22  ;;  %v323_v24 = vmul.f32 %v321_v23, %v297_v17 }
 0x18a   : > { %v325_v25 = vadd.f32 %v323_v24, %v298_v19 }
 0x18c   : > { %327 = vst [vmem:[%s5019_s5 + $0x8] sm:$0xff] %v325_v25 }
 0x18d PF: > { %v330_v26 = vld [vmem:[%s4225_s12] sm:$0xff]  ;;  %v4059_v32 = vmov 0   ;;  %v4060_v33 = vmov 0.0   ;;  %v331_v41 = vld [vmem:[%s4225_s12 + $0x8] sm:$0xf]  ;;  %vm4061_vm0 = vmmov 0   ;;  %v365_v23 = vlaneseq }
 0x18e   : > { %v332_v27 = vld [vmem:[%s4225_s12 + $0x20] sm:$0xff]  ;;  %540 = vmatprep.mubr.bf16.mxu0 %v4059_v32  ;;  %3466 = vmatprep.subr.bf16.mxu1 %v4060_v33  ;;  %v333_v42 = vld [vmem:[%s4225_s12 + $0x28] sm:$0xf]  ;;  %vm604_vm1 = vcmask 261120   ;;  %s4062_s25 = smov 96   ;;  %vm654_vm3 = vcmask 130048  }
 0x18f   : > { %v334_v28 = vld [vmem:[%s4225_s12 + $0x40] sm:$0xff]  ;;  %v3185_v29 = vcombine.high %v330_v26, %v332_v27  ;;  %v3184_v30 = vcombine.low %v330_v26, %v332_v27  ;;  %v335_v43 = vld [vmem:[%s4225_s12 + $0x48] sm:$0xf]  ;;  %v3186_v44 = vcombine.low %v331_v41, %v333_v42  ;;  %3482 = vmatprep.mubr.msk.bf16.mxu1 %vm4061_vm0, %v4060_v33  ;;  %v4320_v24 = vshrl.u32 %v365_v23, 7  ;;  %s4063_s11 = smov 64   ;;  %s4064_s14 = smov 32  }
 0x190   : > { %v336_v31 = vld [vmem:[%s4225_s12 + $0x60] sm:$0xff]  ;;  %v337_v45 = vld [vmem:[%s4225_s12 + $0x68] sm:$0xf] }
 0x191   : > { %v3188_v34 = vcombine.high %v334_v28, %v336_v31  ;;  %v338_v35 = vld [vmem:[%s4225_s12 + $0x80] sm:$0xff]  ;;  %508 = vmatprep.subr.bf16.mxu0 %v3185_v29  ;;  %v3187_v37 = vcombine.low %v334_v28, %v336_v31  ;;  %3467 = vmatpush3.bf16.msra.mxu1 %v3186_v44  ;;  %v3189_v50 = vcombine.low %v335_v43, %v337_v45  ;;  %v339_v51 = vld [vmem:[%s4225_s12 + $0x88] sm:$0xf]  ;;  %v4323_v25 = vsub.s32 0, %v4320_v24 }
 0x192   : > { %v340_v36 = vld [vmem:[%s4225_s12 + $0xa0] sm:$0xff]  ;;  %509 = vmatpush1.bf16.msra.mxu0 %v3184_v30  ;;  %3468 = vmatprep.subr.bf16.mxu1 %v4060_v33  ;;  %v341_v52 = vld [vmem:[%s4225_s12 + $0xa8] sm:$0xf]  ;;  %v4327_v27 = vsub.s32 1, %v4320_v24  ;;  %v375_v45 = vsub.s32 2, %v4320_v24 }
 0x193   : > { %510 = vmatprep.subr.bf16.mxu0 %v3188_v34  ;;  %v3191_v38 = vcombine.high %v338_v35, %v340_v36  ;;  %v342_v39 = vld [vmem:[%s4225_s12 + $0xc0] sm:$0xff]  ;;  %v3190_v46 = vcombine.low %v338_v35, %v340_v36  ;;  %v343_v56 = vld [vmem:[%s4225_s12 + $0xc8] sm:$0xf]  ;;  %v3192_v59 = vcombine.low %v339_v51, %v341_v52 }
 0x194   : > { %v344_v40 = vld [vmem:[%s4225_s12 + $0xe0] sm:$0xff]  ;;  %v345_v57 = vld [vmem:[%s4225_s12 + $0xe8] sm:$0xf] }
 0x195   : > { %v3194_v47 = vcombine.high %v342_v39, %v344_v40  ;;  %v346_v48 = vld [vmem:[%s4225_s12 + $0x100] sm:$0xff]  ;;  %v3193_v53 = vcombine.low %v342_v39, %v344_v40  ;;  %3469 = vmatpush3.bf16.msra.mxu1 %v3189_v50  ;;  %v347_v63 = vld [vmem:[%s4225_s12 + $0x108] sm:$0xf]  ;;  %v3195_v2 = vcombine.low %v343_v56, %v345_v57  ;;  %v4356_v57 = vand.u32 127, %v365_v23 }
 0x196   : > { %511 = vmatpush1.bf16.msra.mxu0 %v3187_v37  ;;  %v348_v49 = vld [vmem:[%s4225_s12 + $0x120] sm:$0xff]  ;;  %3470 = vmatprep.subr.bf16.mxu1 %v4060_v33  ;;  %v349_v0 = vld [vmem:[%s4225_s12 + $0x128] sm:$0xf] }
 0x197   : > { %512 = vmatprep.subr.bf16.mxu0 %v3191_v38  ;;  %v350_v54 = vld [vmem:[%s4225_s12 + $0x140] sm:$0xff]  ;;  %v3197_v58 = vcombine.high %v346_v48, %v348_v49  ;;  %v3196_v60 = vcombine.low %v346_v48, %v348_v49  ;;  %v351_v6 = vld [vmem:[%s4225_s12 + $0x148] sm:$0xf]  ;;  %v3198_v9 = vcombine.low %v347_v63, %v349_v0  ;;  %vm597_vm2 = vcmp.ge.s32.totalorder %v4320_v24, %v4356_v57 }
 0x198   : > { %v352_v55 = vld [vmem:[%s4225_s12 + $0x160] sm:$0xff]  ;;  %v353_v7 = vld [vmem:[%s4225_s12 + $0x168] sm:$0xf]  ;;  %vm1769_vm5 = vcmp.lt.s32.totalorder %v4356_v57, 24 }
 0x199   : > { %v354_v61 = vld [vmem:[%s4225_s12 + $0x180] sm:$0xff]  ;;  %v3200_v1 = vcombine.high %v350_v54, %v352_v55  ;;  %3471 = vmatpush3.bf16.msra.mxu1 %v3192_v59  ;;  %v3199_v3 = vcombine.low %v350_v54, %v352_v55  ;;  %v355_v11 = vld [vmem:[%s4225_s12 + $0x188] sm:$0xf]  ;;  %v3201_v14 = vcombine.low %v351_v6, %v353_v7 }
 0x19a   : > { %513 = vmatpush1.bf16.msra.mxu0 %v3190_v46  ;;  %v356_v62 = vld [vmem:[%s4225_s12 + $0x1a0] sm:$0xff]  ;;  %3472 = vmatprep.subr.bf16.mxu1 %v4060_v33  ;;  %v357_v12 = vld [vmem:[%s4225_s12 + $0x1a8] sm:$0xf] }
 0x19b   : > { %514 = vmatprep.subr.bf16.mxu0 %v3194_v47  ;;  %v358_v4 = vld [vmem:[%s4225_s12 + $0x1c0] sm:$0xff]  ;;  %v3203_v8 = vcombine.high %v354_v61, %v356_v62  ;;  %v3202_v10 = vcombine.low %v354_v61, %v356_v62  ;;  %v4303_v16 = vld [vmem:[%s5019_s5 + $0x8] sm:$0xff]  ;;  %v3204_v18 = vcombine.low %v355_v11, %v357_v12 }
 0x19c   : > { %v360_v5 = vld [vmem:[%s4225_s12 + $0x1e0] sm:$0xff]  ;;  %v359_v20 = vld [vmem:[%s4225_s12 + $0x1c8] sm:$0xf] }
 0x19d   : > { %3473 = vmatpush3.bf16.msra.mxu1 %v3195_v2  ;;  %v3206_v13 = vcombine.high %v358_v4, %v360_v5  ;;  %v4298_v15 = vld [vmem:[%s5019_s5] sm:$0xff]  ;;  %v3205_v17 = vcombine.low %v358_v4, %v360_v5  ;;  %v361_v21 = vld [vmem:[%s4225_s12 + $0x1e8] sm:$0xf] }
 0x19e   : > { %515 = vmatpush1.bf16.msra.mxu0 %v3193_v53  ;;  %3474 = vmatprep.subr.bf16.mxu1 %v4060_v33  ;;  %v362_v19 = vpack.c.bf16 %v4303_v16, %v4298_v15  ;;  %v3207_v22 = vcombine.low %v359_v20, %v361_v21  ;;  %v363_v26 = vld [vmem:[%s4242_s29] ss:$8 sm:$0x7] }
 0x19f   : > { %516 = vmatprep.subr.bf16.mxu0 %v3197_v58  ;;  %v368_v28 = vrot.slane %v363_v26, %v4323_v25  ;;  %v372_v30 = vrot.slane %v363_v26, %v4327_v27  ;;  %v376_v46 = vrot.slane %v363_v26, %v375_v45  ;;  %v4359_v58 = vadd.s32 8, %v4320_v24 }
 0x1a1   : > { %3475 = vmatpush3.bf16.msra.mxu1 %v3198_v9  ;;  %vm598_vm4 = vcmp.ge.s32.totalorder %v4359_v58, %v4356_v57 }
 0x1a2   : > { %517 = vmatpush1.bf16.msra.mxu0 %v3196_v60  ;;  %3476 = vmatprep.subr.bf16.mxu1 %v4060_v33 }
 0x1a3   : > { %518 = vmatprep.subr.bf16.mxu0 %v3200_v1 }
 0x1a5   : > { %3477 = vmatpush3.bf16.msra.mxu1 %v3201_v14 }
 0x1a6   : > { %519 = vmatpush1.bf16.msra.mxu0 %v3199_v3  ;;  %3478 = vmatprep.subr.bf16.mxu1 %v4060_v33 }
 0x1a7   : > { %520 = vmatprep.subr.bf16.mxu0 %v3203_v8 }
 0x1a9   : > { %3479 = vmatpush3.bf16.msra.mxu1 %v3204_v18 }
 0x1aa   : > { %521 = vmatpush1.bf16.msra.mxu0 %v3202_v10  ;;  %3480 = vmatprep.subr.bf16.mxu1 %v4060_v33 }
 0x1ab   : > { %522 = vmatprep.subr.bf16.mxu0 %v3206_v13 }
 0x1ad   : > { %3481 = vmatpush3.bf16.msra.mxu1 %v3207_v22 }
 0x1ae   : > { %523 = vmatpush1.bf16.msra.mxu0 %v3205_v17  ;;  %3486 = vmatprep.subr.bf16.mxu1 %v4060_v33 }
 0x1af   : > { %3498 = vmatprep.subr.bf16.mxu0 %v4060_v33 }
 0x1b0   : > { %3483 = vmatmul.mubr.bf16.vlgmr.msra.gmra.mrb[0].mxu1 %v362_v19 }
 0x1b1   : > { %541 = vmatmul.mubr.bf16.vlgmr.msra.gmra.mrb[0].mxu0 %v362_v19  ;;  %3488 = vmatprep.mubr.msk.bf16.mxu1 %vm4061_vm0, %v4060_v33 }
 0x1b2   : > { %3500 = vmatprep.mubr.msk.bf16.mxu0 %vm4061_vm0, %v4060_v33 }
 0x283   : > { %v585_v47 = vpop.f32.mrb[0].mxu1 }
 0x284   : > { %v542_v29 = vpop.f32.mrb[0].mxu0  ;;  %v586_v48 = vadd.f32 %v585_v47, %v376_v46  ;;  %v3484_v49 = vpop.f32.mrb[1].mxu1  ;;  %v3839_v47 = vld [vmem:[%s4231_s28 + $0x10] sm:$0xff]  }
 0x285   : > { %v543_v31 = vadd.f32 %v542_v29, %v368_v28  ;;  %v544_v34 = vpop.f32.mrb[1].mxu0  ;;  %v588_v50 = vpop.f32.mrb[2].mxu1 }
 0x286   : > { %v546_v35 = vpop.f32.mrb[2].mxu0  ;;  %v545_v38 = vadd.f32 %v544_v34, %v372_v30  ;;  %v589_v51 = vadd.f32 %v588_v50, %v376_v46  ;;  %v3485_v52 = vpop.f32.mrb[3].mxu1 }
 0x287   : > { %v547_v36 = vadd.f32 %v546_v35, %v368_v28  ;;  %v548_v37 = vpop.f32.mrb[3].mxu0  ;;  %v599_v40 = vmul.f32 0.17677669, %v543_v31 }
 0x288   : > { %v549_v39 = vadd.f32 %v548_v37, %v372_v30  ;;  %v4347_v53 = vpack.c.bf16 %v589_v51, %v586_v48  ;;  %v3840_v48 = vld [vmem:[%s4231_s28 + $0x18] sm:$0xff]  }
 0x289   : > { %v600_v41 = vmul.f32 0.17677669, %v547_v36 }
 0x28a   : > { %v4331_v42 = vpack.c.bf16 %v549_v39, %v545_v38 }
 0x28b   : > { %v4333_v43 = vpack.c.bf16 %v600_v41, %v599_v40 }
 0x28c   : > { %731 = vrot.lane.b32.xlu0 %v4331_v42, %s4062_s25  ;;  %v609_v44 = vsel %vm604_vm1, %v4331_v42, 0 }
 0x28d   : > { %3487 = vmatpush3.bf16.xpose.msra.mxu1 %v609_v44 }
 0x28e   : > { %3492 = vmatprep.subr.bf16.mxu1 %v4060_v33 }
 0x290   : > { %728 = vrot.lane.b32.xlu0 %v4333_v43, %s4062_s25 }
 0x294   : > { %3489 = vmatmul.mubr.msk.bf16.vlgmr.msra.gmra.mrb[4].mxu1 %vm604_vm1, %v4333_v43 }
 0x295   : > { %3494 = vmatprep.mubr.msk.bf16.mxu1 %vm4061_vm0, %v4060_v33  ;;  %3493 = vmatpush3.bf16.msra.mxu1 %v4347_v53 }
 0x296   : > { %3504 = vmatprep.subr.bf16.mxu1 %v4060_v33 }
 0x2fe   : > { %v732_v54 = vpop.permute.xlu0 %731 }
 0x2ff   : > { %v737_v55 = vsel %vm604_vm1, %v732_v54, 0 }
 0x300   : > { %3499 = vmatpush3.bf16.xpose.msra.mxu0 %v737_v55 }
 0x301   : > { %3510 = vmatprep.subr.bf16.mxu0 %v4060_v33 }
 0x302   : > { %v729_v56 = vpop.permute.xlu0 %728 }
 0x307   : > { %3501 = vmatmul.mubr.msk.bf16.vlgmr.msra.gmra.mrb[4].mxu0 %vm604_vm1, %v729_v56 }
 0x308   : > { %3514 = vmatprep.mubr.msk.bf16.mxu0 %vm4061_vm0, %v4060_v33  ;;  %3511 = vmatpush3.bf16.msra.mxu0 %v3839_v47 }
 0x309   : > { %3512 = vmatprep.subr.bf16.mxu0 %v4060_v33 }
 0x30c   : > { %3513 = vmatpush3.bf16.msra.mxu0 %v3840_v48 }
 0x30d   : > { %3526 = vmatprep.subr.bf16.mxu0 %v4060_v33 }
 0x367   : > { %v645_v59 = vpop.f32.mrb[4].mxu1 }
 0x368   : > { %v652_v60 = vsel %vm597_vm2, %v645_v59, -1e+30  ;;  %v3490_v61 = vpop.f32.mrb[5].mxu1  ;;  %v3837_v59 = vld [vmem:[%s4231_s28] sm:$0xff]  }
 0x369   : > { %v648_v62 = vpop.f32.mrb[6].mxu1  ;;  %v655_v63 = vsel %vm654_vm3, %v652_v60, -inf  ;;  %v3838_v61 = vld [vmem:[%s4231_s28 + $0x8] sm:$0xff]  }
 0x36a   : > { %v653_v0 = vsel %vm598_vm4, %v648_v62, -1e+30  ;;  %656 = vmax.xlane.f32.xlu1 %v655_v63  ;;  %v3491_v1 = vpop.f32.mrb[7].mxu1 }
 0x36b   : > { %v658_v2 = vsel %vm654_vm3, %v653_v0, -inf }
 0x36e   : > { %659 = vmax.xlane.f32.xlu1 %v658_v2 }
 0x3da   : > { %v773_v3 = vpop.f32.mrb[4].mxu0 }
 0x3db   : > { %v780_v4 = vsel %vm597_vm2, %v773_v3, -1e+30  ;;  %v3502_v5 = vpop.f32.mrb[5].mxu0 }
 0x3dc   : > { %v776_v6 = vpop.f32.mrb[6].mxu0  ;;  %v782_v7 = vsel %vm654_vm3, %v780_v4, -inf }
 0x3dd   : > { %v781_v8 = vsel %vm598_vm4, %v776_v6, -1e+30  ;;  %783 = vmax.xlane.f32.xlu0 %v782_v7  ;;  %v3503_v9 = vpop.f32.mrb[7].mxu0 }
 0x3de   : > { %v785_v10 = vsel %vm654_vm3, %v781_v8, -inf }
 0x3df   : > { %786 = vmax.xlane.f32.xlu1 %v785_v10 }
 0x3f3   : > { %972 = vrot.lane.b32.xlu0 %v4331_v42, %s4063_s11 }
 0x3f7   : > { %v657_v11 = vpop.xlane.xlu1 %656 }
 0x3f8   : > { %v661_v12 = vsub.f32 %v652_v60, %v657_v11 }
 0x3fa   : > { %v663_v13 = vmul.f32 1.442695, %v661_v12 }
 0x3fb   : > { %v660_v14 = vpop.xlane.xlu1 %659 }
 0x3fc   : > { %3877 = vpow2.f32 %v663_v13  ;;  %v662_v17 = vsub.f32 %v653_v0, %v660_v14 }
 0x3fe   : > { %v665_v18 = vmul.f32 1.442695, %v662_v17 }
 0x400   : > { %3879 = vpow2.f32 %v665_v18 }
 0x406   : > { %v3878_v19 = vpop.eup %3877 }
 0x407   : > { %v667_v20 = vsel %vm654_vm3, %v3878_v19, 0.0 }
 0x408   : > { %668 = vadd.xlane.f32.xlu1 %v667_v20 }
 0x40a   : > { %v3880_v21 = vpop.eup %3879 }
 0x40b   : > { %v670_v22 = vsel %vm654_vm3, %v3880_v21, 0.0 }
 0x40c   : > { %671 = vadd.xlane.f32.xlu1 %v670_v22 }
 0x46a   : > { %v784_v23 = vpop.xlane.xlu0 %783 }
 0x46b   : > { %v788_v26 = vsub.f32 %v780_v4, %v784_v23 }
 0x46c   : > { %v787_v28 = vpop.xlane.xlu1 %786 }
 0x46d   : > { %v790_v29 = vmul.f32 1.442695, %v788_v26  ;;  %v789_v30 = vsub.f32 %v781_v8, %v787_v28 }
 0x46e   : > { %v973_v5 = vpop.permute.xlu0 %972 }
 0x46f   : > { %3881 = vpow2.f32 %v790_v29  ;;  %v792_v31 = vmul.f32 1.442695, %v789_v30  ;;  %v978_v9 = vsel %vm604_vm1, %v973_v5, 0 }
 0x471   : > { %3883 = vpow2.f32 %v792_v31 }
 0x479   : > { %v3882_v34 = vpop.eup %3881 }
 0x47a   : > { %v794_v35 = vsel %vm654_vm3, %v3882_v34, 0.0 }
 0x47b   : > { %v3884_v36 = vpop.eup %3883  ;;  %795 = vadd.xlane.f32.xlu1 %v794_v35 }
 0x47c   : > { %v797_v37 = vsel %vm654_vm3, %v3884_v36, 0.0 }
 0x47f   : > { %798 = vadd.xlane.f32.xlu1 %v797_v37 }
 0x490   : > { %806 = vrot.lane.b32.xlu1 %v4347_v53, %s4062_s25 }
 0x494   : > { %970 = vrot.lane.b32.xlu1 %v4333_v43, %s4063_s11 }
 0x495   : > { %v669_v38 = vpop.xlane.xlu1 %668 }
 0x496   : > { %3885 = vrcp.f32 %v669_v38 }
 0x499   : > { %v672_v39 = vpop.xlane.xlu1 %671 }
 0x49a   : > { %3887 = vrcp.f32 %v672_v39 }
 0x4a0   : > { %v3886_v40 = vpop.eup %3885 }
 0x4a1   : > { %v675_v44 = vmul.f32 %v3886_v40, %v3878_v19 }
 0x4a4   : > { %v3888_v41 = vpop.eup %3887 }
 0x4a5   : > { %v676_v45 = vmul.f32 %v3888_v41, %v3880_v21 }
 0x4a7   : > { %v677_v46 = vpack.c.bf16 %v676_v45, %v675_v44 }
 0x4a9   : > { %3495 = vmatmul.mubr.msk.bf16.vlgmr.msra.gmra.mrb[8].mxu1 %vm654_vm3, %v677_v46 }
 0x4aa   : > { %3506 = vmatprep.mubr.msk.bf16.mxu1 %vm4061_vm0, %v4060_v33 }
 0x508   : > { %v796_v49 = vpop.xlane.xlu1 %795 }
 0x509   : > { %3889 = vrcp.f32 %v796_v49  ;;  %v3841_v49 = vld [vmem:[%s4231_s28 + $0x20] sm:$0xff]  }
 0x50c   : > { %v799_v50 = vpop.xlane.xlu1 %798 }
 0x50d   : > { %3891 = vrcp.f32 %v799_v50 }
 0x510   : > { %v807_v51 = vpop.permute.xlu1 %806 }
 0x511   : > { %3505 = vmatpush3.bf16.msra.mxu1 %v807_v51 }
 0x512   : > { %3518 = vmatprep.subr.bf16.mxu1 %v4060_v33 }
 0x513   : > { %v3890_v52 = vpop.eup %3889 }
 0x514   : > { %v802_v55 = vmul.f32 %v3890_v52, %v3882_v34  ;;  %v971_v10 = vpop.permute.xlu1 %970 }
 0x517   : > { %v3892_v54 = vpop.eup %3891 }
 0x518   : > { %v803_v56 = vmul.f32 %v3892_v54, %v3884_v36 }
 0x51a   : > { %v804_v60 = vpack.c.bf16 %v803_v56, %v802_v55 }
 0x51c   : > { %3507 = vmatmul.mubr.msk.bf16.vlgmr.msra.gmra.mrb[12].mxu1 %vm654_vm3, %v804_v60 }
 0x51d   : > { %3519 = vmatpush3.bf16.msra.mxu1 %v3837_v59  ;;  %3522 = vmatprep.mubr.msk.bf16.mxu1 %vm4061_vm0, %v4060_v33 }
 0x51e   : > { %3520 = vmatprep.subr.bf16.mxu1 %v4060_v33 }
 0x521   : > { %3521 = vmatpush3.bf16.msra.mxu1 %v3838_v61  ;;  %v3842_v61 = vld [vmem:[%s4231_s28 + $0x28] sm:$0xff]  }
 0x522   : > { %3532 = vmatprep.subr.bf16.mxu1 %v4060_v33 }
 0x57c   : > { %v715_v62 = vpop.f32.mrb[8].mxu1 }
 0x57d   : > { %v3496_v63 = vpop.f32.mrb[9].mxu1 }
 0x57e   : > { %v718_v0 = vpop.f32.mrb[10].mxu1 }
 0x57f   : > { %v726_v1 = vpack.c.bf16 %v718_v0, %v715_v62  ;;  %v3497_v2 = vpop.f32.mrb[11].mxu1 }
 0x581   : > { %3523 = vmatmul.mubr.msk.bf16.vlgmr.msra.gmra.mrb[16].mxu1 %vm604_vm1, %v726_v1 }
 0x582   : > { %3534 = vmatprep.mubr.msk.bf16.mxu1 %vm4061_vm0, %v4060_v33 }
 0x5ef   : > { %v846_v3 = vpop.f32.mrb[12].mxu1 }
 0x5f0   : > { %v3508_v4 = vpop.f32.mrb[13].mxu1 }
 0x5f1   : > { %v849_v6 = vpop.f32.mrb[14].mxu1 }
 0x5f2   : > { %v857_v7 = vpack.c.bf16 %v849_v6, %v846_v3  ;;  %v3509_v8 = vpop.f32.mrb[15].mxu1 }
 0x5f4   : > { %3515 = vmatmul.mubr.msk.bf16.vlgmr.msra.gmra.mrb[8].mxu0 %vm604_vm1, %v857_v7 }
 0x5f5   : > { %3527 = vmatpush3.bf16.xpose.msra.mxu0 %v978_v9  ;;  %3528 = vmatprep.mubr.msk.bf16.mxu0 %vm4061_vm0, %v4060_v33 }
 0x5f6   : > { %3538 = vmatprep.subr.bf16.mxu0 %v4060_v33 }
 0x5fc   : > { %3529 = vmatmul.mubr.msk.bf16.vlgmr.msra.gmra.mrb[12].mxu0 %vm604_vm1, %v971_v10 }
 0x5fd   : > { %3542 = vmatprep.mubr.msk.bf16.mxu0 %vm4061_vm0, %v4060_v33  ;;  %3539 = vmatpush3.bf16.msra.mxu0 %v3841_v49 }
 0x5fe   : > { %3540 = vmatprep.subr.bf16.mxu0 %v4060_v33 }
 0x601   : > { %3541 = vmatpush3.bf16.msra.mxu0 %v3842_v61  ;;  %v1500_v61 = vld [vmem:[%s4225_s12 + $0x30] sm:$0xff] }
 0x602   : > { %3552 = vmatprep.subr.bf16.mxu0 %v4060_v33 }
 0x654   : > { %v963_v11 = vpop.f32.mrb[16].mxu1 }
 0x655   : > { %v3524_v12 = vpop.f32.mrb[17].mxu1 }
 0x656   : > { %v966_v13 = vpop.f32.mrb[18].mxu1 }
 0x657   : > { %v3525_v14 = vpop.f32.mrb[19].mxu1 }
 0x6c7   : > { %v907_v17 = vpop.f32.mrb[8].mxu0 }
 0x6c8   : > { %v4417_v18 = vadd.f32 %v963_v11, %v907_v17  ;;  %v3516_v19 = vpop.f32.mrb[9].mxu0 }
 0x6c9   : > { %v910_v20 = vpop.f32.mrb[10].mxu0 }
 0x6ca   : > { %v4419_v21 = vadd.f32 %v966_v13, %v910_v20  ;;  %v3517_v22 = vpop.f32.mrb[11].mxu0 }
 0x6cf   : > { %v1014_v23 = vpop.f32.mrb[12].mxu0 }
 0x6d0   : > { %v1021_v26 = vsel %vm597_vm2, %v1014_v23, -1e+30  ;;  %v3530_v28 = vpop.f32.mrb[13].mxu0  ;;  %v3843_v23 = vld [vmem:[%s4231_s28 + $0x30] sm:$0xff]  }
 0x6d1   : > { %v1017_v29 = vpop.f32.mrb[14].mxu0  ;;  %v1023_v30 = vsel %vm654_vm3, %v1021_v26, -inf }
 0x6d2   : > { %v1022_v31 = vsel %vm598_vm4, %v1017_v29, -1e+30  ;;  %1024 = vmax.xlane.f32.xlu1 %v1023_v30  ;;  %v3531_v34 = vpop.f32.mrb[15].mxu0 }
 0x6d3   : > { %v1026_v35 = vsel %vm654_vm3, %v1022_v31, -inf }
 0x6d4   : > { %1027 = vmax.xlane.f32.xlu0 %v1026_v35 }
 0x6ea   : > { %1046 = vrot.lane.b32.xlu0 %v4347_v53, %s4063_s11 }
 0x75f   : > { %v1025_v36 = vpop.xlane.xlu1 %1024 }
 0x760   : > { %v1029_v37 = vsub.f32 %v1021_v26, %v1025_v36 }
 0x761   : > { %v1028_v38 = vpop.xlane.xlu0 %1027 }
 0x762   : > { %v1031_v39 = vmul.f32 1.442695, %v1029_v37  ;;  %v1030_v40 = vsub.f32 %v1022_v31, %v1028_v38 }
 0x764   : > { %3893 = vpow2.f32 %v1031_v39  ;;  %v1033_v41 = vmul.f32 1.442695, %v1030_v40 }
 0x765   : > { %v1047_v44 = vpop.permute.xlu0 %1046 }
 0x766   : > { %3895 = vpow2.f32 %v1033_v41  ;;  %3533 = vmatpush3.bf16.msra.mxu1 %v1047_v44 }
 0x767   : > { %3546 = vmatprep.subr.bf16.mxu1 %v4060_v33 }
 0x76e   : > { %v3894_v45 = vpop.eup %3893 }
 0x76f   : > { %v1035_v46 = vsel %vm654_vm3, %v3894_v45, 0.0 }
 0x770   : > { %v3896_v47 = vpop.eup %3895  ;;  %1036 = vadd.xlane.f32.xlu1 %v1035_v46 }
 0x771   : > { %v1038_v48 = vsel %vm654_vm3, %v3896_v47, 0.0 }
 0x774   : > { %1039 = vadd.xlane.f32.xlu1 %v1038_v48 }
 0x785   : > { %1158 = vrot.lane.b32.xlu1 %v4331_v42, %s4064_s14 }
 0x789   : > { %1156 = vrot.lane.b32.xlu1 %v4333_v43, %s4064_s14 }
 0x7fd   : > { %v1037_v50 = vpop.xlane.xlu1 %1036 }
 0x7fe   : > { %3897 = vrcp.f32 %v1037_v50 }
 0x801   : > { %v1040_v51 = vpop.xlane.xlu1 %1039 }
 0x802   : > { %3899 = vrcp.f32 %v1040_v51 }
 0x805   : > { %v1159_v59 = vpop.permute.xlu1 %1158 }
 0x806   : > { %v1164_v42 = vsel %vm604_vm1, %v1159_v59, 0 }
 0x808   : > { %v3898_v52 = vpop.eup %3897 }
 0x809   : > { %v1043_v55 = vmul.f32 %v3898_v52, %v3894_v45  ;;  %v1157_v43 = vpop.permute.xlu1 %1156  ;;  %v1344_v52 = vld [vmem:[%s4242_s29 + $0x1] ss:$0 sm:$0xff] }
 0x80c   : > { %v3900_v54 = vpop.eup %3899 }
 0x80d   : > { %v1044_v56 = vmul.f32 %v3900_v54, %v3896_v47 }
 0x80f   : > { %v1045_v60 = vpack.c.bf16 %v1044_v56, %v1043_v55 }
 0x811   : > { %3535 = vmatmul.mubr.msk.bf16.vlgmr.msra.gmra.mrb[20].mxu1 %vm654_vm3, %v1045_v60 }
 0x812   : > { %3547 = vmatpush3.bf16.xpose.msra.mxu1 %v1164_v42  ;;  %3548 = vmatprep.mubr.msk.bf16.mxu1 %vm4061_vm0, %v4060_v33 }
 0x813   : > { %3558 = vmatprep.subr.bf16.mxu1 %v4060_v33 }
 0x819   : > { %3549 = vmatmul.mubr.msk.bf16.vlgmr.msra.gmra.mrb[24].mxu1 %vm604_vm1, %v1157_v43  ;;  %v1499_v43 = vld [vmem:[%s4225_s12 + $0x10] sm:$0xff] }
 0x81a   : > { %3562 = vmatprep.mubr.msk.bf16.mxu1 %vm4061_vm0, %v4060_v33  ;;  %3559 = vmatpush3.bf16.msra.mxu1 %v3843_v23 }
 0x81b   : > { %3560 = vmatprep.subr.bf16.mxu1 %v4060_v33 }
 0x8e4   : > { %v1086_v62 = vpop.f32.mrb[20].mxu1 }
 0x8e5   : > { %v3536_v63 = vpop.f32.mrb[21].mxu1 }
 0x8e6   : > { %v1089_v0 = vpop.f32.mrb[22].mxu1  ;;  %v3246_v63 = vcombine.high %v1499_v43, %v1500_v61 }
 0x8e7   : > { %v1097_v1 = vpack.c.bf16 %v1089_v0, %v1086_v62  ;;  %v3537_v2 = vpop.f32.mrb[23].mxu1  ;;  %v3245_v62 = vcombine.low %v1499_v43, %v1500_v61  ;;  %v1502_v0 = vld [vmem:[%s4225_s12 + $0x70] sm:$0xff]  ;;  %v1384_v43 = vld [vmem:[%s4225_s12 + $0x10c] sm:$0xf] }
 0x8e8   : > { %v1504_v2 = vld [vmem:[%s4225_s12 + $0xb0] sm:$0xff]  ;;  %v1385_v61 = vld [vmem:[%s4225_s12 + $0x12c] sm:$0xf] }
 0x8e9   : > { %3543 = vmatmul.mubr.msk.bf16.vlgmr.msra.gmra.mrb[16].mxu0 %vm604_vm1, %v1097_v1 }
 0x8ea   : > { %3554 = vmatprep.mubr.msk.bf16.mxu0 %vm4061_vm0, %v4060_v33 }
 0x8ec   : > { %v1200_v3 = vpop.f32.mrb[24].mxu1 }
 0x8ed   : > { %v1207_v4 = vsel %vm597_vm2, %v1200_v3, -1e+30  ;;  %v3550_v5 = vpop.f32.mrb[25].mxu1 }
 0x8ee   : > { %v1203_v6 = vpop.f32.mrb[26].mxu1  ;;  %v1209_v7 = vsel %vm654_vm3, %v1207_v4, -inf  ;;  %v1505_v5 = vld [vmem:[%s4225_s12 + $0xd0] sm:$0xff] }
 0x8ef   : > { %v1208_v8 = vsel %vm598_vm4, %v1203_v6, -1e+30  ;;  %1210 = vmax.xlane.f32.xlu0 %v1209_v7  ;;  %v3551_v9 = vpop.f32.mrb[27].mxu1  ;;  %v1506_v6 = vld [vmem:[%s4225_s12 + $0xf0] sm:$0xff]  ;;  %v1376_v7 = vld [vmem:[%s4225_s12 + $0xc] sm:$0xf] }
 0x8f0   : > { %v1212_v10 = vsel %vm654_vm3, %v1208_v8, -inf }
 0x8f1   : > { %1213 = vmax.xlane.f32.xlu1 %v1212_v10 }
 0x902   : > { %1232 = vrot.lane.b32.xlu1 %v4347_v53, %s4064_s14 }
 0x97c   : > { %v1211_v11 = vpop.xlane.xlu0 %1210 }
 0x97d   : > { %v1215_v12 = vsub.f32 %v1207_v4, %v1211_v11  ;;  %v3252_v11 = vcombine.high %v1505_v5, %v1506_v6 }
 0x97e   : > { %v1214_v24 = vpop.xlane.xlu1 %1213 }
 0x97f   : > { %v1217_v13 = vmul.f32 1.442695, %v1215_v12  ;;  %v1216_v14 = vsub.f32 %v1208_v8, %v1214_v24  ;;  %v1377_v8 = vld [vmem:[%s4225_s12 + $0x2c] sm:$0xf]  ;;  %v1507_v12 = vld [vmem:[%s4225_s12 + $0x110] sm:$0xff] }
 0x980   : > { %v3228_v10 = vcombine.low %v1376_v7, %v1377_v8  ;;  %v1508_v24 = vld [vmem:[%s4225_s12 + $0x130] sm:$0xff]  ;;  %v3236_v7 = vld [vmem:[%s4242_s29 + $0x3] ss:$8 sm:$0x3] }
 0x981   : > { %3901 = vpow2.f32 %v1217_v13  ;;  %v1219_v17 = vmul.f32 1.442695, %v1216_v14  ;;  %v3251_v13 = vcombine.low %v1505_v5, %v1506_v6  ;;  %v3254_v14 = vcombine.high %v1507_v12, %v1508_v24  ;;  %v1391_v5 = vld [vmem:[%s4225_s12 + $0x1ec] sm:$0xf] }
 0x982   : > { %v1233_v19 = vpop.permute.xlu1 %1232  ;;  %v4571_v8 = vrot.slane %v3236_v7, %v4323_v25 }
 0x983   : > { %3903 = vpow2.f32 %v1219_v17  ;;  %3553 = vmatpush3.bf16.msra.mxu0 %v1233_v19  ;;  %v1509_v17 = vld [vmem:[%s4225_s12 + $0x150] sm:$0xff] }
 0x984   : > { %3566 = vmatprep.subr.bf16.mxu0 %v4060_v33  ;;  %v1510_v19 = vld [vmem:[%s4225_s12 + $0x170] sm:$0xff] }
 0x985   : > { %v3255_v23 = vcombine.low %v1509_v17, %v1510_v19 }
 0x98b   : > { %v3902_v58 = vpop.eup %3901 }
 0x98c   : > { %v1221_v20 = vsel %vm654_vm3, %v3902_v58, 0.0 }
 0x98d   : > { %v3904_v22 = vpop.eup %3903  ;;  %1222 = vadd.xlane.f32.xlu0 %v1221_v20  ;;  %v3256_v20 = vcombine.high %v1509_v17, %v1510_v19 }
 0x98e   : > { %v1224_v53 = vsel %vm654_vm3, %v3904_v22, 0.0 }
 0x991   : > { %1225 = vadd.xlane.f32.xlu0 %v1224_v53  ;;  %v1512_v53 = vld [vmem:[%s4225_s12 + $0x1b0] sm:$0xff] }
 0x9bc   : > { %v1147_v26 = vpop.f32.mrb[16].mxu0 }
 0x9bd   : > { %v1154_v28 = vadd.f32 %v1147_v26, %v4417_v18  ;;  %v3544_v29 = vpop.f32.mrb[17].mxu0  ;;  %v3844_v18 = vld [vmem:[%s4231_s28 + $0x38] sm:$0xff]  }
 0x9be   : > { %v1150_v30 = vpop.f32.mrb[18].mxu0  ;;  %3561 = vmatpush3.bf16.msra.mxu1 %v3844_v18  ;;  %v1514_v29 = vld [vmem:[%s4225_s12 + $0x1f0] sm:$0xff] }
 0x9bf   : > { %v1155_v31 = vadd.f32 %v1150_v30, %v4419_v21  ;;  %v3545_v34 = vpop.f32.mrb[19].mxu0  ;;  %1656 = vmatprep.subr.bf16.mxu1 %v3246_v63  ;;  %v1387_v63 = vld [vmem:[%s4225_s12 + $0x16c] sm:$0xf] }
 0xa1a   : > { %v1223_v35 = vpop.xlane.xlu0 %1222 }
 0xa1b   : > { %3905 = vrcp.f32 %v1223_v35  ;;  %v3845_v35 = vld [vmem:[%s5015_s1] sm:$0xff]  }
 0xa1e   : > { %v1226_v36 = vpop.xlane.xlu0 %1225 }
 0xa1f   : > { %3907 = vrcp.f32 %v1226_v36  ;;  %v3846_v36 = vld [vmem:[%s5015_s1 + $0x8] sm:$0xff]  }
 0xa25   : > { %v3906_v37 = vpop.eup %3905 }
 0xa26   : > { %v1229_v39 = vmul.f32 %v3906_v37, %v3902_v58  ;;  %v3253_v58 = vcombine.low %v1507_v12, %v1508_v24  ;;  %v3847_v37 = vld [vmem:[%s5015_s1 + $0x10] sm:$0xff]  }
 0xa29   : > { %v3908_v38 = vpop.eup %3907 }
 0xa2a   : > { %v1230_v40 = vmul.f32 %v3908_v38, %v3904_v22  ;;  %v1511_v22 = vld [vmem:[%s4225_s12 + $0x190] sm:$0xff]  ;;  %v3848_v38 = vld [vmem:[%s5015_s1 + $0x18] sm:$0xff]  }
 0xa2b   : > { %v3258_v26 = vcombine.high %v1511_v22, %v1512_v53  ;;  %v3257_v30 = vcombine.low %v1511_v22, %v1512_v53 }
 0xa2c   : > { %v1231_v41 = vpack.c.bf16 %v1230_v40, %v1229_v39  ;;  %v3849_v39 = vld [vmem:[%s5015_s1 + $0x20] sm:$0xff]  }
 0xa2e   : > { %3555 = vmatmul.mubr.msk.bf16.vlgmr.msra.gmra.mrb[20].mxu0 %vm654_vm3, %v1231_v41 }
 0xa2f   : > { %3582 = vmatprep.mubr.msk.bf16.mxu0 %vm4061_vm0, %v4060_v33  ;;  %3567 = vmatpush3.bf16.msra.mxu0 %v3228_v10 }
 0xa30   : > { %3568 = vmatprep.subr.bf16.mxu0 %v4060_v33 }
 0xb01   : > { %v1272_v44 = vpop.f32.mrb[20].mxu0 }
 0xb02   : > { %v3556_v21 = vpop.f32.mrb[21].mxu0 }
 0xb03   : > { %v1275_v45 = vpop.f32.mrb[22].mxu0 }
 0xb04   : > { %v1283_v46 = vpack.c.bf16 %v1275_v45, %v1272_v44  ;;  %v3557_v47 = vpop.f32.mrb[23].mxu0 }
 0xb06   : > { %3563 = vmatmul.mubr.msk.bf16.vlgmr.msra.gmra.mrb[28].mxu1 %vm604_vm1, %v1283_v46 }
 0xb07   : > { %1688 = vmatprep.mubr.bf16.mxu1 %v4059_v32  ;;  %1657 = vmatpush1.bf16.msra.mxu1 %v3245_v62  ;;  %v1386_v62 = vld [vmem:[%s4225_s12 + $0x14c] sm:$0xf] }
 0xbd9   : > { %v1333_v48 = vpop.f32.mrb[28].mxu1 }
 0xbda   : > { %v1340_v49 = vadd.f32 %v1333_v48, %v1154_v28  ;;  %v3564_v50 = vpop.f32.mrb[29].mxu1  ;;  %v1513_v28 = vld [vmem:[%s4225_s12 + $0x1d0] sm:$0xff]  ;;  %v1378_v48 = vld [vmem:[%s4225_s12 + $0x4c] sm:$0xf] }
 0xbdb   : > { %v1336_v51 = vpop.f32.mrb[30].mxu1  ;;  %v3259_v34 = vcombine.low %v1513_v28, %v1514_v29 }
 0xbdc   : > { %v1342_v54 = vadd.f32 %v1340_v49, %v4298_v15  ;;  %v1341_v55 = vadd.f32 %v1336_v51, %v1155_v31  ;;  %v3565_v56 = vpop.f32.mrb[31].mxu1  ;;  %v1501_v15 = vld [vmem:[%s4225_s12 + $0x50] sm:$0xff]  ;;  %v3260_v31 = vcombine.high %v1513_v28, %v1514_v29  ;;  %v1379_v49 = vld [vmem:[%s4225_s12 + $0x6c] sm:$0xf] }
 0xbdd   : > { %v3248_v1 = vcombine.high %v1501_v15, %v1502_v0  ;;  %v3247_v3 = vcombine.low %v1501_v15, %v1502_v0  ;;  %v3229_v50 = vcombine.low %v1378_v48, %v1379_v49  ;;  %v3850_v51 = vld [vmem:[%s5015_s1 + $0x28] sm:$0xff]   ;;  %v3232_v15 = vcombine.low %v1384_v43, %v1385_v61 }
 0xbde   : > { %v1343_v59 = vadd.f32 %v1341_v55, %v4303_v16  ;;  %v4479_v60 = vadd.f32 %v1344_v52, %v1342_v54  ;;  %v1503_v16 = vld [vmem:[%s4225_s12 + $0x90] sm:$0xff]  ;;  %v1381_v54 = vld [vmem:[%s4225_s12 + $0xac] sm:$0xf]  ;;  %v3233_v0 = vcombine.low %v1386_v62, %v1387_v63 }
 0xbdf   : > { %1658 = vmatprep.subr.bf16.mxu1 %v3248_v1  ;;  %v3250_v4 = vcombine.high %v1503_v16, %v1504_v2  ;;  %v3249_v9 = vcombine.low %v1503_v16, %v1504_v2  ;;  %3569 = vmatpush3.bf16.msra.mxu0 %v3229_v50  ;;  %v1382_v56 = vld [vmem:[%s4225_s12 + $0xcc] sm:$0xf]  ;;  %v3852_v1 = vld [vmem:[%s5015_s1 + $0x38] sm:$0xff]  }
 0xbe0   : > { %1349 = vadd.xlane.f32.xlu0 %v4479_v60  ;;  %v4482_v42 = vadd.f32 %v1344_v52, %v1343_v59  ;;  %1659 = vmatpush1.bf16.msra.mxu1 %v3247_v3  ;;  %v1380_v52 = vld [vmem:[%s4225_s12 + $0x8c] sm:$0xf] }
 0xbe1   : > { %1660 = vmatprep.subr.bf16.mxu1 %v3250_v4  ;;  %3570 = vmatprep.subr.bf16.mxu0 %v4060_v33  ;;  %v3230_v55 = vcombine.low %v1380_v52, %v1381_v54  ;;  %v1383_v59 = vld [vmem:[%s4225_s12 + $0xec] sm:$0xf] }
 0xbe2   : > { %v1388_v16 = vld [vmem:[%s4225_s12 + $0x18c] sm:$0xf] }
 0xbe3   : > { %3571 = vmatpush3.bf16.msra.mxu0 %v3230_v55  ;;  %v1389_v2 = vld [vmem:[%s4225_s12 + $0x1ac] sm:$0xf] }
 0xbe4   : > { %1351 = vadd.xlane.f32.xlu0 %v4482_v42  ;;  %1661 = vmatpush1.bf16.msra.mxu1 %v3249_v9  ;;  %v3234_v3 = vcombine.low %v1388_v16, %v1389_v2  ;;  %v1390_v4 = vld [vmem:[%s4225_s12 + $0x1cc] sm:$0xf]  ;;  %v4574_v9 = vrot.slane %v3236_v7, %v4327_v27 }
 0xbe5   : > { %1662 = vmatprep.subr.bf16.mxu1 %v3252_v11  ;;  %3572 = vmatprep.subr.bf16.mxu0 %v4060_v33  ;;  %v3235_v6 = vcombine.low %v1390_v4, %v1391_v5 }
 0xbe8   : > { %1663 = vmatpush1.bf16.msra.mxu1 %v3251_v13 }
 0xbe9   : > { %1664 = vmatprep.subr.bf16.mxu1 %v3254_v14 }
 0xbec   : > { %1665 = vmatpush1.bf16.msra.mxu1 %v3253_v58 }
 0xbed   : > { %1666 = vmatprep.subr.bf16.mxu1 %v3256_v20 }
 0xbf0   : > { %1667 = vmatpush1.bf16.msra.mxu1 %v3255_v23 }
 0xbf1   : > { %1668 = vmatprep.subr.bf16.mxu1 %v3258_v26 }
 0xbf4   : > { %1669 = vmatpush1.bf16.msra.mxu1 %v3257_v30 }
 0xbf5   : > { %1670 = vmatprep.subr.bf16.mxu1 %v3260_v31 }
 0xbf8   : > { %1671 = vmatpush1.bf16.msra.mxu1 %v3259_v34 }
 0xbf9   : > { %3606 = vmatprep.subr.bf16.mxu1 %v4060_v33 }
 0xbfb   : > { %1689 = vmatmul.mubr.bf16.vlgmr.msra.gmra.mrb[32].mxu1 %v3845_v35 }
 0xbfc   : > { %1698 = vmatprep.mubr.bf16.mxu1 %v4059_v32 }
 0xc03   : > { %1699 = vmatmul.mubr.bf16.gmra.mrb[36].mxu1 %v3846_v36 }
 0xc04   : > { %1708 = vmatprep.mubr.bf16.mxu1 %v4059_v32 }
 0xc0b   : > { %1709 = vmatmul.mubr.bf16.gmra.mrb[40].mxu1 %v3847_v37 }
 0xc0c   : > { %1718 = vmatprep.mubr.bf16.mxu1 %v4059_v32 }
 0xc13   : > { %1719 = vmatmul.mubr.bf16.gmra.mrb[44].mxu1 %v3848_v38 }
 0xc14   : > { %1728 = vmatprep.mubr.bf16.mxu1 %v4059_v32 }
 0xc1b   : > { %1729 = vmatmul.mubr.bf16.gmra.mrb[48].mxu1 %v3849_v39 }
 0xc1c   : > { %1738 = vmatprep.mubr.bf16.mxu1 %v4059_v32 }
 0xc23   : > { %1739 = vmatmul.mubr.bf16.gmra.mrb[52].mxu1 %v3850_v51 }
 0xc24   : > { %1748 = vmatprep.mubr.bf16.mxu1 %v4059_v32 }
 0xc6d   : > { %v1350_v40 = vpop.xlane.xlu0 %1349 }
 0xc6e   : > { %v1354_v41 = vmul.f32 0.0078125, %v1350_v40 }
 0xc70   : > { %v4526_v18 = vsub.f32 %v4479_v60, %v1354_v41  ;;  %v3231_v60 = vcombine.low %v1382_v56, %v1383_v59 }
 0xc71   : > { %v1352_v44 = vpop.xlane.xlu0 %1351 }
 0xc72   : > { %v1355_v21 = vmul.f32 0.0078125, %v1352_v44  ;;  %v1358_v45 = vmul.f32 %v4526_v18, %v4526_v18  ;;  %3573 = vmatpush3.bf16.msra.mxu0 %v3231_v60 }
 0xc73   : > { %3574 = vmatprep.subr.bf16.mxu0 %v4060_v33 }
 0xc74   : > { %v4531_v46 = vsub.f32 %v4482_v42, %v1355_v21  ;;  %1360 = vadd.xlane.f32.xlu0 %v1358_v45  ;;  %v3851_v42 = vld [vmem:[%s5015_s1 + $0x30] sm:$0xff]  }
 0xc75   : > { %1749 = vmatmul.mubr.bf16.gmra.mrb[56].mxu1 %v3851_v42 }
 0xc76   : > { %v1359_v47 = vmul.f32 %v4531_v46, %v4531_v46  ;;  %1758 = vmatprep.mubr.bf16.mxu1 %v4059_v32  ;;  %3575 = vmatpush3.bf16.msra.mxu0 %v3232_v15 }
 0xc77   : > { %3576 = vmatprep.subr.bf16.mxu0 %v4060_v33 }
 0xc78   : > { %1362 = vadd.xlane.f32.xlu0 %v1359_v47 }
 0xc7a   : > { %3577 = vmatpush3.bf16.msra.mxu0 %v3233_v0 }
 0xc7b   : > { %3578 = vmatprep.subr.bf16.mxu0 %v4060_v33 }
 0xc7d   : > { %1759 = vmatmul.mubr.bf16.gmra.mrb[60].mxu1 %v3852_v1 }
 0xc7e   : > { %3622 = vmatprep.mubr.msk.bf16.mxu1 %vm4061_vm0, %v4060_v33  ;;  %3579 = vmatpush3.bf16.msra.mxu0 %v3234_v3 }
 0xc7f   : > { %3580 = vmatprep.subr.bf16.mxu0 %v4060_v33 }
 0xc82   : > { %3581 = vmatpush3.bf16.msra.mxu0 %v3235_v6 }
 0xc83   : > { %3586 = vmatprep.subr.bf16.mxu0 %v4060_v33 }
 0xcce   : > { %v1690_v10 = vpop.f32.mrb[32].mxu1 }
 0xccf   : > { %v1691_v11 = vadd.f32 %v1690_v10, %v4571_v8  ;;  %v1692_v12 = vpop.f32.mrb[33].mxu1  ;;  %v1347_v10 = vld [vmem:[%s4242_s29 + $0x7] ss:$0 sm:$0xff] }
 0xcd0   : > { %v1693_v24 = vadd.f32 %v1692_v12, %v4574_v9  ;;  %v1694_v13 = vpop.f32.mrb[34].mxu1 }
 0xcd1   : > { %v1695_v14 = vadd.f32 %v1694_v13, %v4571_v8  ;;  %v1696_v17 = vpop.f32.mrb[35].mxu1 }
 0xcd2   : > { %v1697_v19 = vadd.f32 %v1696_v17, %v4574_v9 }
 0xcd3   : > { %v4580_v58 = vpack.c.bf16 %v1695_v14, %v1691_v11 }
 0xcd4   : > { %v4582_v20 = vpack.c.bf16 %v1697_v19, %v1693_v24  ;;  %v1348_v19 = vld [vmem:[%s4242_s29 + $0x18] ss:$0 sm:$0xff] }
 0xcd5   : > { %1935 = vrot.lane.b32.xlu1 %v4580_v58, %s4062_s25 }
 0xcd6   : > { %v1700_v22 = vpop.f32.mrb[36].mxu1  ;;  %3607 = vmatpush3.bf16.msra.mxu1 %v4582_v20 }
 0xcd7   : > { %v1701_v53 = vadd.f32 %v1700_v22, %v4571_v8  ;;  %v1702_v23 = vpop.f32.mrb[37].mxu1  ;;  %3608 = vmatprep.subr.bf16.mxu1 %v4060_v33 }
 0xcd8   : > { %v1703_v26 = vadd.f32 %v1702_v23, %v4574_v9  ;;  %v1704_v28 = vpop.f32.mrb[38].mxu1 }
 0xcd9   : > { %v1705_v29 = vadd.f32 %v1704_v28, %v4571_v8  ;;  %v1706_v30 = vpop.f32.mrb[39].mxu1 }
 0xcda   : > { %v1707_v31 = vadd.f32 %v1706_v30, %v4574_v9 }
 0xcdb   : > { %v4592_v34 = vpack.c.bf16 %v1705_v29, %v1701_v53 }
 0xcdc   : > { %v4594_v35 = vpack.c.bf16 %v1707_v31, %v1703_v26 }
 0xcdd   : > { %1937 = vrot.lane.b32.xlu0 %v4592_v34, %s4062_s25  ;;  %v1796_v26 = vsel %vm604_vm1, %v4592_v34, 0 }
 0xcde   : > { %v1710_v36 = vpop.f32.mrb[40].mxu1  ;;  %3609 = vmatpush3.bf16.msra.mxu1 %v4594_v35 }
 0xcdf   : > { %v1711_v37 = vadd.f32 %v1710_v36, %v4571_v8  ;;  %v1712_v38 = vpop.f32.mrb[41].mxu1  ;;  %3610 = vmatprep.subr.bf16.mxu1 %v4060_v33 }
 0xce0   : > { %v1713_v39 = vadd.f32 %v1712_v38, %v4574_v9  ;;  %v1714_v40 = vpop.f32.mrb[42].mxu1 }
 0xce1   : > { %v1715_v44 = vadd.f32 %v1714_v40, %v4571_v8  ;;  %v1716_v21 = vpop.f32.mrb[43].mxu1 }
 0xce2   : > { %v1717_v47 = vadd.f32 %v1716_v21, %v4574_v9 }
 0xce3   : > { %v4604_v48 = vpack.c.bf16 %v1715_v44, %v1711_v37 }
 0xce4   : > { %v4606_v50 = vpack.c.bf16 %v1717_v47, %v1713_v39 }
 0xce5   : > { %1939 = vrot.lane.b32.xlu1 %v4604_v48, %s4062_s25  ;;  %v1799_v28 = vsel %vm604_vm1, %v4604_v48, 0 }
 0xce6   : > { %v1720_v54 = vpop.f32.mrb[44].mxu1  ;;  %3611 = vmatpush3.bf16.msra.mxu1 %v4606_v50 }
 0xce7   : > { %v1721_v55 = vadd.f32 %v1720_v54, %v4571_v8  ;;  %v1722_v56 = vpop.f32.mrb[45].mxu1  ;;  %3612 = vmatprep.subr.bf16.mxu1 %v4060_v33 }
 0xce8   : > { %v1723_v60 = vadd.f32 %v1722_v56, %v4574_v9  ;;  %v1724_v42 = vpop.f32.mrb[46].mxu1 }
 0xce9   : > { %v1725_v43 = vadd.f32 %v1724_v42, %v4571_v8  ;;  %v1726_v61 = vpop.f32.mrb[47].mxu1 }
 0xcea   : > { %v1727_v15 = vadd.f32 %v1726_v61, %v4574_v9 }
 0xceb   : > { %v4616_v62 = vpack.c.bf16 %v1725_v43, %v1721_v55 }
 0xcec   : > { %v4618_v63 = vpack.c.bf16 %v1727_v15, %v1723_v60 }
 0xced   : > { %1941 = vrot.lane.b32.xlu1 %v4616_v62, %s4062_s25  ;;  %v1802_v29 = vsel %vm604_vm1, %v4616_v62, 0 }
 0xcee   : > { %v1730_v0 = vpop.f32.mrb[48].mxu1  ;;  %3613 = vmatpush3.bf16.msra.mxu1 %v4618_v63 }
 0xcef   : > { %v1731_v1 = vadd.f32 %v1730_v0, %v4571_v8  ;;  %v1732_v16 = vpop.f32.mrb[49].mxu1  ;;  %3614 = vmatprep.subr.bf16.mxu1 %v4060_v33 }
 0xcf0   : > { %v1733_v3 = vadd.f32 %v1732_v16, %v4574_v9  ;;  %v1734_v4 = vpop.f32.mrb[50].mxu1 }
 0xcf1   : > { %v1735_v6 = vadd.f32 %v1734_v4, %v4571_v8  ;;  %v1736_v7 = vpop.f32.mrb[51].mxu1 }
 0xcf2   : > { %v1737_v11 = vadd.f32 %v1736_v7, %v4574_v9 }
 0xcf3   : > { %v4630_v12 = vpack.c.bf16 %v1735_v6, %v1731_v1 }
 0xcf4   : > { %v4632_v13 = vpack.c.bf16 %v1737_v11, %v1733_v3 }
 0xcf5   : > { %1943 = vrot.lane.b32.xlu1 %v4630_v12, %s4062_s25  ;;  %v1805_v30 = vsel %vm604_vm1, %v4630_v12, 0 }
 0xcf6   : > { %3615 = vmatpush3.bf16.msra.mxu1 %v4632_v13  ;;  %v1740_v31 = vpop.f32.mrb[52].mxu1 }
 0xcf7   : > { %3616 = vmatprep.subr.bf16.mxu1 %v4060_v33  ;;  %v1741_v36 = vadd.f32 %v1740_v31, %v4571_v8  ;;  %v1742_v37 = vpop.f32.mrb[53].mxu1 }
 0xcf8   : > { %v1743_v38 = vadd.f32 %v1742_v37, %v4574_v9  ;;  %v1744_v39 = vpop.f32.mrb[54].mxu1 }
 0xcf9   : > { %v1745_v40 = vadd.f32 %v1744_v39, %v4571_v8 }
 0xcfb   : > { %v4667_v21 = vpack.c.bf16 %v1745_v40, %v1741_v36 }
 0xcfd   : > { %1945 = vrot.lane.b32.xlu1 %v4667_v21, %s4062_s25  ;;  %v1808_v47 = vsel %vm604_vm1, %v4667_v21, 0 }
 0xd01   : > { %v1361_v41 = vpop.xlane.xlu0 %1360 }
 0xd02   : > { %v1364_v45 = vmul.f32 0.0078125, %v1361_v41  ;;  %v1746_v41 = vpop.f32.mrb[55].mxu1 }
 0xd03   : > { %v1747_v44 = vadd.f32 %v1746_v41, %v4574_v9 }
 0xd04   : > { %v1366_v49 = vadd.f32 1e-05, %v1364_v45 }
 0xd05   : > { %v1363_v51 = vpop.xlane.xlu0 %1362  ;;  %v4669_v45 = vpack.c.bf16 %v1747_v44, %v1743_v38 }
 0xd06   : > { %3909 = vrsqrt.f32 %v1366_v49  ;;  %v1365_v52 = vmul.f32 0.0078125, %v1363_v51 }
 0xd07   : > { %3617 = vmatpush3.bf16.msra.mxu1 %v4669_v45 }
 0xd08   : > { %v1367_v59 = vadd.f32 1e-05, %v1365_v52  ;;  %3618 = vmatprep.subr.bf16.mxu1 %v4060_v33 }
 0xd0a   : > { %3911 = vrsqrt.f32 %v1367_v59 }
 0xd10   : > { %v3910_v2 = vpop.eup %3909 }
 0xd11   : > { %v1370_v5 = vmul.f32 %v3910_v2, %v4526_v18 }
 0xd13   : > { %v1372_v17 = vmul.f32 %v1370_v5, %v1347_v10 }
 0xd14   : > { %v3912_v24 = vpop.eup %3911 }
 0xd15   : > { %v1371_v14 = vmul.f32 %v3912_v24, %v4531_v46  ;;  %v4640_v22 = vadd.f32 %v1372_v17, %v1348_v19  ;;  %v1793_v46 = vsel %vm604_vm1, %v4580_v58, 0 }
 0xd17   : > { %v1373_v18 = vmul.f32 %v1371_v14, %v1347_v10 }
 0xd19   : > { %v4642_v53 = vadd.f32 %v1373_v18, %v1348_v19 }
 0xd1b   : > { %v1392_v23 = vpack.c.bf16 %v4642_v53, %v4640_v22 }
 0xd1d   : > { %3583 = vmatmul.mubr.bf16.vlgmr.msra.gmra.mrb[24].mxu0 %v1392_v23 }
 0xd1e   : > { %3587 = vmatpush3.bf16.xpose.msra.mxu0 %v1793_v46  ;;  %3602 = vmatprep.mubr.msk.bf16.mxu0 %vm4061_vm0, %v4060_v33 }
 0xd1f   : > { %3588 = vmatprep.subr.bf16.mxu0 %v4060_v33 }
 0xd26   : > { %3589 = vmatpush3.bf16.xpose.msra.mxu0 %v1796_v26 }
 0xd27   : > { %3590 = vmatprep.subr.bf16.mxu0 %v4060_v33 }
 0xd2e   : > { %3591 = vmatpush3.bf16.xpose.msra.mxu0 %v1799_v28 }
 0xd2f   : > { %3592 = vmatprep.subr.bf16.mxu0 %v4060_v33 }
 0xd36   : > { %3593 = vmatpush3.bf16.xpose.msra.mxu0 %v1802_v29 }
 0xd37   : > { %3594 = vmatprep.subr.bf16.mxu0 %v4060_v33 }
 0xd3e   : > { %3595 = vmatpush3.bf16.xpose.msra.mxu0 %v1805_v30 }
 0xd3f   : > { %3596 = vmatprep.subr.bf16.mxu0 %v4060_v33 }
 0xd46   : > { %3597 = vmatpush3.bf16.xpose.msra.mxu0 %v1808_v47 }
 0xd47   : > { %3598 = vmatprep.subr.bf16.mxu0 %v4060_v33  ;;  %v1936_v18 = vpop.permute.xlu1 %1935 }
 0xd48   : > { %v1750_v49 = vpop.f32.mrb[56].mxu1  ;;  %v1955_v28 = vsel %vm604_vm1, %v1936_v18, 0 }
 0xd49   : > { %v1751_v51 = vadd.f32 %v1750_v49, %v4571_v8  ;;  %v1752_v52 = vpop.f32.mrb[57].mxu1 }
 0xd4a   : > { %v1753_v54 = vadd.f32 %v1752_v52, %v4574_v9  ;;  %v1754_v55 = vpop.f32.mrb[58].mxu1 }
 0xd4b   : > { %v1755_v56 = vadd.f32 %v1754_v55, %v4571_v8  ;;  %v1756_v59 = vpop.f32.mrb[59].mxu1 }
 0xd4c   : > { %v1757_v60 = vadd.f32 %v1756_v59, %v4574_v9 }
 0xd4d   : > { %v4682_v42 = vpack.c.bf16 %v1755_v56, %v1751_v51 }
 0xd4e   : > { %v4684_v43 = vpack.c.bf16 %v1757_v60, %v1753_v54 }
 0xd4f   : > { %1947 = vrot.lane.b32.xlu1 %v4682_v42, %s4062_s25  ;;  %v1811_v61 = vsel %vm604_vm1, %v4682_v42, 0  ;;  %v1938_v29 = vpop.permute.xlu0 %1937 }
 0xd50   : > { %v1760_v15 = vpop.f32.mrb[60].mxu1  ;;  %3619 = vmatpush3.bf16.msra.mxu1 %v4684_v43  ;;  %3599 = vmatpush3.bf16.xpose.msra.mxu0 %v1811_v61  ;;  %v1958_v30 = vsel %vm604_vm1, %v1938_v29, 0 }
 0xd51   : > { %v1761_v0 = vadd.f32 %v1760_v15, %v4571_v8  ;;  %v1762_v1 = vpop.f32.mrb[61].mxu1  ;;  %3620 = vmatprep.subr.bf16.mxu1 %v4060_v33  ;;  %3600 = vmatprep.subr.bf16.mxu0 %v4060_v33 }
 0xd52   : > { %v1763_v16 = vadd.f32 %v1762_v1, %v4574_v9  ;;  %v1764_v2 = vpop.f32.mrb[62].mxu1 }
 0xd53   : > { %v1765_v3 = vadd.f32 %v1764_v2, %v4571_v8  ;;  %v1766_v4 = vpop.f32.mrb[63].mxu1  ;;  %v1393_v8 = vld [vmem:[%s4242_s29 + $0x2] ss:$0 sm:$0xff] }
 0xd54   : > { %v1767_v5 = vadd.f32 %v1766_v4, %v4574_v9 }
 0xd55   : > { %v4697_v6 = vpack.c.bf16 %v1765_v3, %v1761_v0 }
 0xd56   : > { %v4699_v7 = vpack.c.bf16 %v1767_v5, %v1763_v16 }
 0xd57   : > { %1949 = vrot.lane.b32.xlu0 %v4697_v6, %s4062_s25  ;;  %v1814_v10 = vsel %vm604_vm1, %v4697_v6, 0  ;;  %v1940_v31 = vpop.permute.xlu1 %1939 }
 0xd58   : > { %3621 = vmatpush3.bf16.msra.mxu1 %v4699_v7  ;;  %3601 = vmatpush3.bf16.xpose.msra.mxu0 %v1814_v10  ;;  %v1961_v36 = vsel %vm604_vm1, %v1940_v31, 0 }
 0xd59   : > { %3646 = vmatprep.subr.bf16.mxu1 %v4060_v33  ;;  %3626 = vmatprep.subr.bf16.mxu0 %v4060_v33 }
 0xd5f   : > { %v1942_v37 = vpop.permute.xlu1 %1941 }
 0xd60   : > { %v1964_v38 = vsel %vm604_vm1, %v1942_v37, 0 }
 0xd67   : > { %v1944_v39 = vpop.permute.xlu1 %1943 }
 0xd68   : > { %v1967_v40 = vsel %vm604_vm1, %v1944_v39, 0 }
 0xd6f   : > { %v1946_v41 = vpop.permute.xlu1 %1945 }
 0xd70   : > { %v1970_v44 = vsel %vm604_vm1, %v1946_v41, 0 }
 0xdc1   : > { %v1948_v47 = vpop.permute.xlu1 %1947 }
 0xdc2   : > { %v1973_v49 = vsel %vm604_vm1, %v1948_v47, 0 }
 0xdc9   : > { %v1950_v51 = vpop.permute.xlu0 %1949 }
 0xdca   : > { %v1976_v52 = vsel %vm604_vm1, %v1950_v51, 0 }
 0xdf0   : > { %v1476_v11 = vpop.f32.mrb[24].mxu0 }
 0xdf1   : > { %v1477_v9 = vadd.f32 %v1476_v11, %v1393_v8  ;;  %v3584_v24 = vpop.f32.mrb[25].mxu0 }
 0xdf2   : > { %v1479_v14 = vpop.f32.mrb[26].mxu0 }
 0xdf3   : > { %v1480_v17 = vadd.f32 %v1479_v14, %v1393_v8  ;;  %v3585_v19 = vpop.f32.mrb[27].mxu0  ;;  %v1770_v23 = vmul.f32 0.17677669, %v1477_v9 }
 0xdf5   : > { %v1771_v46 = vmul.f32 0.17677669, %v1480_v17 }
 0xdf7   : > { %v4709_v26 = vpack.c.bf16 %v1771_v46, %v1770_v23 }
 0xdf9   : > { %1925 = vrot.lane.b32.xlu1 %v4709_v26, %s4062_s25  ;;  %3603 = vmatmul.mubr.msk.bf16.vlgmr.msra.gmra.mrb[28].mxu0 %vm604_vm1, %v4709_v26 }
 0xdfa   : > { %3627 = vmatpush3.bf16.xpose.msra.mxu0 %v1955_v28  ;;  %3642 = vmatprep.mubr.msk.bf16.mxu0 %vm4061_vm0, %v4060_v33 }
 0xdfb   : > { %3628 = vmatprep.subr.bf16.mxu0 %v4060_v33 }
 0xe02   : > { %3629 = vmatpush3.bf16.xpose.msra.mxu0 %v1958_v30 }
 0xe03   : > { %3630 = vmatprep.subr.bf16.mxu0 %v4060_v33 }
 0xe0a   : > { %3631 = vmatpush3.bf16.xpose.msra.mxu0 %v1961_v36 }
 0xe0b   : > { %3632 = vmatprep.subr.bf16.mxu0 %v4060_v33 }
 0xe12   : > { %3633 = vmatpush3.bf16.xpose.msra.mxu0 %v1964_v38 }
 0xe13   : > { %3634 = vmatprep.subr.bf16.mxu0 %v4060_v33 }
 0xe1a   : > { %3635 = vmatpush3.bf16.xpose.msra.mxu0 %v1967_v40 }
 0xe1b   : > { %3636 = vmatprep.subr.bf16.mxu0 %v4060_v33 }
 0xe22   : > { %3637 = vmatpush3.bf16.xpose.msra.mxu0 %v1970_v44 }
 0xe23   : > { %3638 = vmatprep.subr.bf16.mxu0 %v4060_v33 }
 0xe2a   : > { %3639 = vmatpush3.bf16.xpose.msra.mxu0 %v1973_v49 }
 0xe2b   : > { %3640 = vmatprep.subr.bf16.mxu0 %v4060_v33 }
 0xe32   : > { %3641 = vmatpush3.bf16.xpose.msra.mxu0 %v1976_v52 }
 0xe33   : > { %3702 = vmatprep.subr.bf16.mxu0 %v4060_v33 }
 0xe6b   : > { %v1926_v54 = vpop.permute.xlu1 %1925 }
 0xe6c   : > { %3643 = vmatmul.mubr.msk.bf16.vlgmr.msra.gmra.mrb[32].mxu0 %vm604_vm1, %v1926_v54 }
 0xe6d   : > { %3718 = vmatprep.mubr.msk.bf16.mxu0 %vm4061_vm0, %v4060_v33 }
 0xecc   : > { %v1850_v55 = vpop.f32.mrb[28].mxu0 }
 0xecd   : > { %v3604_v56 = vpop.f32.mrb[29].mxu0  ;;  %v1857_v59 = vsel %vm1769_vm5, %v1850_v55, -1e+30 }
 0xece   : > { %1859 = vmax.xlane.f32.xlu0 %v1857_v59  ;;  %v1853_v60 = vpop.f32.mrb[30].mxu0 }
 0xecf   : > { %v3605_v61 = vpop.f32.mrb[31].mxu0  ;;  %v1858_v15 = vsel %vm1769_vm5, %v1853_v60, -1e+30 }
 0xed0   : > { %1861 = vmax.xlane.f32.xlu1 %v1858_v15 }
 0xf3f   : > { %v2012_v0 = vpop.f32.mrb[32].mxu0 }
 0xf40   : > { %v3644_v1 = vpop.f32.mrb[33].mxu0  ;;  %v2019_v16 = vsel %vm1769_vm5, %v2012_v0, -1e+30 }
 0xf41   : > { %2021 = vmax.xlane.f32.xlu0 %v2019_v16  ;;  %v2015_v2 = vpop.f32.mrb[34].mxu0 }
 0xf42   : > { %v3645_v3 = vpop.f32.mrb[35].mxu0  ;;  %v2020_v4 = vsel %vm1769_vm5, %v2015_v2, -1e+30  ;;  %v3853_v2 = vld [vmem:[%s4231_s28 + $0x50] sm:$0xff]  }
 0xf45   : > { %2023 = vmax.xlane.f32.xlu0 %v2020_v4 }
 0xf5b   : > { %v1860_v5 = vpop.xlane.xlu0 %1859 }
 0xf5c   : > { %v1863_v10 = vsub.f32 %v1857_v59, %v1860_v5 }
 0xf5d   : > { %v1862_v8 = vpop.xlane.xlu1 %1861 }
 0xf5e   : > { %v1865_v11 = vmul.f32 1.442695, %v1863_v10  ;;  %v1864_v9 = vsub.f32 %v1858_v15, %v1862_v8 }
 0xf60   : > { %3913 = vpow2.f32 %v1865_v11  ;;  %v1867_v24 = vmul.f32 1.442695, %v1864_v9 }
 0xf62   : > { %3915 = vpow2.f32 %v1867_v24 }
 0xf6a   : > { %v3914_v14 = vpop.eup %3913 }
 0xf6b   : > { %1869 = vadd.xlane.f32.xlu1 %v3914_v14 }
 0xf6c   : > { %v3916_v17 = vpop.eup %3915 }
 0xf6d   : > { %1871 = vadd.xlane.f32.xlu0 %v3916_v17 }
 0xf7c   : > { %2048 = vrot.lane.b32.xlu1 %v4582_v20, %s4062_s25 }
 0xf80   : > { %2052 = vrot.lane.b32.xlu1 %v4606_v50, %s4062_s25 }
 0xf83   : > { %2050 = vrot.lane.b32.xlu0 %v4594_v35, %s4062_s25 }
 0xf84   : > { %2054 = vrot.lane.b32.xlu1 %v4618_v63, %s4062_s25 }
 0xf88   : > { %2056 = vrot.lane.b32.xlu1 %v4632_v13, %s4062_s25 }
 0xf8c   : > { %2058 = vrot.lane.b32.xlu1 %v4669_v45, %s4062_s25 }
 0xf90   : > { %2062 = vrot.lane.b32.xlu1 %v4699_v7, %s4062_s25 }
 0xf94   : > { %2234 = vrot.lane.b32.xlu1 %v4592_v34, %s4063_s11 }
 0xf98   : > { %2238 = vrot.lane.b32.xlu1 %v4616_v62, %s4063_s11 }
 0xf9c   : > { %2242 = vrot.lane.b32.xlu1 %v4667_v21, %s4063_s11 }
 0xfa0   : > { %2246 = vrot.lane.b32.xlu1 %v4697_v6, %s4063_s11 }
 0xfce   : > { %v2022_v19 = vpop.xlane.xlu0 %2021 }
 0xfcf   : > { %v2025_v18 = vsub.f32 %v2019_v16, %v2022_v19  ;;  %v3855_v19 = vld [vmem:[%s4231_s28 + $0x40] sm:$0xff]  }
 0xfd1   : > { %v2027_v23 = vmul.f32 1.442695, %v2025_v18 }
 0xfd2   : > { %v2024_v46 = vpop.xlane.xlu0 %2023 }
 0xfd3   : > { %3917 = vpow2.f32 %v2027_v23  ;;  %v2026_v28 = vsub.f32 %v2020_v4, %v2024_v46  ;;  %v3854_v4 = vld [vmem:[%s4231_s28 + $0x58] sm:$0xff]   ;;  %v3856_v46 = vld [vmem:[%s4231_s28 + $0x48] sm:$0xff]  }
 0xfd5   : > { %v2029_v29 = vmul.f32 1.442695, %v2026_v28 }
 0xfd7   : > { %3919 = vpow2.f32 %v2029_v29 }
 0xfdd   : > { %v3918_v30 = vpop.eup %3917 }
 0xfde   : > { %2031 = vadd.xlane.f32.xlu0 %v3918_v30 }
 0xfe1   : > { %v3920_v31 = vpop.eup %3919 }
 0xfe2   : > { %2033 = vadd.xlane.f32.xlu0 %v3920_v31 }
 0xff8   : > { %v1870_v36 = vpop.xlane.xlu1 %1869  ;;  %2060 = vrot.lane.b32.xlu0 %v4684_v43, %s4062_s25 }
 0xff9   : > { %3921 = vrcp.f32 %v1870_v36 }
 0xffa   : > { %v1872_v37 = vpop.xlane.xlu0 %1871 }
 0xffb   : > { %3923 = vrcp.f32 %v1872_v37 }
 0xffc   : > { %2232 = vrot.lane.b32.xlu0 %v4580_v58, %s4063_s11  ;;  %v2049_v44 = vpop.permute.xlu1 %2048 }
 0xffe   : > { %v2051_v51 = vpop.permute.xlu0 %2050 }
0x1000   : > { %2236 = vrot.lane.b32.xlu0 %v4604_v48, %s4063_s11  ;;  %v2053_v49 = vpop.permute.xlu1 %2052 }
0x1003   : > { %v3922_v38 = vpop.eup %3921 }
0x1004   : > { %2240 = vrot.lane.b32.xlu0 %v4630_v12, %s4063_s11  ;;  %v1875_v40 = vmul.f32 %v3922_v38, %v3914_v14  ;;  %v2055_v52 = vpop.permute.xlu1 %2054 }
0x1005   : > { %v3924_v39 = vpop.eup %3923 }
0x1006   : > { %v1876_v41 = vmul.f32 %v3924_v39, %v3916_v17 }
0x1008   : > { %2244 = vrot.lane.b32.xlu0 %v4682_v42, %s4063_s11  ;;  %v1877_v47 = vpack.c.bf16 %v1876_v41, %v1875_v40  ;;  %v2057_v54 = vpop.permute.xlu1 %2056 }
0x100a   : > { %3623 = vmatmul.mubr.bf16.vlgmr.msra.gmra.mrb[64].mxu1 %v1877_v47 }
0x100b   : > { %3647 = vmatpush3.bf16.msra.mxu1 %v2049_v44  ;;  %3662 = vmatprep.mubr.msk.bf16.mxu1 %vm4061_vm0, %v4060_v33 }
0x100c   : > { %2230 = vrot.lane.b32.xlu0 %v4709_v26, %s4063_s11  ;;  %3648 = vmatprep.subr.bf16.mxu1 %v4060_v33  ;;  %v2059_v55 = vpop.permute.xlu1 %2058 }
0x100f   : > { %3649 = vmatpush3.bf16.msra.mxu1 %v2051_v51 }
0x1010   : > { %3650 = vmatprep.subr.bf16.mxu1 %v4060_v33  ;;  %v2063_v61 = vpop.permute.xlu1 %2062 }
0x1013   : > { %3651 = vmatpush3.bf16.msra.mxu1 %v2053_v49 }
0x1014   : > { %3652 = vmatprep.subr.bf16.mxu1 %v4060_v33 }
0x1017   : > { %3653 = vmatpush3.bf16.msra.mxu1 %v2055_v52 }
0x1018   : > { %3654 = vmatprep.subr.bf16.mxu1 %v4060_v33 }
0x101b   : > { %3655 = vmatpush3.bf16.msra.mxu1 %v2057_v54 }
0x101c   : > { %3656 = vmatprep.subr.bf16.mxu1 %v4060_v33 }
0x101f   : > { %3657 = vmatpush3.bf16.msra.mxu1 %v2059_v55 }
0x1020   : > { %3658 = vmatprep.subr.bf16.mxu1 %v4060_v33 }
0x106b   : > { %v2032_v56 = vpop.xlane.xlu0 %2031 }
0x106c   : > { %3925 = vrcp.f32 %v2032_v56 }
0x106f   : > { %v2034_v59 = vpop.xlane.xlu0 %2033 }
0x1070   : > { %3927 = vrcp.f32 %v2034_v59 }
0x1073   : > { %v2061_v60 = vpop.permute.xlu0 %2060 }
0x1074   : > { %3659 = vmatpush3.bf16.msra.mxu1 %v2061_v60 }
0x1075   : > { %3660 = vmatprep.subr.bf16.mxu1 %v4060_v33 }
0x1076   : > { %v3926_v15 = vpop.eup %3925 }
0x1077   : > { %v2037_v1 = vmul.f32 %v3926_v15, %v3918_v30  ;;  %v2233_v28 = vpop.permute.xlu0 %2232  ;;  %v2235_v30 = vpop.permute.xlu1 %2234 }
0x1078   : > { %3661 = vmatpush3.bf16.msra.mxu1 %v2063_v61  ;;  %v2252_v29 = vsel %vm604_vm1, %v2233_v28, 0 }
0x1079   : > { %3666 = vmatprep.subr.bf16.mxu1 %v4060_v33 }
0x107a   : > { %v3928_v0 = vpop.eup %3927 }
0x107b   : > { %v2038_v16 = vmul.f32 %v3928_v0, %v3920_v31  ;;  %v2255_v31 = vsel %vm604_vm1, %v2235_v30, 0  ;;  %v2237_v36 = vpop.permute.xlu0 %2236  ;;  %v2239_v38 = vpop.permute.xlu1 %2238 }
0x107c   : > { %v2258_v37 = vsel %vm604_vm1, %v2237_v36, 0  ;;  %v2261_v39 = vsel %vm604_vm1, %v2239_v38, 0 }
0x107d   : > { %v2039_v3 = vpack.c.bf16 %v2038_v16, %v2037_v1 }
0x107f   : > { %3663 = vmatmul.mubr.bf16.vlgmr.msra.gmra.mrb[68].mxu1 %v2039_v3  ;;  %v2241_v40 = vpop.permute.xlu0 %2240  ;;  %v2243_v44 = vpop.permute.xlu1 %2242 }
0x1080   : > { %3667 = vmatpush3.bf16.msra.mxu1 %v3853_v2  ;;  %3670 = vmatprep.mubr.msk.bf16.mxu1 %vm4061_vm0, %v4060_v33  ;;  %v2264_v41 = vsel %vm604_vm1, %v2241_v40, 0  ;;  %v2267_v47 = vsel %vm604_vm1, %v2243_v44, 0 }
0x1081   : > { %3668 = vmatprep.subr.bf16.mxu1 %v4060_v33 }
0x1083   : > { %v2245_v49 = vpop.permute.xlu0 %2244  ;;  %v2247_v52 = vpop.permute.xlu1 %2246 }
0x1084   : > { %3669 = vmatpush3.bf16.msra.mxu1 %v3854_v4  ;;  %v2270_v51 = vsel %vm604_vm1, %v2245_v49, 0  ;;  %v2273_v54 = vsel %vm604_vm1, %v2247_v52, 0 }
0x1085   : > { %3674 = vmatprep.subr.bf16.mxu1 %v4060_v33 }
0x1087   : > { %v2231_v55 = vpop.permute.xlu0 %2230 }
0x10dd   : > { %v1912_v5 = vpop.f32.mrb[64].mxu1 }
0x10de   : > { %v3624_v10 = vpop.f32.mrb[65].mxu1 }
0x10df   : > { %v1915_v8 = vpop.f32.mrb[66].mxu1 }
0x10e0   : > { %v1923_v11 = vpack.c.bf16 %v1915_v8, %v1912_v5  ;;  %v3625_v9 = vpop.f32.mrb[67].mxu1 }
0x1152   : > { %v2106_v24 = vpop.f32.mrb[68].mxu1 }
0x1153   : > { %v3664_v14 = vpop.f32.mrb[69].mxu1 }
0x1154   : > { %v2109_v17 = vpop.f32.mrb[70].mxu1 }
0x1155   : > { %v2117_v18 = vpack.c.bf16 %v2109_v17, %v2106_v24  ;;  %v3665_v23 = vpop.f32.mrb[71].mxu1 }
0x1157   : > { %3671 = vmatmul.mubr.msk.bf16.vlgmr.msra.gmra.mrb[72].mxu1 %vm604_vm1, %v2117_v18 }
0x1158   : > { %3675 = vmatpush3.bf16.msra.mxu1 %v3855_v19  ;;  %3678 = vmatprep.mubr.msk.bf16.mxu1 %vm4061_vm0, %v4060_v33 }
0x1159   : > { %3676 = vmatprep.subr.bf16.mxu1 %v4060_v33 }
0x115c   : > { %3677 = vmatpush3.bf16.msra.mxu1 %v3856_v46 }
0x115d   : > { %3682 = vmatprep.subr.bf16.mxu1 %v4060_v33 }
0x115f   : > { %3679 = vmatmul.mubr.msk.bf16.vlgmr.msra.gmra.mrb[76].mxu1 %vm604_vm1, %v1923_v11 }
0x1160   : > { %3698 = vmatprep.mubr.msk.bf16.mxu1 %vm4061_vm0, %v4060_v33 }
0x1165   : > { %3683 = vmatpush3.bf16.xpose.msra.mxu1 %v2252_v29 }
0x1166   : > { %3684 = vmatprep.subr.bf16.mxu1 %v4060_v33 }
0x116d   : > { %3685 = vmatpush3.bf16.xpose.msra.mxu1 %v2255_v31 }
0x116e   : > { %3686 = vmatprep.subr.bf16.mxu1 %v4060_v33 }
0x1175   : > { %3687 = vmatpush3.bf16.xpose.msra.mxu1 %v2258_v37 }
0x1176   : > { %3688 = vmatprep.subr.bf16.mxu1 %v4060_v33 }
0x117d   : > { %3689 = vmatpush3.bf16.xpose.msra.mxu1 %v2261_v39  ;;  %v3857_v39 = vld [vmem:[%s4231_s28 + $0x60] sm:$0xff]  }
0x117e   : > { %3690 = vmatprep.subr.bf16.mxu1 %v4060_v33 }
0x1185   : > { %3691 = vmatpush3.bf16.xpose.msra.mxu1 %v2264_v41 }
0x1186   : > { %3692 = vmatprep.subr.bf16.mxu1 %v4060_v33 }
0x118d   : > { %3693 = vmatpush3.bf16.xpose.msra.mxu1 %v2267_v47 }
0x118e   : > { %3694 = vmatprep.subr.bf16.mxu1 %v4060_v33 }
0x1195   : > { %3695 = vmatpush3.bf16.xpose.msra.mxu1 %v2270_v51 }
0x1196   : > { %3696 = vmatprep.subr.bf16.mxu1 %v4060_v33 }
0x119d   : > { %3697 = vmatpush3.bf16.xpose.msra.mxu1 %v2273_v54 }
0x119e   : > { %3750 = vmatprep.subr.bf16.mxu1 %v4060_v33 }
0x11a4   : > { %3699 = vmatmul.mubr.msk.bf16.vlgmr.msra.gmra.mrb[80].mxu1 %vm604_vm1, %v2231_v55 }
0x11a5   : > { %3766 = vmatprep.mubr.msk.bf16.mxu1 %vm4061_vm0, %v4060_v33 }
0x122a   : > { %v2167_v56 = vpop.f32.mrb[72].mxu1 }
0x122b   : > { %v3672_v59 = vpop.f32.mrb[73].mxu1 }
0x122c   : > { %v2170_v60 = vpop.f32.mrb[74].mxu1 }
0x122d   : > { %v3673_v61 = vpop.f32.mrb[75].mxu1 }
0x1232   : > { %v2223_v15 = vpop.f32.mrb[76].mxu1 }
0x1233   : > { %v4824_v0 = vadd.f32 %v2223_v15, %v2167_v56  ;;  %v3680_v1 = vpop.f32.mrb[77].mxu1 }
0x1234   : > { %v2226_v16 = vpop.f32.mrb[78].mxu1 }
0x1235   : > { %v4826_v2 = vadd.f32 %v2226_v16, %v2170_v60  ;;  %v3681_v3 = vpop.f32.mrb[79].mxu1 }
0x1277   : > { %v2309_v4 = vpop.f32.mrb[80].mxu1 }
0x1278   : > { %v3700_v5 = vpop.f32.mrb[81].mxu1  ;;  %v2316_v10 = vsel %vm1769_vm5, %v2309_v4, -1e+30 }
0x1279   : > { %2318 = vmax.xlane.f32.xlu1 %v2316_v10  ;;  %v2312_v8 = vpop.f32.mrb[82].mxu1 }
0x127a   : > { %v3701_v11 = vpop.f32.mrb[83].mxu1  ;;  %v2317_v9 = vsel %vm1769_vm5, %v2312_v8, -1e+30 }
0x127b   : > { %2320 = vmax.xlane.f32.xlu0 %v2317_v9 }
0x128a   : > { %2339 = vrot.lane.b32.xlu1 %v4594_v35, %s4063_s11 }
0x128e   : > { %2345 = vrot.lane.b32.xlu1 %v4632_v13, %s4063_s11 }
0x1291   : > { %2337 = vrot.lane.b32.xlu0 %v4582_v20, %s4063_s11 }
0x1295   : > { %2341 = vrot.lane.b32.xlu0 %v4606_v50, %s4063_s11 }
0x1299   : > { %2343 = vrot.lane.b32.xlu0 %v4618_v63, %s4063_s11 }
0x129d   : > { %2347 = vrot.lane.b32.xlu0 %v4669_v45, %s4063_s11 }
0x12a1   : > { %2351 = vrot.lane.b32.xlu0 %v4699_v7, %s4063_s11 }
0x12a5   : > { %2469 = vrot.lane.b32.xlu0 %v4592_v34, %s4064_s14 }
0x12a9   : > { %2473 = vrot.lane.b32.xlu0 %v4616_v62, %s4064_s14 }
0x12ad   : > { %2477 = vrot.lane.b32.xlu0 %v4667_v21, %s4064_s14 }
0x12b1   : > { %2481 = vrot.lane.b32.xlu0 %v4697_v6, %s4064_s14 }
0x1306   : > { %v2319_v24 = vpop.xlane.xlu1 %2318 }
0x1307   : > { %v2322_v14 = vsub.f32 %v2316_v10, %v2319_v24 }
0x1308   : > { %v2321_v17 = vpop.xlane.xlu0 %2320 }
0x1309   : > { %v2324_v19 = vmul.f32 1.442695, %v2322_v14  ;;  %v2323_v18 = vsub.f32 %v2317_v9, %v2321_v17 }
0x130a   : > { %v2340_v34 = vpop.permute.xlu1 %2339 }
0x130b   : > { %3929 = vpow2.f32 %v2324_v19  ;;  %v2326_v23 = vmul.f32 1.442695, %v2323_v18 }
0x130c   : > { %v2338_v46 = vpop.permute.xlu0 %2337 }
0x130d   : > { %3703 = vmatpush3.bf16.msra.mxu0 %v2338_v46  ;;  %3931 = vpow2.f32 %v2326_v23 }
0x130e   : > { %3704 = vmatprep.subr.bf16.mxu0 %v4060_v33  ;;  %v2346_v29 = vpop.permute.xlu1 %2345 }
0x1310   : > { %v2342_v62 = vpop.permute.xlu0 %2341 }
0x1311   : > { %3705 = vmatpush3.bf16.msra.mxu0 %v2340_v34 }
0x1312   : > { %3706 = vmatprep.subr.bf16.mxu0 %v4060_v33 }
0x1314   : > { %v2344_v6 = vpop.permute.xlu0 %2343 }
0x1315   : > { %v3930_v21 = vpop.eup %3929  ;;  %3707 = vmatpush3.bf16.msra.mxu0 %v2342_v62 }
0x1316   : > { %2328 = vadd.xlane.f32.xlu1 %v3930_v21  ;;  %3708 = vmatprep.subr.bf16.mxu0 %v4060_v33 }
0x1317   : > { %v3932_v28 = vpop.eup %3931 }
0x1318   : > { %v2348_v30 = vpop.permute.xlu0 %2347 }
0x1319   : > { %3709 = vmatpush3.bf16.msra.mxu0 %v2344_v6 }
0x131a   : > { %2330 = vadd.xlane.f32.xlu1 %v3932_v28  ;;  %3710 = vmatprep.subr.bf16.mxu0 %v4060_v33 }
0x131d   : > { %3711 = vmatpush3.bf16.msra.mxu0 %v2346_v29 }
0x131e   : > { %3712 = vmatprep.subr.bf16.mxu0 %v4060_v33 }
0x1321   : > { %3713 = vmatpush3.bf16.msra.mxu0 %v2348_v30 }
0x1322   : > { %3714 = vmatprep.subr.bf16.mxu0 %v4060_v33 }
0x132b   : > { %2349 = vrot.lane.b32.xlu1 %v4684_v43, %s4063_s11 }
0x132f   : > { %2467 = vrot.lane.b32.xlu1 %v4580_v58, %s4064_s14  ;;  %v2352_v58 = vpop.permute.xlu0 %2351 }
0x1333   : > { %2471 = vrot.lane.b32.xlu1 %v4604_v48, %s4064_s14  ;;  %v2470_v55 = vpop.permute.xlu0 %2469 }
0x1334   : > { %v2490_v56 = vsel %vm604_vm1, %v2470_v55, 0 }
0x1337   : > { %2475 = vrot.lane.b32.xlu1 %v4630_v12, %s4064_s14  ;;  %v2474_v61 = vpop.permute.xlu0 %2473 }
0x1338   : > { %v2496_v15 = vsel %vm604_vm1, %v2474_v61, 0 }
0x133b   : > { %2479 = vrot.lane.b32.xlu1 %v4682_v42, %s4064_s14  ;;  %v2478_v3 = vpop.permute.xlu0 %2477 }
0x133c   : > { %v2502_v4 = vsel %vm604_vm1, %v2478_v3, 0 }
0x133f   : > { %2465 = vrot.lane.b32.xlu1 %v4709_v26, %s4064_s14  ;;  %v3858_v26 = vld [vmem:[%s4231_s28 + $0x68] sm:$0xff]   ;;  %v2482_v8 = vpop.permute.xlu0 %2481 }
0x1340   : > { %v2508_v11 = vsel %vm604_vm1, %v2482_v8, 0 }
0x13a3   : > { %v2329_v31 = vpop.xlane.xlu1 %2328 }
0x13a4   : > { %3933 = vrcp.f32 %v2329_v31 }
0x13a7   : > { %v2331_v36 = vpop.xlane.xlu1 %2330 }
0x13a8   : > { %3935 = vrcp.f32 %v2331_v36 }
0x13ab   : > { %v2350_v37 = vpop.permute.xlu1 %2349 }
0x13ac   : > { %3715 = vmatpush3.bf16.msra.mxu0 %v2350_v37 }
0x13ad   : > { %3716 = vmatprep.subr.bf16.mxu0 %v4060_v33 }
0x13ae   : > { %v3934_v48 = vpop.eup %3933 }
0x13af   : > { %v2334_v42 = vmul.f32 %v3934_v48, %v3930_v21  ;;  %v2468_v47 = vpop.permute.xlu1 %2467 }
0x13b0   : > { %3717 = vmatpush3.bf16.msra.mxu0 %v2352_v58  ;;  %v2487_v54 = vsel %vm604_vm1, %v2468_v47, 0 }
0x13b1   : > { %3722 = vmatprep.subr.bf16.mxu0 %v4060_v33 }
0x13b2   : > { %v3936_v12 = vpop.eup %3935 }
0x13b3   : > { %v2335_v38 = vmul.f32 %v3936_v12, %v3932_v28  ;;  %v2472_v59 = vpop.permute.xlu1 %2471 }
0x13b4   : > { %v2493_v60 = vsel %vm604_vm1, %v2472_v59, 0  ;;  %v2702_v59 = vld [vmem:[%s4242_s29 + $0x4] ss:$0 sm:$0xff] }
0x13b5   : > { %v2336_v40 = vpack.c.bf16 %v2335_v38, %v2334_v42 }
0x13b7   : > { %3719 = vmatmul.mubr.bf16.vlgmr.msra.gmra.mrb[36].mxu0 %v2336_v40  ;;  %v2476_v1 = vpop.permute.xlu1 %2475 }
0x13b8   : > { %3723 = vmatpush3.bf16.msra.mxu0 %v3857_v39  ;;  %3726 = vmatprep.mubr.msk.bf16.mxu0 %vm4061_vm0, %v4060_v33  ;;  %v2499_v16 = vsel %vm604_vm1, %v2476_v1, 0 }
0x13b9   : > { %3724 = vmatprep.subr.bf16.mxu0 %v4060_v33 }
0x13bb   : > { %v2480_v5 = vpop.permute.xlu1 %2479 }
0x13bc   : > { %3725 = vmatpush3.bf16.msra.mxu0 %v3858_v26  ;;  %v2505_v10 = vsel %vm604_vm1, %v2480_v5, 0  ;;  %v3859_v26 = vld [vmem:[%s4231_s28 + $0x70] sm:$0xff]   ;;  %v2735_v5 = vld [vmem:[%s4225_s12 + $0x58] sm:$0xff] }
0x13bd   : > { %3730 = vmatprep.subr.bf16.mxu0 %v4060_v33 }
0x13bf   : > { %v2466_v9 = vpop.permute.xlu1 %2465 }
0x148a   : > { %v2395_v41 = vpop.f32.mrb[36].mxu0 }
0x148b   : > { %v3720_v44 = vpop.f32.mrb[37].mxu0 }
0x148c   : > { %v2398_v49 = vpop.f32.mrb[38].mxu0 }
0x148d   : > { %v2406_v51 = vpack.c.bf16 %v2398_v49, %v2395_v41  ;;  %v3721_v52 = vpop.f32.mrb[39].mxu0 }
0x148f   : > { %3727 = vmatmul.mubr.msk.bf16.vlgmr.msra.gmra.mrb[40].mxu0 %vm604_vm1, %v2406_v51 }
0x1490   : > { %3731 = vmatpush3.bf16.xpose.msra.mxu0 %v2487_v54  ;;  %3746 = vmatprep.mubr.msk.bf16.mxu0 %vm4061_vm0, %v4060_v33 }
0x1491   : > { %3732 = vmatprep.subr.bf16.mxu0 %v4060_v33 }
0x1498   : > { %3733 = vmatpush3.bf16.xpose.msra.mxu0 %v2490_v56 }
0x1499   : > { %3734 = vmatprep.subr.bf16.mxu0 %v4060_v33 }
0x14a0   : > { %3735 = vmatpush3.bf16.xpose.msra.mxu0 %v2493_v60 }
0x14a1   : > { %3736 = vmatprep.subr.bf16.mxu0 %v4060_v33 }
0x14a8   : > { %3737 = vmatpush3.bf16.xpose.msra.mxu0 %v2496_v15 }
0x14a9   : > { %3738 = vmatprep.subr.bf16.mxu0 %v4060_v33 }
0x14b0   : > { %3739 = vmatpush3.bf16.xpose.msra.mxu0 %v2499_v16 }
0x14b1   : > { %3740 = vmatprep.subr.bf16.mxu0 %v4060_v33 }
0x14b8   : > { %3741 = vmatpush3.bf16.xpose.msra.mxu0 %v2502_v4  ;;  %v2734_v4 = vld [vmem:[%s4225_s12 + $0x38] sm:$0xff] }
0x14b9   : > { %3742 = vmatprep.subr.bf16.mxu0 %v4060_v33 }
0x14c0   : > { %3743 = vmatpush3.bf16.xpose.msra.mxu0 %v2505_v10 }
0x14c1   : > { %3744 = vmatprep.subr.bf16.mxu0 %v4060_v33 }
0x14c8   : > { %3745 = vmatpush3.bf16.xpose.msra.mxu0 %v2508_v11  ;;  %v2736_v11 = vld [vmem:[%s4225_s12 + $0x78] sm:$0xff] }
0x14cf   : > { %3747 = vmatmul.mubr.msk.bf16.vlgmr.msra.gmra.mrb[44].mxu0 %vm604_vm1, %v2466_v9  ;;  %v3281_v9 = vcombine.high %v2735_v5, %v2736_v11 }
0x1562   : > { %v2456_v24 = vpop.f32.mrb[40].mxu0 }
0x1563   : > { %v4900_v14 = vadd.f32 %v2456_v24, %v4824_v0  ;;  %v3728_v17 = vpop.f32.mrb[41].mxu0 }
0x1564   : > { %v2459_v19 = vpop.f32.mrb[42].mxu0 }
0x1565   : > { %v4903_v18 = vadd.f32 %v2459_v19, %v4826_v2  ;;  %v3729_v23 = vpop.f32.mrb[43].mxu0 }
0x15a2   : > { %v2544_v46 = vpop.f32.mrb[44].mxu0 }
0x15a3   : > { %v3748_v34 = vpop.f32.mrb[45].mxu0  ;;  %v2551_v62 = vsel %vm1769_vm5, %v2544_v46, -1e+30 }
0x15a4   : > { %2553 = vmax.xlane.f32.xlu0 %v2551_v62  ;;  %v2547_v21 = vpop.f32.mrb[46].mxu0  ;;  %v2737_v34 = vld [vmem:[%s4225_s12 + $0x98] sm:$0xff] }
0x15a5   : > { %v3749_v6 = vpop.f32.mrb[47].mxu0  ;;  %v2552_v28 = vsel %vm1769_vm5, %v2547_v21, -1e+30 }
0x15a6   : > { %2555 = vmax.xlane.f32.xlu1 %v2552_v28 }
0x15b7   : > { %2574 = vrot.lane.b32.xlu1 %v4594_v35, %s4064_s14 }
0x15ba   : > { %2572 = vrot.lane.b32.xlu0 %v4582_v20, %s4064_s14 }
0x15bb   : > { %2582 = vrot.lane.b32.xlu1 %v4669_v45, %s4064_s14 }
0x15be   : > { %2576 = vrot.lane.b32.xlu0 %v4606_v50, %s4064_s14 }
0x15c2   : > { %2578 = vrot.lane.b32.xlu0 %v4618_v63, %s4064_s14 }
0x15c6   : > { %2580 = vrot.lane.b32.xlu0 %v4632_v13, %s4064_s14 }
0x15ca   : > { %2584 = vrot.lane.b32.xlu0 %v4684_v43, %s4064_s14 }
0x1631   : > { %v2554_v57 = vpop.xlane.xlu0 %2553 }
0x1632   : > { %v2557_v35 = vsub.f32 %v2551_v62, %v2554_v57  ;;  %v2738_v62 = vld [vmem:[%s4225_s12 + $0xb8] sm:$0xff] }
0x1633   : > { %v2556_v0 = vpop.xlane.xlu1 %2555  ;;  %v3283_v21 = vcombine.high %v2737_v34, %v2738_v62  ;;  %v3282_v6 = vcombine.low %v2737_v34, %v2738_v62  ;;  %v2740_v57 = vld [vmem:[%s4225_s12 + $0xf8] sm:$0xff] }
0x1634   : > { %v2559_v2 = vmul.f32 1.442695, %v2557_v35  ;;  %v2558_v20 = vsub.f32 %v2552_v28, %v2556_v0  ;;  %v2739_v28 = vld [vmem:[%s4225_s12 + $0xd8] sm:$0xff] }
0x1635   : > { %v2573_v29 = vpop.permute.xlu0 %2572  ;;  %v3285_v35 = vcombine.high %v2739_v28, %v2740_v57  ;;  %v3284_v0 = vcombine.low %v2739_v28, %v2740_v57 }
0x1636   : > { %3937 = vpow2.f32 %v2559_v2  ;;  %v2561_v45 = vmul.f32 1.442695, %v2558_v20  ;;  %3751 = vmatpush3.bf16.msra.mxu1 %v2573_v29  ;;  %v2741_v2 = vld [vmem:[%s4225_s12 + $0x118] sm:$0xff] }
0x1637   : > { %3752 = vmatprep.subr.bf16.mxu1 %v4060_v33  ;;  %v2575_v50 = vpop.permute.xlu1 %2574  ;;  %v2742_v20 = vld [vmem:[%s4225_s12 + $0x138] sm:$0xff] }
0x1638   : > { %3939 = vpow2.f32 %v2561_v45  ;;  %v3287_v29 = vcombine.high %v2741_v2, %v2742_v20  ;;  %v3286_v45 = vcombine.low %v2741_v2, %v2742_v20 }
0x1639   : > { %v2577_v30 = vpop.permute.xlu0 %2576 }
0x163a   : > { %3753 = vmatpush3.bf16.msra.mxu1 %v2575_v50  ;;  %v2743_v50 = vld [vmem:[%s4225_s12 + $0x158] sm:$0xff] }
0x163b   : > { %3754 = vmatprep.subr.bf16.mxu1 %v4060_v33  ;;  %v2583_v36 = vpop.permute.xlu1 %2582 }
0x163d   : > { %v2579_v63 = vpop.permute.xlu0 %2578 }
0x163e   : > { %3755 = vmatpush3.bf16.msra.mxu1 %v2577_v30  ;;  %v2744_v30 = vld [vmem:[%s4225_s12 + $0x178] sm:$0xff] }
0x163f   : > { %3756 = vmatprep.subr.bf16.mxu1 %v4060_v33 }
0x1640   : > { %v3938_v13 = vpop.eup %3937 }
0x1641   : > { %2563 = vadd.xlane.f32.xlu1 %v3938_v13  ;;  %v2581_v31 = vpop.permute.xlu0 %2580 }
0x1642   : > { %3757 = vmatpush3.bf16.msra.mxu1 %v2579_v63  ;;  %v3940_v43 = vpop.eup %3939  ;;  %v3289_v63 = vcombine.high %v2743_v50, %v2744_v30 }
0x1643   : > { %3758 = vmatprep.subr.bf16.mxu1 %v4060_v33 }
0x1645   : > { %2565 = vadd.xlane.f32.xlu1 %v3940_v43  ;;  %v2585_v37 = vpop.permute.xlu0 %2584 }
0x1646   : > { %3759 = vmatpush3.bf16.msra.mxu1 %v2581_v31  ;;  %v2746_v31 = vld [vmem:[%s4225_s12 + $0x1b8] sm:$0xff] }
0x1647   : > { %3760 = vmatprep.subr.bf16.mxu1 %v4060_v33 }
0x164a   : > { %3761 = vmatpush3.bf16.msra.mxu1 %v2583_v36 }
0x164b   : > { %3762 = vmatprep.subr.bf16.mxu1 %v4060_v33 }
0x164e   : > { %3763 = vmatpush3.bf16.msra.mxu1 %v2585_v37 }
0x164f   : > { %3764 = vmatprep.subr.bf16.mxu1 %v4060_v33 }
0x1656   : > { %2586 = vrot.lane.b32.xlu1 %v4699_v7, %s4064_s14  ;;  %v3860_v7 = vld [vmem:[%s4231_s28 + $0x78] sm:$0xff]  }
0x16ce   : > { %v2564_v58 = vpop.xlane.xlu1 %2563 }
0x16cf   : > { %3941 = vrcp.f32 %v2564_v58  ;;  %v2747_v58 = vld [vmem:[%s4225_s12 + $0x1d8] sm:$0xff] }
0x16d2   : > { %v2566_v48 = vpop.xlane.xlu1 %2565 }
0x16d3   : > { %3943 = vrcp.f32 %v2566_v48  ;;  %v2748_v48 = vld [vmem:[%s4225_s12 + $0x1f8] sm:$0xff] }
0x16d6   : > { %v2587_v12 = vpop.permute.xlu1 %2586 }
0x16d7   : > { %3765 = vmatpush3.bf16.msra.mxu1 %v2587_v12  ;;  %v3292_v12 = vcombine.low %v2747_v58, %v2748_v48 }
0x16d8   : > { %3770 = vmatprep.subr.bf16.mxu1 %v4060_v33 }
0x16d9   : > { %v3942_v42 = vpop.eup %3941 }
0x16da   : > { %v2569_v39 = vmul.f32 %v3942_v42, %v3938_v13  ;;  %v3288_v13 = vcombine.low %v2743_v50, %v2744_v30  ;;  %v3293_v42 = vcombine.high %v2747_v58, %v2748_v48 }
0x16dd   : > { %v3944_v38 = vpop.eup %3943 }
0x16de   : > { %v2570_v40 = vmul.f32 %v3944_v38, %v3940_v43  ;;  %v2745_v43 = vld [vmem:[%s4225_s12 + $0x198] sm:$0xff]  ;;  %v3861_v38 = vld [vmem:[%s4231_s28 + $0xc0] sm:$0xff]  }
0x16df   : > { %v3291_v36 = vcombine.high %v2745_v43, %v2746_v31  ;;  %v3290_v37 = vcombine.low %v2745_v43, %v2746_v31  ;;  %3444 = vmatprep.subr.bf16.mxu0 %v3861_v38 }
0x16e0   : > { %v2571_v41 = vpack.c.bf16 %v2570_v40, %v2569_v39  ;;  %v3862_v39 = vld [vmem:[%s4231_s28 + $0x80] sm:$0xff]   ;;  %v3863_v40 = vld [vmem:[%s4231_s28 + $0xc8] sm:$0xff]  }
0x16e1   : > { %3445 = vmatpush3.bf16.msra.mxu0 %v3862_v39 }
0x16e2   : > { %3767 = vmatmul.mubr.bf16.vlgmr.msra.gmra.mrb[84].mxu1 %v2571_v41  ;;  %3446 = vmatprep.subr.bf16.mxu0 %v3863_v40  ;;  %v3865_v41 = vld [vmem:[%s4231_s28 + $0xd0] sm:$0xff]  }
0x16e3   : > { %3771 = vmatpush3.bf16.msra.mxu1 %v3859_v26  ;;  %3774 = vmatprep.mubr.msk.bf16.mxu1 %vm4061_vm0, %v4060_v33  ;;  %v3864_v26 = vld [vmem:[%s4231_s28 + $0x88] sm:$0xff]  }
0x16e4   : > { %3772 = vmatprep.subr.bf16.mxu1 %v4060_v33 }
0x16e5   : > { %3447 = vmatpush3.bf16.msra.mxu0 %v3864_v26 }
0x16e6   : > { %3448 = vmatprep.subr.bf16.mxu0 %v3865_v41 }
0x16e7   : > { %3773 = vmatpush3.bf16.msra.mxu1 %v3860_v7  ;;  %v3866_v7 = vld [vmem:[%s4231_s28 + $0x90] sm:$0xff]  }
0x16e9   : > { %3449 = vmatpush3.bf16.msra.mxu0 %v3866_v7 }
0x17b5   : > { %v2630_v44 = vpop.f32.mrb[84].mxu1 }
0x17b6   : > { %v3768_v47 = vpop.f32.mrb[85].mxu1 }
0x17b7   : > { %v2633_v49 = vpop.f32.mrb[86].mxu1  ;;  %v3868_v47 = vld [vmem:[%s4231_s28 + $0x98] sm:$0xff]  }
0x17b8   : > { %v2641_v51 = vpack.c.bf16 %v2633_v49, %v2630_v44  ;;  %v3769_v52 = vpop.f32.mrb[87].mxu1  ;;  %v3867_v44 = vld [vmem:[%s4231_s28 + $0xd8] sm:$0xff]   ;;  %v3869_v49 = vld [vmem:[%s4231_s28 + $0xe0] sm:$0xff]  }
0x17b9   : > { %3450 = vmatprep.subr.bf16.mxu0 %v3867_v44  ;;  %v3871_v52 = vld [vmem:[%s4231_s28 + $0xe8] sm:$0xff]  }
0x17ba   : > { %3775 = vmatmul.mubr.msk.bf16.vlgmr.msra.gmra.mrb[88].mxu1 %vm604_vm1, %v2641_v51  ;;  %3451 = vmatpush3.bf16.msra.mxu0 %v3868_v47  ;;  %v3870_v51 = vld [vmem:[%s4231_s28 + $0xa0] sm:$0xff]  }
0x17bb   : > { %2875 = vmatprep.mubr.bf16.mxu1 %v4059_v32  ;;  %v2733_v32 = vld [vmem:[%s4225_s12 + $0x18] sm:$0xff]  ;;  %3452 = vmatprep.subr.bf16.mxu0 %v3869_v49 }
0x17bc   : > { %v3278_v10 = vcombine.low %v2733_v32, %v2734_v4  ;;  %v3279_v8 = vcombine.high %v2733_v32, %v2734_v4  ;;  %v2706_v4 = vld [vmem:[%s4242_s29 + $0x1a] ss:$0 sm:$0xff] }
0x17be   : > { %2843 = vmatprep.subr.bf16.mxu1 %v3279_v8  ;;  %3453 = vmatpush3.bf16.msra.mxu0 %v3870_v51 }
0x17bf   : > { %2844 = vmatpush1.bf16.msra.mxu1 %v3278_v10  ;;  %3454 = vmatprep.subr.bf16.mxu0 %v3871_v52 }
0x17c0   : > { %2845 = vmatprep.subr.bf16.mxu1 %v3281_v9  ;;  %v3872_v9 = vld [vmem:[%s4231_s28 + $0xa8] sm:$0xff]  }
0x17c2   : > { %3455 = vmatpush3.bf16.msra.mxu0 %v3872_v9 }
0x188d   : > { %v2691_v54 = vpop.f32.mrb[88].mxu1 }
0x188e   : > { %v2698_v55 = vadd.f32 %v2691_v54, %v4900_v14  ;;  %v3776_v56 = vpop.f32.mrb[89].mxu1 }
0x188f   : > { %v2694_v33 = vpop.f32.mrb[90].mxu1 }
0x1890   : > { %v2700_v60 = vadd.f32 %v2698_v55, %v4640_v22  ;;  %v2699_v61 = vadd.f32 %v2694_v33, %v4903_v18  ;;  %v3777_v15 = vpop.f32.mrb[91].mxu1  ;;  %v3280_v22 = vcombine.low %v2735_v5, %v2736_v11 }
0x1892   : > { %v2701_v1 = vadd.f32 %v2699_v61, %v4642_v53  ;;  %v2703_v16 = vadd.f32 %v2702_v59, %v2700_v60  ;;  %2846 = vmatpush1.bf16.msra.mxu1 %v3280_v22  ;;  %v3873_v22 = vld [vmem:[%s4231_s28 + $0xf0] sm:$0xff]  }
0x1893   : > { %2847 = vmatprep.subr.bf16.mxu1 %v3283_v21  ;;  %3456 = vmatprep.subr.bf16.mxu0 %v3873_v22 }
0x1894   : > { %2707 = vadd.xlane.f32.xlu0 %v2703_v16  ;;  %v2704_v3 = vadd.f32 %v2702_v59, %v2701_v1  ;;  %v2705_v1 = vld [vmem:[%s4242_s29 + $0x19] ss:$0 sm:$0xff] }
0x1896   : > { %2709 = vadd.xlane.f32.xlu1 %v2704_v3  ;;  %2848 = vmatpush1.bf16.msra.mxu1 %v3282_v6 }
0x1897   : > { %2849 = vmatprep.subr.bf16.mxu1 %v3285_v35 }
0x189a   : > { %2850 = vmatpush1.bf16.msra.mxu1 %v3284_v0 }
0x189b   : > { %2851 = vmatprep.subr.bf16.mxu1 %v3287_v29 }
0x189e   : > { %2852 = vmatpush1.bf16.msra.mxu1 %v3286_v45 }
0x189f   : > { %2853 = vmatprep.subr.bf16.mxu1 %v3289_v63 }
0x18a2   : > { %2854 = vmatpush1.bf16.msra.mxu1 %v3288_v13  ;;  %v3063_v13 = vld [vmem:[%s4242_s29 + $0x6] ss:$0 sm:$0xff] }
0x18a3   : > { %2855 = vmatprep.subr.bf16.mxu1 %v3291_v36 }
0x18a6   : > { %2856 = vmatpush1.bf16.msra.mxu1 %v3290_v37 }
0x18a7   : > { %2857 = vmatprep.subr.bf16.mxu1 %v3293_v42 }
0x18aa   : > { %2858 = vmatpush1.bf16.msra.mxu1 %v3292_v12 }
0x1921   : > { %v2708_v24 = vpop.xlane.xlu0 %2707 }
0x1922   : > { %v2711_v53 = vmul.f32 0.0078125, %v2708_v24  ;;  %v3874_v24 = vld [vmem:[%s4231_s28 + $0xb0] sm:$0xff]  }
0x1923   : > { %v2710_v14 = vpop.xlane.xlu1 %2709  ;;  %3457 = vmatpush3.bf16.msra.mxu0 %v3874_v24 }
0x1924   : > { %v4949_v17 = vsub.f32 %v2703_v16, %v2711_v53  ;;  %v2712_v19 = vmul.f32 0.0078125, %v2710_v14  ;;  %v3875_v53 = vld [vmem:[%s4231_s28 + $0xf8] sm:$0xff]  }
0x1925   : > { %v3876_v14 = vld [vmem:[%s4231_s28 + $0xb8] sm:$0xff]   ;;  %3458 = vmatprep.subr.bf16.mxu0 %v3875_v53 }
0x1926   : > { %v4951_v18 = vsub.f32 %v2704_v3, %v2712_v19  ;;  %v2715_v23 = vmul.f32 %v4949_v17, %v4949_v17 }
0x1927   : > { %3459 = vmatpush3.bf16.msra.mxu0 %v3876_v14 }
0x1928   : > { %2717 = vadd.xlane.f32.xlu0 %v2715_v23  ;;  %v2716_v46 = vmul.f32 %v4951_v18, %v4951_v18 }
0x192c   : > { %2719 = vadd.xlane.f32.xlu0 %v2716_v46 }
0x19b5   : > { %v2718_v54 = vpop.xlane.xlu0 %2717 }
0x19b6   : > { %v2721_v55 = vmul.f32 0.0078125, %v2718_v54 }
0x19b8   : > { %v2723_v56 = vadd.f32 1e-05, %v2721_v55  ;;  %v3066_v55 = vld [vmem:[%s4242_s29 + $0x1b] ss:$0 sm:$0xff] }
0x19b9   : > { %v2720_v33 = vpop.xlane.xlu0 %2719 }
0x19ba   : > { %3945 = vrsqrt.f32 %v2723_v56  ;;  %v2722_v59 = vmul.f32 0.0078125, %v2720_v33 }
0x19bc   : > { %v2724_v60 = vadd.f32 1e-05, %v2722_v59  ;;  %v3067_v59 = vld [vmem:[%s4242_s29 + $0x1c] ss:$0 sm:$0xff] }
0x19be   : > { %3947 = vrsqrt.f32 %v2724_v60 }
0x19c4   : > { %v3946_v61 = vpop.eup %3945 }
0x19c5   : > { %v2727_v15 = vmul.f32 %v3946_v61, %v4949_v17  ;;  %v3277_v17 = vld [vmem:[%s4242_s29 + $0x5] ss:$8 sm:$0x3] }
0x19c6   : > { %v2756_v19 = vrot.slane %v3277_v17, %v4323_v25 }
0x19c7   : > { %v2729_v32 = vmul.f32 %v2727_v15, %v2705_v1 }
0x19c8   : > { %v3948_v16 = vpop.eup %3947 }
0x19c9   : > { %v2728_v3 = vmul.f32 %v3948_v16, %v4951_v18  ;;  %v2731_v10 = vadd.f32 %v2729_v32, %v2706_v4  ;;  %v2760_v18 = vrot.slane %v3277_v17, %v4327_v27 }
0x19cb   : > { %v2730_v5 = vmul.f32 %v2728_v3, %v2705_v1 }
0x19cd   : > { %v2732_v8 = vadd.f32 %v2730_v5, %v2706_v4 }
0x19cf   : > { %v2749_v11 = vpack.c.bf16 %v2732_v8, %v2731_v10 }
0x19d1   : > { %2876 = vmatmul.mubr.bf16.vlgmr.msra.gmra.mrb[92].mxu1 %v2749_v11 }
0x1aa4   : > { %v2877_v23 = vpop.f32.mrb[92].mxu1 }
0x1aa5   : > { %v2878_v46 = vadd.f32 %v2877_v23, %v2756_v19  ;;  %v2879_v34 = vpop.f32.mrb[93].mxu1 }
0x1aa6   : > { %v2880_v62 = vadd.f32 %v2879_v34, %v2760_v18  ;;  %v2881_v21 = vpop.f32.mrb[94].mxu1 }
0x1aa7   : > { %v2882_v6 = vadd.f32 %v2881_v21, %v2756_v19  ;;  %v2883_v28 = vpop.f32.mrb[95].mxu1  ;;  %v2886_v35 = vmax.f32 %v2878_v46, 0.0 }
0x1aa8   : > { %v2884_v57 = vadd.f32 %v2883_v28, %v2760_v18  ;;  %v2887_v2 = vmax.f32 %v2880_v62, 0.0 }
0x1aa9   : > { %v2888_v0 = vmax.f32 %v2882_v6, 0.0 }
0x1aaa   : > { %v2889_v20 = vmax.f32 %v2884_v57, 0.0 }
0x1aab   : > { %v2922_v29 = vpack.c.bf16 %v2888_v0, %v2886_v35 }
0x1aac   : > { %v2923_v45 = vpack.c.bf16 %v2889_v20, %v2887_v2 }
0x1aae   : > { %3052 = vmatprep.mubr.bf16.mxu0 %v2923_v45 }
0x1aaf   : > { %3053 = vmatmul.mubr.bf16.vlgmr.msra.gmra.mrb[48].mxu0 %v2922_v29 }
0x1b82   : > { %v3460_v25 = vpop.f32.mrb[48].mxu0 }
0x1b83   : > { %v3461_v50 = vpop.f32.mrb[49].mxu0 }
0x1b84   : > { %v3462_v27 = vadd.f32 %v3461_v50, %v3460_v25  ;;  %v3463_v30 = vpop.f32.mrb[50].mxu0 }
0x1b85   : > { %v3464_v63 = vpop.f32.mrb[51].mxu0 }
0x1b86   : > { %v3061_v43 = vadd.f32 %v3462_v27, %v2731_v10  ;;  %v3465_v31 = vadd.f32 %v3464_v63, %v3463_v30 }
0x1b88   : > { %v3062_v36 = vadd.f32 %v3465_v31, %v2732_v8  ;;  %v3064_v37 = vadd.f32 %v3063_v13, %v3061_v43 }
0x1b8a   : > { %3068 = vadd.xlane.f32.xlu1 %v3064_v37  ;;  %v3065_v58 = vadd.f32 %v3063_v13, %v3062_v36 }
0x1b8c   : > { %3070 = vadd.xlane.f32.xlu0 %v3065_v58 }
0x1c17   : > { %v3069_v48 = vpop.xlane.xlu1 %3068 }
0x1c18   : > { %v3072_v12 = vmul.f32 0.0078125, %v3069_v48 }
0x1c19   : > { %v3071_v42 = vpop.xlane.xlu0 %3070 }
0x1c1a   : > { %v3074_v38 = vsub.f32 %v3064_v37, %v3072_v12  ;;  %v3073_v39 = vmul.f32 0.0078125, %v3071_v42 }
0x1c1c   : > { %v3075_v40 = vsub.f32 %v3065_v58, %v3073_v39  ;;  %v3076_v26 = vmul.f32 %v3074_v38, %v3074_v38 }
0x1c1e   : > { %3078 = vadd.xlane.f32.xlu1 %v3076_v26  ;;  %v3077_v41 = vmul.f32 %v3075_v40, %v3075_v40 }
0x1c20   : > { %3080 = vadd.xlane.f32.xlu0 %v3077_v41 }
0x1cab   : > { %v3079_v7 = vpop.xlane.xlu1 %3078 }
0x1cac   : > { %v3082_v44 = vmul.f32 0.0078125, %v3079_v7 }
0x1cad   : > { %v3081_v47 = vpop.xlane.xlu0 %3080 }
0x1cae   : > { %v3084_v49 = vadd.f32 1e-05, %v3082_v44  ;;  %v3083_v51 = vmul.f32 0.0078125, %v3081_v47 }
0x1cb0   : > { %3949 = vrsqrt.f32 %v3084_v49  ;;  %v3085_v52 = vadd.f32 1e-05, %v3083_v51 }
0x1cb2   : > { %3951 = vrsqrt.f32 %v3085_v52 }
0x1cba   : > { %v3950_v54 = vpop.eup %3949 }
0x1cbb   : > { %v3088_v56 = vmul.f32 %v3950_v54, %v3074_v38 }
0x1cbc   : > { %v3952_v33 = vpop.eup %3951 }
0x1cbd   : > { %v3090_v60 = vmul.f32 %v3088_v56, %v3066_v55  ;;  %v3089_v61 = vmul.f32 %v3952_v33, %v3075_v40 }
0x1cbf   : > { %v3092_v15 = vadd.f32 %v3090_v60, %v3067_v59  ;;  %v3091_v1 = vmul.f32 %v3089_v61, %v3066_v55 }
0x1cc1   : > { %3094 = vst [vmem:[%s5019_s5] sm:$0xff] %v3092_v15  ;;  %v3093_v16 = vadd.f32 %v3091_v1, %v3067_v59 }
0x1cc3   : > { %3095 = vst [vmem:[%s5019_s5 + $0x8] sm:$0xff] %v3093_v16 }
0x1cc4 PF: > { %p18_p3 = scmp.ge.s32.totalorder %s4117_s23, 4   ;;  %s5026_s18 = smov %s4043_s19 }
0x1cc5   : > { %s5027_s19 = smov %s4047_s20  ;;  %s5028_s20 = smov %s4127_s26 }
0x1cc6   : > { %s5029_s21 = smov %s4117_s23  ;;  %20 = sbr.rel (!%p18_p3) target bundleno = 5 (0x5), region = 98 }
0x1ccd   :  { %3107 = vsyncpa [#allocation3], 1 }
0x1cce   :  { %3109 = vsyncpa [#allocation3 + $0x1], 1 }
0x1ccf   :  { %3110 = vsyncpa [#allocation5], 1 }
0x1cd0   :  { %3112 = vsyncpa [#allocation5 + $0x1], 1 }

</bundles_post_ra>
